<compile_context>
chip_gen: v7x
topology: tpu7x:2x2x1
jax: 0.10.0
libtpu: 0.0.40
codegen_flags: <defaults>
</compile_context>

<pallas_src>
import jax
import jax.numpy as jnp
from jax import lax
from jax.experimental import pallas as pl
from jax.experimental.pallas import tpu as pltpu


# --------------------------- fully fused forward kernel ---------------------------
def _encoder1_kernel(feat_ref, feat_a_ref, adj_hbm, gn_hbm, w1_ref, w2_ref, wdT_ref,
                     hiden_hbm, h_hbm, logits_ref,
                     adj_vmem, gn_vmem, hiden_vmem, h_vmem, in_sems, out_sems):
    f32 = jnp.float32
    bf16 = jnp.bfloat16
    n_out = w1_ref.shape[1]

    # Kick off the HBM->VMEM DMAs for the two (N, N) matrices; they land while
    # the MXU is busy with the two feature pre-multiplies below.
    adj_cp = pltpu.make_async_copy(adj_hbm, adj_vmem, in_sems.at[0])
    gn_cp = pltpu.make_async_copy(gn_hbm, gn_vmem, in_sems.at[1])
    adj_cp.start()
    gn_cp.start()

    # zpre   = feat   @ w1      (dropout p=0.0 -> identity)
    # zpre_a = feat_a @ w1
    w1 = w1_ref[...]                                                   # (IN, OUT) bf16
    zpre = jnp.dot(feat_ref[...], w1, preferred_element_type=f32)      # (N, OUT)
    zpre_a = jnp.dot(feat_a_ref[...], w1, preferred_element_type=f32)  # (N, OUT)
    zc = jnp.concatenate([zpre.astype(bf16), zpre_a.astype(bf16)], axis=1)  # (N, 2*OUT)

    adj_cp.wait()
    adj = adj_vmem[...]                                                # (N, N) bf16

    # One fat dot for both views: [z | z_a] = adj @ [zpre | zpre_a]
    zz = jnp.dot(adj, zc, preferred_element_type=f32)                  # (N, 2*OUT)
    z = zz[:, :n_out]
    z_a = zz[:, n_out:]

    # hiden_emb = z : stage and start the writeback DMA immediately.
    hiden_vmem[...] = z
    hiden_cp = pltpu.make_async_copy(hiden_vmem, hiden_hbm, out_sems.at[0])
    hiden_cp.start()

    # h = (adj @ z) @ w2     (reassociated: fewer MACs, identical math)
    az = jnp.dot(adj, z.astype(bf16), preferred_element_type=f32)      # (N, OUT)
    h_vmem[...] = jnp.dot(az.astype(bf16), w2_ref[...],
                          preferred_element_type=f32)                  # (N, IN)
    h_cp = pltpu.make_async_copy(h_vmem, h_hbm, out_sems.at[1])
    h_cp.start()

    # emb = relu(z), emb_a = relu(z_a)   (VPU, free under MXU)
    emb = jnp.maximum(z, 0.0)
    emb_a = jnp.maximum(z_a, 0.0)

    # AvgReadout (+ F.normalize(p=2, dim=1)) + sigmoid, both views in one dot.
    # The per-row division by sum(graph_neigh) cancels exactly under the L2
    # normalization (row sums are strictly positive thanks to self-loops), so
    # it is omitted entirely.
    gn_cp.wait()
    ec = jnp.concatenate([emb.astype(bf16), emb_a.astype(bf16)], axis=1)  # (N, 2*OUT)
    vsum_all = jnp.dot(gn_vmem[...], ec, preferred_element_type=f32)      # (N, 2*OUT)

    def normalize_sigmoid(v):
        sumsq = jnp.sum(v * v, axis=1, keepdims=True)
        # x / max(||x||_2, 1e-12)  ==  x * rsqrt(max(||x||^2, 1e-24))
        return jax.nn.sigmoid(v * lax.rsqrt(jnp.maximum(sumsq, 1e-24)))

    g = normalize_sigmoid(vsum_all[:, :n_out])                         # (N, OUT)
    g_a = normalize_sigmoid(vsum_all[:, n_out:])                       # (N, OUT)

    # Discriminator nn.Bilinear(n_h, n_h, 1) (bias added in the wrapper):
    #   sc[n] = sum_{i,j} h[n,i] * W[i,j] * c[n,j]
    # wdT is W^T (pre-transposed on host), so (c @ wdT)[n,i] = sum_j c[n,j] W[i,j].
    gg = jnp.concatenate([g.astype(bf16), g_a.astype(bf16)], axis=0)   # (2N, OUT)
    t_all = jnp.dot(gg, wdT_ref[...], preferred_element_type=f32)      # (2N, OUT)
    n = z.shape[0]
    t = t_all[:n]
    t_a = t_all[n:]

    sc1 = jnp.sum(emb * t, axis=1, keepdims=True)                      # ret[:, 0]
    sc2 = jnp.sum(emb_a * t, axis=1, keepdims=True)                    # ret[:, 1]
    sc1a = jnp.sum(emb_a * t_a, axis=1, keepdims=True)                 # ret_a[:, 0]
    sc2a = jnp.sum(emb * t_a, axis=1, keepdims=True)                   # ret_a[:, 1]
    logits_ref[...] = jnp.concatenate([sc1, sc2, sc1a, sc2a], axis=1)  # (N, 4)

    # Make sure the early output DMAs finished before the kernel returns.
    hiden_cp.wait()
    h_cp.wait()


def encoder1_forward(feat, feat_a, adj, graph_neigh, w1, w2, disc_w, disc_b):
    """Encoder1.forward: returns (hiden_emb, h, ret, ret_a)."""
    N, in_f = feat.shape
    out_f = w1.shape[1]
    assert feat_a.shape == (N, in_f)
    assert adj.shape == (N, N) and graph_neigh.shape == (N, N)
    assert w1.shape == (in_f, out_f) and w2.shape == (out_f, in_f)
    assert disc_w.shape == (out_f, out_f) and disc_b.shape == (1,)

    bf16 = jnp.bfloat16
    # bf16 MXU operands (halves input DMA bytes); accumulation stays f32.
    feat_bf = feat.astype(bf16)
    feat_a_bf = feat_a.astype(bf16)
    adj_bf = adj.astype(bf16)
    gn_bf = graph_neigh.astype(bf16)
    w1_bf = w1.astype(bf16)
    w2_bf = w2.astype(bf16)
    # Pre-transpose the bilinear weight once on the host (XLA), so the kernel
    # never performs an in-kernel transpose.
    wdT_bf = disc_w.T.astype(bf16)

    vmem = pl.BlockSpec(memory_space=pltpu.MemorySpace.VMEM)
    anyspace = pl.BlockSpec(memory_space=pl.ANY)

    hiden, h, logits = pl.pallas_call(
        _encoder1_kernel,
        out_shape=(jax.ShapeDtypeStruct((N, out_f), jnp.float32),
                   jax.ShapeDtypeStruct((N, in_f), jnp.float32),
                   jax.ShapeDtypeStruct((N, 4), jnp.float32)),
        in_specs=[vmem,        # feat (bf16)
                  vmem,        # feat_a (bf16)
                  anyspace,    # adj (bf16, manual DMA)
                  anyspace,    # graph_neigh (bf16, manual DMA)
                  vmem,        # w1 (bf16)
                  vmem,        # w2 (bf16)
                  vmem],       # disc_w^T (bf16)
        out_specs=(anyspace,   # hiden_emb (manual writeback DMA)
                   anyspace,   # h         (manual writeback DMA)
                   vmem),      # logits
        scratch_shapes=[
            pltpu.VMEM((N, N), bf16),             # adj landing buffer
            pltpu.VMEM((N, N), bf16),             # graph_neigh landing buffer
            pltpu.VMEM((N, out_f), jnp.float32),  # hiden staging
            pltpu.VMEM((N, in_f), jnp.float32),   # h staging
            pltpu.SemaphoreType.DMA((2,)),        # input DMA sems
            pltpu.SemaphoreType.DMA((2,)),        # output DMA sems
        ],
    )(feat_bf, feat_a_bf, adj_bf, gn_bf, w1_bf, w2_bf, wdT_bf)

    # Bilinear bias (zero-initialised in the module) added on the tiny slices.
    ret = logits[:, 0:2] + disc_b
    ret_a = logits[:, 2:4] + disc_b
    return hiden, h, ret, ret_a


# ----------------------------- pure-JAX reference -----------------------------
def _reference_forward(feat, feat_a, adj, graph_neigh, w1, w2, disc_w, disc_b):
    def readout(e):
        vsum = graph_neigh @ e
        rs = jnp.sum(graph_neigh, axis=1, keepdims=True)
        ge = vsum / rs
        nrm = jnp.sqrt(jnp.sum(ge * ge, axis=1, keepdims=True))
        ge = ge / jnp.maximum(nrm, 1e-12)
        return jax.nn.sigmoid(ge)

    def disc(c, h_pl, h_mi):
        t = c @ disc_w.T
        s1 = jnp.sum(h_pl * t, axis=1, keepdims=True) + disc_b[0]
        s2 = jnp.sum(h_mi * t, axis=1, keepdims=True) + disc_b[0]
        return jnp.concatenate([s1, s2], axis=1)

    z = adj @ (feat @ w1)
    z_a = adj @ (feat_a @ w1)
    h = adj @ (z @ w2)
    emb, emb_a = jnp.maximum(z, 0.0), jnp.maximum(z_a, 0.0)
    g, g_a = readout(emb), readout(emb_a)
    return z, h, disc(g, emb, emb_a), disc(g_a, emb_a, emb)


# ----------------------------- parameter init (deterministic) -----------------------------
def xavier_uniform(key, shape, fan_in, fan_out, dtype=jnp.float32):
    a = jnp.sqrt(6.0 / (fan_in + fan_out))
    return jax.random.uniform(key, shape, dtype=dtype, minval=-a, maxval=a)


if __name__ == "__main__":
    N = 256            # number of nodes / spots
    IN_FEATURES = 256
    OUT_FEATURES = 128

    key = jax.random.PRNGKey(0)
    k_feat, k_feat_a, k_adj, k_mask, k_w1, k_w2, k_disc = jax.random.split(key, 7)

    feat = jax.random.normal(k_feat, (N, IN_FEATURES), dtype=jnp.float32)
    feat_a = jax.random.normal(k_feat_a, (N, IN_FEATURES), dtype=jnp.float32)

    # graph_neigh: binary neighbourhood mask with self-loops (rows guaranteed non-zero)
    graph_neigh = (jax.random.uniform(k_mask, (N, N)) < 0.3).astype(jnp.float32)
    graph_neigh = jnp.maximum(graph_neigh, jnp.eye(N, dtype=jnp.float32))

    # adj: row-normalized random adjacency with self-loops
    adj = (jax.random.uniform(k_adj, (N, N)) < 0.3).astype(jnp.float32)
    adj = jnp.maximum(adj, jnp.eye(N, dtype=jnp.float32))
    adj = adj / jnp.sum(adj, axis=1, keepdims=True)

    # weights (xavier_uniform, matching Encoder1.reset_parameters / Discriminator init)
    w1 = xavier_uniform(k_w1, (IN_FEATURES, OUT_FEATURES), IN_FEATURES, OUT_FEATURES)
    w2 = xavier_uniform(k_w2, (OUT_FEATURES, IN_FEATURES), OUT_FEATURES, IN_FEATURES)
    # nn.Bilinear(out, out, 1): weight (1, out, out), bias (1,) zero-filled
    disc_w3 = xavier_uniform(k_disc, (1, OUT_FEATURES, OUT_FEATURES),
                             OUT_FEATURES * OUT_FEATURES, OUT_FEATURES)
    disc_w = disc_w3[0]
    disc_b = jnp.zeros((1,), dtype=jnp.float32)

    fwd = jax.jit(encoder1_forward)
    hiden_emb, h, ret, ret_a = fwd(feat, feat_a, adj, graph_neigh,
                                   w1, w2, disc_w, disc_b)
    jax.block_until_ready((hiden_emb, h, ret, ret_a))

    assert hiden_emb.shape == (N, OUT_FEATURES)
    assert h.shape == (N, IN_FEATURES)
    assert ret.shape == (N, 2)
    assert ret_a.shape == (N, 2)
    assert bool(jnp.all(jnp.isfinite(hiden_emb))) and bool(jnp.all(jnp.isfinite(h)))
    assert bool(jnp.all(jnp.isfinite(ret))) and bool(jnp.all(jnp.isfinite(ret_a)))

    # (A) Tight check: f32 reference evaluated on the bf16-rounded inputs
    #     (isolates the kernel's algorithmic correctness from input quantization).
    def _r(x):
        return x.astype(jnp.bfloat16).astype(jnp.float32)

    a_hiden, a_h, a_ret, a_ret_a = _reference_forward(
        _r(feat), _r(feat_a), _r(adj), _r(graph_neigh), _r(w1), _r(w2), _r(disc_w), disc_b)
    assert jnp.allclose(hiden_emb, a_hiden, rtol=1e-2, atol=1e-2)
    assert jnp.allclose(h, a_h, rtol=1e-2, atol=1e-2)
    assert jnp.allclose(ret, a_ret, rtol=1e-2, atol=1e-2)
    assert jnp.allclose(ret_a, a_ret_a, rtol=1e-2, atol=1e-2)

    # (B) Sanity check vs the full-f32 reference (original PyTorch semantics);
    #     looser tolerance accounts for the bf16 operand quantization.
    r_hiden, r_h, r_ret, r_ret_a = _reference_forward(
        feat, feat_a, adj, graph_neigh, w1, w2, disc_w, disc_b)
    assert jnp.allclose(hiden_emb, r_hiden, rtol=5e-2, atol=5e-2)
    assert jnp.allclose(h, r_h, rtol=5e-2, atol=5e-2)
    assert jnp.allclose(ret, r_ret, rtol=5e-2, atol=5e-2)
    assert jnp.allclose(ret_a, r_ret_a, rtol=5e-2, atol=5e-2)

    print("KERNEL_OK")
</pallas_src>

<mosaic_0001>
module attributes {stable_mosaic.version = 11 : i64} {
  func.func @_encoder1_kernel(%arg0: memref<256x256xbf16, #tpu.memory_space<vmem>>, %arg1: memref<256x256xbf16, #tpu.memory_space<vmem>>, %arg2: memref<256x256xbf16, #tpu.memory_space<any>>, %arg3: memref<256x256xbf16, #tpu.memory_space<any>>, %arg4: memref<256x128xbf16, #tpu.memory_space<vmem>>, %arg5: memref<128x256xbf16, #tpu.memory_space<vmem>>, %arg6: memref<128x128xbf16, #tpu.memory_space<vmem>>, %arg7: memref<256x128xf32, #tpu.memory_space<any>>, %arg8: memref<256x256xf32, #tpu.memory_space<any>>, %arg9: memref<256x4xf32, #tpu.memory_space<vmem>>, %arg10: memref<256x256xbf16, #tpu.memory_space<vmem>>, %arg11: memref<256x256xbf16, #tpu.memory_space<vmem>>, %arg12: memref<256x128xf32, #tpu.memory_space<vmem>>, %arg13: memref<256x256xf32, #tpu.memory_space<vmem>>, %arg14: memref<2x!tpu.dma_semaphore, #tpu.memory_space<semaphore_mem>>, %arg15: memref<2x!tpu.dma_semaphore, #tpu.memory_space<semaphore_mem>>) attributes {dimension_semantics = [], scalar_prefetch = 0 : i64, scratch_operands = 6 : i64, tpu.core_type = #tpu.core_type<tc>} {
    %c0_i32 = arith.constant 0 : i32
    %0 = tpu.memref_slice %arg14[%c0_i32] : memref<2x!tpu.dma_semaphore, #tpu.memory_space<semaphore_mem>> -> memref<1x!tpu.dma_semaphore, #tpu.memory_space<semaphore_mem>>
    %1 = tpu.memref_squeeze %0 : memref<1x!tpu.dma_semaphore, #tpu.memory_space<semaphore_mem>> -> memref<!tpu.dma_semaphore, #tpu.memory_space<semaphore_mem>>
    tpu.enqueue_dma source(%arg2 : memref<256x256xbf16, #tpu.memory_space<any>>) target(%arg10 : memref<256x256xbf16, #tpu.memory_space<vmem>>) target_semaphore(%1 : memref<!tpu.dma_semaphore, #tpu.memory_space<semaphore_mem>>)
    %c1_i32 = arith.constant 1 : i32
    %2 = tpu.memref_slice %arg14[%c1_i32] : memref<2x!tpu.dma_semaphore, #tpu.memory_space<semaphore_mem>> -> memref<1x!tpu.dma_semaphore, #tpu.memory_space<semaphore_mem>>
    %3 = tpu.memref_squeeze %2 : memref<1x!tpu.dma_semaphore, #tpu.memory_space<semaphore_mem>> -> memref<!tpu.dma_semaphore, #tpu.memory_space<semaphore_mem>>
    tpu.enqueue_dma source(%arg3 : memref<256x256xbf16, #tpu.memory_space<any>>) target(%arg11 : memref<256x256xbf16, #tpu.memory_space<vmem>>) target_semaphore(%3 : memref<!tpu.dma_semaphore, #tpu.memory_space<semaphore_mem>>)
    %c0 = arith.constant 0 : index
    %c0_0 = arith.constant 0 : index
    %4 = vector.load %arg4[%c0, %c0_0] : memref<256x128xbf16, #tpu.memory_space<vmem>>, vector<256x128xbf16>
    %c0_1 = arith.constant 0 : index
    %c0_2 = arith.constant 0 : index
    %5 = vector.load %arg0[%c0_1, %c0_2] : memref<256x256xbf16, #tpu.memory_space<vmem>>, vector<256x256xbf16>
    %cst = arith.constant dense<0.000000e+00> : vector<256x128xf32>
    %6 = tpu.matmul %5, %4, %cst {dimension_numbers = #tpu.dot_dimension_numbers<[1], [0], [0], [1], [0, 0, 1, 1], [], []>} : vector<256x256xbf16>, vector<256x128xbf16>, vector<256x128xf32> -> vector<256x128xf32>
    %c0_3 = arith.constant 0 : index
    %c0_4 = arith.constant 0 : index
    %7 = vector.load %arg1[%c0_3, %c0_4] : memref<256x256xbf16, #tpu.memory_space<vmem>>, vector<256x256xbf16>
    %cst_5 = arith.constant dense<0.000000e+00> : vector<256x128xf32>
    %8 = tpu.matmul %7, %4, %cst_5 {dimension_numbers = #tpu.dot_dimension_numbers<[1], [0], [0], [1], [0, 0, 1, 1], [], []>} : vector<256x256xbf16>, vector<256x128xbf16>, vector<256x128xf32> -> vector<256x128xf32>
    %9 = arith.truncf %6 : vector<256x128xf32> to vector<256x128xbf16>
    %10 = arith.truncf %8 : vector<256x128xf32> to vector<256x128xbf16>
    %11 = tpu.concatenate %9, %10 in 1 : vector<256x128xbf16>, vector<256x128xbf16> -> vector<256x256xbf16>
    %c0_i32_6 = arith.constant 0 : i32
    %12 = tpu.memref_slice %arg14[%c0_i32_6] : memref<2x!tpu.dma_semaphore, #tpu.memory_space<semaphore_mem>> -> memref<1x!tpu.dma_semaphore, #tpu.memory_space<semaphore_mem>>
    %13 = tpu.memref_squeeze %12 : memref<1x!tpu.dma_semaphore, #tpu.memory_space<semaphore_mem>> -> memref<!tpu.dma_semaphore, #tpu.memory_space<semaphore_mem>>
    tpu.wait_dma2 semaphore(%13 : memref<!tpu.dma_semaphore, #tpu.memory_space<semaphore_mem>>) src(%arg2 : memref<256x256xbf16, #tpu.memory_space<any>>) dst(%arg10 : memref<256x256xbf16, #tpu.memory_space<vmem>>)
    %c0_7 = arith.constant 0 : index
    %c0_8 = arith.constant 0 : index
    %14 = vector.load %arg10[%c0_7, %c0_8] : memref<256x256xbf16, #tpu.memory_space<vmem>>, vector<256x256xbf16>
    %cst_9 = arith.constant dense<0.000000e+00> : vector<256x256xf32>
    %15 = tpu.matmul %14, %11, %cst_9 {dimension_numbers = #tpu.dot_dimension_numbers<[1], [0], [0], [1], [0, 0, 1, 1], [], []>} : vector<256x256xbf16>, vector<256x256xbf16>, vector<256x256xf32> -> vector<256x256xf32>
    %16 = vector.extract_strided_slice %15 {offsets = [0, 0], sizes = [256, 128], strides = [1, 1]} : vector<256x256xf32> to vector<256x128xf32>
    %17 = vector.extract_strided_slice %15 {offsets = [0, 128], sizes = [256, 128], strides = [1, 1]} : vector<256x256xf32> to vector<256x128xf32>
    %c0_10 = arith.constant 0 : index
    %c0_11 = arith.constant 0 : index
    %18 = vector.load %arg12[%c0_10, %c0_11] : memref<256x128xf32, #tpu.memory_space<vmem>>, vector<256x128xf32>
    tpu.vector_store %arg12[%c0_10, %c0_11], %16 {strides = array<i32>} : memref<256x128xf32, #tpu.memory_space<vmem>>, vector<256x128xf32>,
    %c0_i32_12 = arith.constant 0 : i32
    %19 = tpu.memref_slice %arg15[%c0_i32_12] : memref<2x!tpu.dma_semaphore, #tpu.memory_space<semaphore_mem>> -> memref<1x!tpu.dma_semaphore, #tpu.memory_space<semaphore_mem>>
    %20 = tpu.memref_squeeze %19 : memref<1x!tpu.dma_semaphore, #tpu.memory_space<semaphore_mem>> -> memref<!tpu.dma_semaphore, #tpu.memory_space<semaphore_mem>>
    tpu.enqueue_dma source(%arg12 : memref<256x128xf32, #tpu.memory_space<vmem>>) target(%arg7 : memref<256x128xf32, #tpu.memory_space<any>>) target_semaphore(%20 : memref<!tpu.dma_semaphore, #tpu.memory_space<semaphore_mem>>)
    %21 = arith.truncf %16 : vector<256x128xf32> to vector<256x128xbf16>
    %cst_13 = arith.constant dense<0.000000e+00> : vector<256x128xf32>
    %22 = tpu.matmul %14, %21, %cst_13 {dimension_numbers = #tpu.dot_dimension_numbers<[1], [0], [0], [1], [0, 0, 1, 1], [], []>} : vector<256x256xbf16>, vector<256x128xbf16>, vector<256x128xf32> -> vector<256x128xf32>
    %23 = arith.truncf %22 : vector<256x128xf32> to vector<256x128xbf16>
    %c0_14 = arith.constant 0 : index
    %c0_15 = arith.constant 0 : index
    %24 = vector.load %arg5[%c0_14, %c0_15] : memref<128x256xbf16, #tpu.memory_space<vmem>>, vector<128x256xbf16>
    %cst_16 = arith.constant dense<0.000000e+00> : vector<256x256xf32>
    %25 = tpu.matmul %23, %24, %cst_16 {dimension_numbers = #tpu.dot_dimension_numbers<[1], [0], [0], [1], [0, 0, 1, 1], [], []>} : vector<256x128xbf16>, vector<128x256xbf16>, vector<256x256xf32> -> vector<256x256xf32>
    %c0_17 = arith.constant 0 : index
    %c0_18 = arith.constant 0 : index
    %26 = vector.load %arg13[%c0_17, %c0_18] : memref<256x256xf32, #tpu.memory_space<vmem>>, vector<256x256xf32>
    tpu.vector_store %arg13[%c0_17, %c0_18], %25 {strides = array<i32>} : memref<256x256xf32, #tpu.memory_space<vmem>>, vector<256x256xf32>,
    %c1_i32_19 = arith.constant 1 : i32
    %27 = tpu.memref_slice %arg15[%c1_i32_19] : memref<2x!tpu.dma_semaphore, #tpu.memory_space<semaphore_mem>> -> memref<1x!tpu.dma_semaphore, #tpu.memory_space<semaphore_mem>>
    %28 = tpu.memref_squeeze %27 : memref<1x!tpu.dma_semaphore, #tpu.memory_space<semaphore_mem>> -> memref<!tpu.dma_semaphore, #tpu.memory_space<semaphore_mem>>
    tpu.enqueue_dma source(%arg13 : memref<256x256xf32, #tpu.memory_space<vmem>>) target(%arg8 : memref<256x256xf32, #tpu.memory_space<any>>) target_semaphore(%28 : memref<!tpu.dma_semaphore, #tpu.memory_space<semaphore_mem>>)
    %cst_20 = arith.constant 0.000000e+00 : f32
    %29 = vector.broadcast %cst_20 : f32 to vector<256x128xf32>
    %30 = arith.maximumf %16, %29 : vector<256x128xf32>
    %cst_21 = arith.constant 0.000000e+00 : f32
    %31 = vector.broadcast %cst_21 : f32 to vector<256x128xf32>
    %32 = arith.maximumf %17, %31 : vector<256x128xf32>
    %c1_i32_22 = arith.constant 1 : i32
    %33 = tpu.memref_slice %arg14[%c1_i32_22] : memref<2x!tpu.dma_semaphore, #tpu.memory_space<semaphore_mem>> -> memref<1x!tpu.dma_semaphore, #tpu.memory_space<semaphore_mem>>
    %34 = tpu.memref_squeeze %33 : memref<1x!tpu.dma_semaphore, #tpu.memory_space<semaphore_mem>> -> memref<!tpu.dma_semaphore, #tpu.memory_space<semaphore_mem>>
    tpu.wait_dma2 semaphore(%34 : memref<!tpu.dma_semaphore, #tpu.memory_space<semaphore_mem>>) src(%arg3 : memref<256x256xbf16, #tpu.memory_space<any>>) dst(%arg11 : memref<256x256xbf16, #tpu.memory_space<vmem>>)
    %35 = arith.truncf %30 : vector<256x128xf32> to vector<256x128xbf16>
    %36 = arith.truncf %32 : vector<256x128xf32> to vector<256x128xbf16>
    %37 = tpu.concatenate %35, %36 in 1 : vector<256x128xbf16>, vector<256x128xbf16> -> vector<256x256xbf16>
    %c0_23 = arith.constant 0 : index
    %c0_24 = arith.constant 0 : index
    %38 = vector.load %arg11[%c0_23, %c0_24] : memref<256x256xbf16, #tpu.memory_space<vmem>>, vector<256x256xbf16>
    %cst_25 = arith.constant dense<0.000000e+00> : vector<256x256xf32>
    %39 = tpu.matmul %38, %37, %cst_25 {dimension_numbers = #tpu.dot_dimension_numbers<[1], [0], [0], [1], [0, 0, 1, 1], [], []>} : vector<256x256xbf16>, vector<256x256xbf16>, vector<256x256xf32> -> vector<256x256xf32>
    %40 = vector.extract_strided_slice %39 {offsets = [0, 0], sizes = [256, 128], strides = [1, 1]} : vector<256x256xf32> to vector<256x128xf32>
    %41 = arith.mulf %40, %40 : vector<256x128xf32>
    %cst_26 = arith.constant dense<0.000000e+00> : vector<256xf32>
    %42 = vector.multi_reduction <add>, %41, %cst_26 [1] : vector<256x128xf32> to vector<256xf32>
    %43 = vector.shape_cast %42 : vector<256xf32> to vector<256x1xf32>
    %cst_27 = arith.constant 1.000000e-24 : f32
    %44 = vector.broadcast %cst_27 : f32 to vector<256x1xf32>
    %45 = arith.maximumf %43, %44 : vector<256x1xf32>
    %46 = math.rsqrt %45 : vector<256x1xf32>
    %47 = vector.broadcast %46 : vector<256x1xf32> to vector<256x128xf32>
    %48 = arith.mulf %40, %47 : vector<256x128xf32>
    %49 = arith.negf %48 : vector<256x128xf32>
    %50 = math.exp %49 : vector<256x128xf32>
    %cst_28 = arith.constant 1.000000e+00 : f32
    %51 = vector.broadcast %cst_28 : f32 to vector<256x128xf32>
    %52 = arith.addf %51, %50 : vector<256x128xf32>
    %53 = arith.divf %51, %52 : vector<256x128xf32>
    %54 = vector.extract_strided_slice %39 {offsets = [0, 128], sizes = [256, 128], strides = [1, 1]} : vector<256x256xf32> to vector<256x128xf32>
    %55 = arith.mulf %54, %54 : vector<256x128xf32>
    %cst_29 = arith.constant dense<0.000000e+00> : vector<256xf32>
    %56 = vector.multi_reduction <add>, %55, %cst_29 [1] : vector<256x128xf32> to vector<256xf32>
    %57 = vector.shape_cast %56 : vector<256xf32> to vector<256x1xf32>
    %cst_30 = arith.constant 1.000000e-24 : f32
    %58 = vector.broadcast %cst_30 : f32 to vector<256x1xf32>
    %59 = arith.maximumf %57, %58 : vector<256x1xf32>
    %60 = math.rsqrt %59 : vector<256x1xf32>
    %61 = vector.broadcast %60 : vector<256x1xf32> to vector<256x128xf32>
    %62 = arith.mulf %54, %61 : vector<256x128xf32>
    %63 = arith.negf %62 : vector<256x128xf32>
    %64 = math.exp %63 : vector<256x128xf32>
    %cst_31 = arith.constant 1.000000e+00 : f32
    %65 = vector.broadcast %cst_31 : f32 to vector<256x128xf32>
    %66 = arith.addf %65, %64 : vector<256x128xf32>
    %67 = arith.divf %65, %66 : vector<256x128xf32>
    %68 = arith.truncf %53 : vector<256x128xf32> to vector<256x128xbf16>
    %69 = arith.truncf %67 : vector<256x128xf32> to vector<256x128xbf16>
    %70 = tpu.concatenate %68, %69 in 0 : vector<256x128xbf16>, vector<256x128xbf16> -> vector<512x128xbf16>
    %c0_32 = arith.constant 0 : index
    %c0_33 = arith.constant 0 : index
    %71 = vector.load %arg6[%c0_32, %c0_33] : memref<128x128xbf16, #tpu.memory_space<vmem>>, vector<128x128xbf16>
    %cst_34 = arith.constant dense<0.000000e+00> : vector<512x128xf32>
    %72 = tpu.matmul %70, %71, %cst_34 {dimension_numbers = #tpu.dot_dimension_numbers<[1], [0], [0], [1], [0, 0, 1, 1], [], []>} : vector<512x128xbf16>, vector<128x128xbf16>, vector<512x128xf32> -> vector<512x128xf32>
    %73 = vector.extract_strided_slice %72 {offsets = [0, 0], sizes = [256, 128], strides = [1, 1]} : vector<512x128xf32> to vector<256x128xf32>
    %74 = vector.extract_strided_slice %72 {offsets = [256, 0], sizes = [256, 128], strides = [1, 1]} : vector<512x128xf32> to vector<256x128xf32>
    %75 = arith.mulf %30, %73 : vector<256x128xf32>
    %cst_35 = arith.constant dense<0.000000e+00> : vector<256xf32>
    %76 = vector.multi_reduction <add>, %75, %cst_35 [1] : vector<256x128xf32> to vector<256xf32>
    %77 = vector.shape_cast %76 : vector<256xf32> to vector<256x1xf32>
    %78 = arith.mulf %32, %73 : vector<256x128xf32>
    %cst_36 = arith.constant dense<0.000000e+00> : vector<256xf32>
    %79 = vector.multi_reduction <add>, %78, %cst_36 [1] : vector<256x128xf32> to vector<256xf32>
    %80 = vector.shape_cast %79 : vector<256xf32> to vector<256x1xf32>
    %81 = arith.mulf %32, %74 : vector<256x128xf32>
    %cst_37 = arith.constant dense<0.000000e+00> : vector<256xf32>
    %82 = vector.multi_reduction <add>, %81, %cst_37 [1] : vector<256x128xf32> to vector<256xf32>
    %83 = vector.shape_cast %82 : vector<256xf32> to vector<256x1xf32>
    %84 = arith.mulf %30, %74 : vector<256x128xf32>
    %cst_38 = arith.constant dense<0.000000e+00> : vector<256xf32>
    %85 = vector.multi_reduction <add>, %84, %cst_38 [1] : vector<256x128xf32> to vector<256xf32>
    %86 = vector.shape_cast %85 : vector<256xf32> to vector<256x1xf32>
    %87 = tpu.concatenate %77, %80, %83, %86 in 1 : vector<256x1xf32>, vector<256x1xf32>, vector<256x1xf32>, vector<256x1xf32> -> vector<256x4xf32>
    %c0_39 = arith.constant 0 : index
    %c0_40 = arith.constant 0 : index
    %88 = vector.load %arg9[%c0_39, %c0_40] : memref<256x4xf32, #tpu.memory_space<vmem>>, vector<256x4xf32>
    tpu.vector_store %arg9[%c0_39, %c0_40], %87 {strides = array<i32>} : memref<256x4xf32, #tpu.memory_space<vmem>>, vector<256x4xf32>,
    %c0_i32_41 = arith.constant 0 : i32
    %89 = tpu.memref_slice %arg15[%c0_i32_41] : memref<2x!tpu.dma_semaphore, #tpu.memory_space<semaphore_mem>> -> memref<1x!tpu.dma_semaphore, #tpu.memory_space<semaphore_mem>>
    %90 = tpu.memref_squeeze %89 : memref<1x!tpu.dma_semaphore, #tpu.memory_space<semaphore_mem>> -> memref<!tpu.dma_semaphore, #tpu.memory_space<semaphore_mem>>
    tpu.wait_dma2 semaphore(%90 : memref<!tpu.dma_semaphore, #tpu.memory_space<semaphore_mem>>) src(%arg12 : memref<256x128xf32, #tpu.memory_space<vmem>>) dst(%arg7 : memref<256x128xf32, #tpu.memory_space<any>>)
    %c1_i32_42 = arith.constant 1 : i32
    %91 = tpu.memref_slice %arg15[%c1_i32_42] : memref<2x!tpu.dma_semaphore, #tpu.memory_space<semaphore_mem>> -> memref<1x!tpu.dma_semaphore, #tpu.memory_space<semaphore_mem>>
    %92 = tpu.memref_squeeze %91 : memref<1x!tpu.dma_semaphore, #tpu.memory_space<semaphore_mem>> -> memref<!tpu.dma_semaphore, #tpu.memory_space<semaphore_mem>>
    tpu.wait_dma2 semaphore(%92 : memref<!tpu.dma_semaphore, #tpu.memory_space<semaphore_mem>>) src(%arg13 : memref<256x256xf32, #tpu.memory_space<vmem>>) dst(%arg8 : memref<256x256xf32, #tpu.memory_space<any>>)
    return
  }
}

</mosaic_0001>

<bundles_post_ra>
// kernel: encoder1_forward.1
= control target key start
LH: loop header
LB: loop body
LE: loop exit
PB: predicated region body
PF: predicated region fallthrough
CT: control target
= control target key end

     0   :  { %s7943_s0 = inlined_call_operand.vmem [shape: bf16[256,256], index: 0, kind: input, shape index: {}]   ;;  %s7944_s1 = inlined_call_operand.vmem [shape: bf16[256,256], index: 1, kind: input, shape index: {}]   ;;  %s7945_s2 = inlined_call_operand.vmem [shape: bf16[256,256], index: 2, kind: input, shape index: {}]   ;;  %s7946_s3 = inlined_call_operand.vmem [shape: bf16[256,256], index: 3, kind: input, shape index: {}]   ;;  %s7947_s4 = inlined_call_operand.vmem [shape: bf16[256,128], index: 4, kind: input, shape index: {}]   ;;  %s7948_s5 = inlined_call_operand.vmem [shape: bf16[128,256], index: 5, kind: input, shape index: {}]   ;;  %s7949_s6 = inlined_call_operand.vmem [shape: bf16[128,128], index: 6, kind: input, shape index: {}]   ;;  %s7950_s7 = inlined_call_operand.hbm [shape: f32[256,128], index: 7, kind: output, shape index: {0}]   ;;  %s7951_s8 = inlined_call_operand.hbm [shape: f32[256,256], index: 8, kind: output, shape index: {1}]   ;;  %s7952_s9 = inlined_call_operand.vmem [shape: f32[256,4], index: 9, kind: output, shape index: {2}]  }
   0x1   :  { %v43_v0 = vld [vmem:[%s7945_s2] sm:$0xf]  ;;  %v45_v1 = vld [vmem:[%s7945_s2 + $0x8] sm:$0xf]  ;;  %v47_v2 = vld [vmem:[%s7945_s2 + $0x4] sm:$0xf] }
   0x2   :  { %44 = vst [vmem:[#allocation2] sm:$0xf] %v43_v0  ;;  %46 = vst [vmem:[#allocation2 + $0x4] sm:$0xf] %v45_v1  ;;  %v49_v3 = vld [vmem:[%s7945_s2 + $0xc] sm:$0xff]   ;;  %v57_v6 = vld [vmem:[%s7945_s2 + $0x1c] sm:$0xff]  }
   0x3   :  { %48 = vst [vmem:[#allocation2 + $0x8] sm:$0xf] %v47_v2  ;;  %v53_v4 = vld [vmem:[%s7945_s2 + $0x18] sm:$0xf]  ;;  %v55_v5 = vld [vmem:[%s7945_s2 + $0x14] sm:$0xf] }
   0x4   :  { %50 = vst [vmem:[#allocation2 + $0xc] sm:$0xff] %v49_v3   ;;  %54 = vst [vmem:[#allocation2 + $0x14] sm:$0xf] %v53_v4  ;;  %v61_v7 = vld [vmem:[%s7945_s2 + $0x28] sm:$0xf]  ;;  %v65_v9 = vld [vmem:[%s7945_s2 + $0x2c] sm:$0xff]  }
   0x5   :  { %56 = vst [vmem:[#allocation2 + $0x18] sm:$0xf] %v55_v5  ;;  %v63_v8 = vld [vmem:[%s7945_s2 + $0x24] sm:$0xf]  ;;  %58 = vst [vmem:[#allocation2 + $0x1c] sm:$0xff] %v57_v6   ;;  %v73_v12 = vld [vmem:[%s7945_s2 + $0x3c] sm:$0xff]  }
   0x6   :  { %62 = vst [vmem:[#allocation2 + $0x24] sm:$0xf] %v61_v7  ;;  %64 = vst [vmem:[#allocation2 + $0x28] sm:$0xf] %v63_v8  ;;  %v69_v10 = vld [vmem:[%s7945_s2 + $0x38] sm:$0xf] }
   0x7   :  { %v71_v11 = vld [vmem:[%s7945_s2 + $0x34] sm:$0xf]  ;;  %66 = vst [vmem:[#allocation2 + $0x2c] sm:$0xff] %v65_v9   ;;  %70 = vst [vmem:[#allocation2 + $0x34] sm:$0xf] %v69_v10  ;;  %v81_v15 = vld [vmem:[%s7945_s2 + $0x4c] sm:$0xff]  }
   0x8   :  { %72 = vst [vmem:[#allocation2 + $0x38] sm:$0xf] %v71_v11  ;;  %v77_v13 = vld [vmem:[%s7945_s2 + $0x48] sm:$0xf]  ;;  %v79_v14 = vld [vmem:[%s7945_s2 + $0x44] sm:$0xf] }
   0x9   :  { %74 = vst [vmem:[#allocation2 + $0x3c] sm:$0xff] %v73_v12   ;;  %78 = vst [vmem:[#allocation2 + $0x44] sm:$0xf] %v77_v13  ;;  %v85_v16 = vld [vmem:[%s7945_s2 + $0x58] sm:$0xf]  ;;  %v89_v18 = vld [vmem:[%s7945_s2 + $0x5c] sm:$0xff]  }
   0xa   :  { %80 = vst [vmem:[#allocation2 + $0x48] sm:$0xf] %v79_v14  ;;  %v87_v17 = vld [vmem:[%s7945_s2 + $0x54] sm:$0xf]  ;;  %82 = vst [vmem:[#allocation2 + $0x4c] sm:$0xff] %v81_v15   ;;  %v97_v21 = vld [vmem:[%s7945_s2 + $0x6c] sm:$0xff]  }
   0xb   :  { %86 = vst [vmem:[#allocation2 + $0x54] sm:$0xf] %v85_v16  ;;  %88 = vst [vmem:[#allocation2 + $0x58] sm:$0xf] %v87_v17  ;;  %v93_v19 = vld [vmem:[%s7945_s2 + $0x68] sm:$0xf] }
   0xc   :  { %v95_v20 = vld [vmem:[%s7945_s2 + $0x64] sm:$0xf]  ;;  %90 = vst [vmem:[#allocation2 + $0x5c] sm:$0xff] %v89_v18   ;;  %94 = vst [vmem:[#allocation2 + $0x64] sm:$0xf] %v93_v19  ;;  %v105_v24 = vld [vmem:[%s7945_s2 + $0x7c] sm:$0xff]  }
   0xd   :  { %96 = vst [vmem:[#allocation2 + $0x68] sm:$0xf] %v95_v20  ;;  %v101_v22 = vld [vmem:[%s7945_s2 + $0x78] sm:$0xf]  ;;  %v103_v23 = vld [vmem:[%s7945_s2 + $0x74] sm:$0xf] }
   0xe   :  { %98 = vst [vmem:[#allocation2 + $0x6c] sm:$0xff] %v97_v21   ;;  %102 = vst [vmem:[#allocation2 + $0x74] sm:$0xf] %v101_v22  ;;  %v109_v25 = vld [vmem:[%s7945_s2 + $0x88] sm:$0xf]  ;;  %v113_v27 = vld [vmem:[%s7945_s2 + $0x8c] sm:$0xff]  }
   0xf   :  { %104 = vst [vmem:[#allocation2 + $0x78] sm:$0xf] %v103_v23  ;;  %v111_v26 = vld [vmem:[%s7945_s2 + $0x84] sm:$0xf]  ;;  %106 = vst [vmem:[#allocation2 + $0x7c] sm:$0xff] %v105_v24   ;;  %v121_v30 = vld [vmem:[%s7945_s2 + $0x9c] sm:$0xff]  }
  0x10   :  { %110 = vst [vmem:[#allocation2 + $0x84] sm:$0xf] %v109_v25  ;;  %112 = vst [vmem:[#allocation2 + $0x88] sm:$0xf] %v111_v26  ;;  %v117_v28 = vld [vmem:[%s7945_s2 + $0x98] sm:$0xf] }
  0x11   :  { %v119_v29 = vld [vmem:[%s7945_s2 + $0x94] sm:$0xf]  ;;  %114 = vst [vmem:[#allocation2 + $0x8c] sm:$0xff] %v113_v27   ;;  %118 = vst [vmem:[#allocation2 + $0x94] sm:$0xf] %v117_v28  ;;  %v129_v33 = vld [vmem:[%s7945_s2 + $0xac] sm:$0xff]  }
  0x12   :  { %120 = vst [vmem:[#allocation2 + $0x98] sm:$0xf] %v119_v29  ;;  %v125_v31 = vld [vmem:[%s7945_s2 + $0xa8] sm:$0xf]  ;;  %v127_v32 = vld [vmem:[%s7945_s2 + $0xa4] sm:$0xf] }
  0x13   :  { %122 = vst [vmem:[#allocation2 + $0x9c] sm:$0xff] %v121_v30   ;;  %126 = vst [vmem:[#allocation2 + $0xa4] sm:$0xf] %v125_v31  ;;  %v133_v34 = vld [vmem:[%s7945_s2 + $0xb8] sm:$0xf]  ;;  %v137_v36 = vld [vmem:[%s7945_s2 + $0xbc] sm:$0xff]  }
  0x14   :  { %128 = vst [vmem:[#allocation2 + $0xa8] sm:$0xf] %v127_v32  ;;  %v135_v35 = vld [vmem:[%s7945_s2 + $0xb4] sm:$0xf]  ;;  %130 = vst [vmem:[#allocation2 + $0xac] sm:$0xff] %v129_v33   ;;  %v145_v39 = vld [vmem:[%s7945_s2 + $0xcc] sm:$0xff]  }
  0x15   :  { %134 = vst [vmem:[#allocation2 + $0xb4] sm:$0xf] %v133_v34  ;;  %136 = vst [vmem:[#allocation2 + $0xb8] sm:$0xf] %v135_v35  ;;  %v141_v37 = vld [vmem:[%s7945_s2 + $0xc8] sm:$0xf] }
  0x16   :  { %v143_v38 = vld [vmem:[%s7945_s2 + $0xc4] sm:$0xf]  ;;  %138 = vst [vmem:[#allocation2 + $0xbc] sm:$0xff] %v137_v36   ;;  %142 = vst [vmem:[#allocation2 + $0xc4] sm:$0xf] %v141_v37  ;;  %v153_v42 = vld [vmem:[%s7945_s2 + $0xdc] sm:$0xff]  }
  0x17   :  { %144 = vst [vmem:[#allocation2 + $0xc8] sm:$0xf] %v143_v38  ;;  %v149_v40 = vld [vmem:[%s7945_s2 + $0xd8] sm:$0xf]  ;;  %v151_v41 = vld [vmem:[%s7945_s2 + $0xd4] sm:$0xf] }
  0x18   :  { %146 = vst [vmem:[#allocation2 + $0xcc] sm:$0xff] %v145_v39   ;;  %150 = vst [vmem:[#allocation2 + $0xd4] sm:$0xf] %v149_v40  ;;  %v157_v43 = vld [vmem:[%s7945_s2 + $0xe8] sm:$0xf]  ;;  %v161_v45 = vld [vmem:[%s7945_s2 + $0xec] sm:$0xff]  }
  0x19   :  { %152 = vst [vmem:[#allocation2 + $0xd8] sm:$0xf] %v151_v41  ;;  %v159_v44 = vld [vmem:[%s7945_s2 + $0xe4] sm:$0xf]  ;;  %154 = vst [vmem:[#allocation2 + $0xdc] sm:$0xff] %v153_v42  }
  0x1a   :  { %158 = vst [vmem:[#allocation2 + $0xe4] sm:$0xf] %v157_v43  ;;  %160 = vst [vmem:[#allocation2 + $0xe8] sm:$0xf] %v159_v44  ;;  %v165_v46 = vld [vmem:[%s7945_s2 + $0xf8] sm:$0xf] }
  0x1b   :  { %v167_v47 = vld [vmem:[%s7945_s2 + $0xf4] sm:$0xf]  ;;  %162 = vst [vmem:[#allocation2 + $0xec] sm:$0xff] %v161_v45   ;;  %166 = vst [vmem:[#allocation2 + $0xf4] sm:$0xf] %v165_v46 }
  0x1c   :  { %168 = vst [vmem:[#allocation2 + $0xf8] sm:$0xf] %v167_v47  ;;  %v169_v48 = vld [vmem:[%s7945_s2 + $0xfc] sm:$0xf] }
  0x1d   :  { %170 = vst [vmem:[#allocation2 + $0xfc] sm:$0xf] %v169_v48 }
  0x1e   :  { %329 = vsyncadd [#allocation6], 4096  ;;  %v348_v49 = vld [vmem:[%s7946_s3] sm:$0xf]  ;;  %v350_v50 = vld [vmem:[%s7946_s3 + $0x8] sm:$0xf] }
  0x1f   :  { %349 = vst [vmem:[#allocation3] sm:$0xf] %v348_v49  ;;  %351 = vst [vmem:[#allocation3 + $0x4] sm:$0xf] %v350_v50  ;;  %v352_v51 = vld [vmem:[%s7946_s3 + $0x4] sm:$0xf] }
  0x20   :  { %v354_v52 = vld [vmem:[%s7946_s3 + $0xc] sm:$0xff]   ;;  %v358_v53 = vld [vmem:[%s7946_s3 + $0x18] sm:$0xf]  ;;  %353 = vst [vmem:[#allocation3 + $0x8] sm:$0xf] %v352_v51  ;;  %v362_v55 = vld [vmem:[%s7946_s3 + $0x1c] sm:$0xff]  }
  0x21   :  { %355 = vst [vmem:[#allocation3 + $0xc] sm:$0xff] %v354_v52   ;;  %359 = vst [vmem:[#allocation3 + $0x14] sm:$0xf] %v358_v53  ;;  %v360_v54 = vld [vmem:[%s7946_s3 + $0x14] sm:$0xf]  ;;  %v370_v58 = vld [vmem:[%s7946_s3 + $0x2c] sm:$0xff]  }
  0x22   :  { %v366_v56 = vld [vmem:[%s7946_s3 + $0x28] sm:$0xf]  ;;  %361 = vst [vmem:[#allocation3 + $0x18] sm:$0xf] %v360_v54  ;;  %363 = vst [vmem:[#allocation3 + $0x1c] sm:$0xff] %v362_v55   ;;  %v378_v61 = vld [vmem:[%s7946_s3 + $0x3c] sm:$0xff]  }
  0x23   :  { %367 = vst [vmem:[#allocation3 + $0x24] sm:$0xf] %v366_v56  ;;  %v368_v57 = vld [vmem:[%s7946_s3 + $0x24] sm:$0xf]  ;;  %v374_v59 = vld [vmem:[%s7946_s3 + $0x38] sm:$0xf] }
  0x24   :  { %369 = vst [vmem:[#allocation3 + $0x28] sm:$0xf] %v368_v57  ;;  %371 = vst [vmem:[#allocation3 + $0x2c] sm:$0xff] %v370_v58   ;;  %v376_v60 = vld [vmem:[%s7946_s3 + $0x34] sm:$0xf]  ;;  %v386_v0 = vld [vmem:[%s7946_s3 + $0x4c] sm:$0xff]  }
  0x25   :  { %375 = vst [vmem:[#allocation3 + $0x34] sm:$0xf] %v374_v59  ;;  %v382_v62 = vld [vmem:[%s7946_s3 + $0x48] sm:$0xf]  ;;  %377 = vst [vmem:[#allocation3 + $0x38] sm:$0xf] %v376_v60 }
  0x26   :  { %379 = vst [vmem:[#allocation3 + $0x3c] sm:$0xff] %v378_v61   ;;  %383 = vst [vmem:[#allocation3 + $0x44] sm:$0xf] %v382_v62  ;;  %v384_v63 = vld [vmem:[%s7946_s3 + $0x44] sm:$0xf]  ;;  %v394_v3 = vld [vmem:[%s7946_s3 + $0x5c] sm:$0xff]  }
  0x27   :  { %v390_v1 = vld [vmem:[%s7946_s3 + $0x58] sm:$0xf]  ;;  %385 = vst [vmem:[#allocation3 + $0x48] sm:$0xf] %v384_v63  ;;  %387 = vst [vmem:[#allocation3 + $0x4c] sm:$0xff] %v386_v0   ;;  %v402_v6 = vld [vmem:[%s7946_s3 + $0x6c] sm:$0xff]  }
  0x28   :  { %391 = vst [vmem:[#allocation3 + $0x54] sm:$0xf] %v390_v1  ;;  %v392_v2 = vld [vmem:[%s7946_s3 + $0x54] sm:$0xf]  ;;  %v398_v4 = vld [vmem:[%s7946_s3 + $0x68] sm:$0xf] }
  0x29   :  { %393 = vst [vmem:[#allocation3 + $0x58] sm:$0xf] %v392_v2  ;;  %395 = vst [vmem:[#allocation3 + $0x5c] sm:$0xff] %v394_v3   ;;  %v400_v5 = vld [vmem:[%s7946_s3 + $0x64] sm:$0xf]  ;;  %v410_v9 = vld [vmem:[%s7946_s3 + $0x7c] sm:$0xff]  }
  0x2a   :  { %399 = vst [vmem:[#allocation3 + $0x64] sm:$0xf] %v398_v4  ;;  %v406_v7 = vld [vmem:[%s7946_s3 + $0x78] sm:$0xf]  ;;  %401 = vst [vmem:[#allocation3 + $0x68] sm:$0xf] %v400_v5 }
  0x2b   :  { %403 = vst [vmem:[#allocation3 + $0x6c] sm:$0xff] %v402_v6   ;;  %407 = vst [vmem:[#allocation3 + $0x74] sm:$0xf] %v406_v7  ;;  %v408_v8 = vld [vmem:[%s7946_s3 + $0x74] sm:$0xf]  ;;  %v418_v12 = vld [vmem:[%s7946_s3 + $0x8c] sm:$0xff]  }
  0x2c   :  { %v414_v10 = vld [vmem:[%s7946_s3 + $0x88] sm:$0xf]  ;;  %409 = vst [vmem:[#allocation3 + $0x78] sm:$0xf] %v408_v8  ;;  %411 = vst [vmem:[#allocation3 + $0x7c] sm:$0xff] %v410_v9   ;;  %v426_v15 = vld [vmem:[%s7946_s3 + $0x9c] sm:$0xff]  }
  0x2d   :  { %415 = vst [vmem:[#allocation3 + $0x84] sm:$0xf] %v414_v10  ;;  %v416_v11 = vld [vmem:[%s7946_s3 + $0x84] sm:$0xf]  ;;  %v422_v13 = vld [vmem:[%s7946_s3 + $0x98] sm:$0xf] }
  0x2e   :  { %417 = vst [vmem:[#allocation3 + $0x88] sm:$0xf] %v416_v11  ;;  %419 = vst [vmem:[#allocation3 + $0x8c] sm:$0xff] %v418_v12   ;;  %v424_v14 = vld [vmem:[%s7946_s3 + $0x94] sm:$0xf]  ;;  %v434_v18 = vld [vmem:[%s7946_s3 + $0xac] sm:$0xff]  }
  0x2f   :  { %423 = vst [vmem:[#allocation3 + $0x94] sm:$0xf] %v422_v13  ;;  %v430_v16 = vld [vmem:[%s7946_s3 + $0xa8] sm:$0xf]  ;;  %425 = vst [vmem:[#allocation3 + $0x98] sm:$0xf] %v424_v14 }
  0x30   :  { %427 = vst [vmem:[#allocation3 + $0x9c] sm:$0xff] %v426_v15   ;;  %431 = vst [vmem:[#allocation3 + $0xa4] sm:$0xf] %v430_v16  ;;  %v432_v17 = vld [vmem:[%s7946_s3 + $0xa4] sm:$0xf]  ;;  %v442_v21 = vld [vmem:[%s7946_s3 + $0xbc] sm:$0xff]  }
  0x31   :  { %v438_v19 = vld [vmem:[%s7946_s3 + $0xb8] sm:$0xf]  ;;  %433 = vst [vmem:[#allocation3 + $0xa8] sm:$0xf] %v432_v17  ;;  %435 = vst [vmem:[#allocation3 + $0xac] sm:$0xff] %v434_v18   ;;  %v450_v24 = vld [vmem:[%s7946_s3 + $0xcc] sm:$0xff]  }
  0x32   :  { %439 = vst [vmem:[#allocation3 + $0xb4] sm:$0xf] %v438_v19  ;;  %v440_v20 = vld [vmem:[%s7946_s3 + $0xb4] sm:$0xf]  ;;  %v446_v22 = vld [vmem:[%s7946_s3 + $0xc8] sm:$0xf] }
  0x33   :  { %441 = vst [vmem:[#allocation3 + $0xb8] sm:$0xf] %v440_v20  ;;  %443 = vst [vmem:[#allocation3 + $0xbc] sm:$0xff] %v442_v21   ;;  %v448_v23 = vld [vmem:[%s7946_s3 + $0xc4] sm:$0xf]  ;;  %v458_v27 = vld [vmem:[%s7946_s3 + $0xdc] sm:$0xff]  }
  0x34   :  { %447 = vst [vmem:[#allocation3 + $0xc4] sm:$0xf] %v446_v22  ;;  %v454_v25 = vld [vmem:[%s7946_s3 + $0xd8] sm:$0xf]  ;;  %449 = vst [vmem:[#allocation3 + $0xc8] sm:$0xf] %v448_v23 }
  0x35   :  { %451 = vst [vmem:[#allocation3 + $0xcc] sm:$0xff] %v450_v24   ;;  %455 = vst [vmem:[#allocation3 + $0xd4] sm:$0xf] %v454_v25  ;;  %v456_v26 = vld [vmem:[%s7946_s3 + $0xd4] sm:$0xf]  ;;  %v466_v30 = vld [vmem:[%s7946_s3 + $0xec] sm:$0xff]  }
  0x36   :  { %v462_v28 = vld [vmem:[%s7946_s3 + $0xe8] sm:$0xf]  ;;  %457 = vst [vmem:[#allocation3 + $0xd8] sm:$0xf] %v456_v26  ;;  %459 = vst [vmem:[#allocation3 + $0xdc] sm:$0xff] %v458_v27   ;;  %v5035_v34 = vld [vmem:[%s7947_s4 + $0x40] sm:$0xff]  }
  0x37   :  { %463 = vst [vmem:[#allocation3 + $0xe4] sm:$0xf] %v462_v28  ;;  %v464_v29 = vld [vmem:[%s7946_s3 + $0xe4] sm:$0xf]  ;;  %v470_v31 = vld [vmem:[%s7946_s3 + $0xf8] sm:$0xf]  ;;  %5016 = vmatprep.subr.bf16.mxu1 %v5035_v34  ;;  %4560 = vmatprep.subr.bf16.mxu0 %v5035_v34 }
  0x38   :  { %465 = vst [vmem:[#allocation3 + $0xe8] sm:$0xf] %v464_v29  ;;  %467 = vst [vmem:[#allocation3 + $0xec] sm:$0xff] %v466_v30   ;;  %v472_v32 = vld [vmem:[%s7946_s3 + $0xf4] sm:$0xf]  ;;  %v5036_v35 = vld [vmem:[%s7947_s4] sm:$0xff]  }
  0x39   :  { %471 = vst [vmem:[#allocation3 + $0xf4] sm:$0xf] %v470_v31  ;;  %v474_v33 = vld [vmem:[%s7946_s3 + $0xfc] sm:$0xf]  ;;  %473 = vst [vmem:[#allocation3 + $0xf8] sm:$0xf] %v472_v32  ;;  %5024 = vmatpush3.bf16.msra.mxu1 %v5036_v35  ;;  %4561 = vmatpush3.bf16.msra.mxu0 %v5036_v35 }
  0x3a   :  { %475 = vst [vmem:[#allocation3 + $0xfc] sm:$0xf] %v474_v33  ;;  %v5037_v36 = vld [vmem:[%s7947_s4 + $0x48] sm:$0xff]   ;;  %v5039_v38 = vld [vmem:[%s7947_s4 + $0x50] sm:$0xff]   ;;  %v5041_v40 = vld [vmem:[%s7947_s4 + $0x58] sm:$0xff]  }
  0x3b   :  { %v5038_v37 = vld [vmem:[%s7947_s4 + $0x8] sm:$0xff]   ;;  %5017 = vmatprep.subr.bf16.mxu1 %v5037_v36  ;;  %4562 = vmatprep.subr.bf16.mxu0 %v5037_v36  ;;  %v5040_v39 = vld [vmem:[%s7947_s4 + $0x10] sm:$0xff]   ;;  %v5042_v41 = vld [vmem:[%s7947_s4 + $0x18] sm:$0xff]  }
  0x3c   :  { %v5043_v42 = vld [vmem:[%s7947_s4 + $0x60] sm:$0xff]   ;;  %v5045_v44 = vld [vmem:[%s7947_s4 + $0x68] sm:$0xff]   ;;  %v5047_v47 = vld [vmem:[%s7947_s4 + $0x70] sm:$0xff]  }
  0x3d   :  { %5025 = vmatpush3.bf16.msra.mxu1 %v5038_v37  ;;  %4563 = vmatpush3.bf16.msra.mxu0 %v5038_v37  ;;  %v5044_v43 = vld [vmem:[%s7947_s4 + $0x20] sm:$0xff]   ;;  %v5046_v46 = vld [vmem:[%s7947_s4 + $0x28] sm:$0xff]   ;;  %v5048_v48 = vld [vmem:[%s7947_s4 + $0x30] sm:$0xff]  }
  0x3e   :  { %5018 = vmatprep.subr.bf16.mxu1 %v5039_v38  ;;  %4564 = vmatprep.subr.bf16.mxu0 %v5039_v38  ;;  %v5053_v45 = vld [vmem:[%s7943_s0 + $0x84] ss:$8 sps:$4 sm:$0xff]   ;;  %v5049_v49 = vld [vmem:[%s7947_s4 + $0x78] sm:$0xff]   ;;  %v5051_v51 = vld [vmem:[%s7943_s0 + $0x80] ss:$8 sps:$4 sm:$0xff]  }
  0x3f   :  { %1051 = vmatprep.mubr.bf16.mxu1 %v5053_v45  ;;  %v5050_v50 = vld [vmem:[%s7947_s4 + $0x38] sm:$0xff]  }
  0x40   :  { %v5054_v52 = vld [vmem:[%s7943_s0 + $0x94] ss:$8 sps:$4 sm:$0xff]  }
  0x41   :  { %5026 = vmatpush3.bf16.msra.mxu1 %v5040_v39  ;;  %4565 = vmatpush3.bf16.msra.mxu0 %v5040_v39 }
  0x42   :  { %5019 = vmatprep.subr.bf16.mxu1 %v5041_v40  ;;  %4566 = vmatprep.subr.bf16.mxu0 %v5041_v40 }
  0x45   :  { %5027 = vmatpush3.bf16.msra.mxu1 %v5042_v41  ;;  %4567 = vmatpush3.bf16.msra.mxu0 %v5042_v41 }
  0x46   :  { %5020 = vmatprep.subr.bf16.mxu1 %v5043_v42  ;;  %4568 = vmatprep.subr.bf16.mxu0 %v5043_v42 }
  0x49   :  { %5028 = vmatpush3.bf16.msra.mxu1 %v5044_v43  ;;  %4569 = vmatpush3.bf16.msra.mxu0 %v5044_v43 }
  0x4a   :  { %5021 = vmatprep.subr.bf16.mxu1 %v5045_v44  ;;  %4570 = vmatprep.subr.bf16.mxu0 %v5045_v44 }
  0x4d   :  { %5029 = vmatpush3.bf16.msra.mxu1 %v5046_v46  ;;  %4571 = vmatpush3.bf16.msra.mxu0 %v5046_v46 }
  0x4e   :  { %5022 = vmatprep.subr.bf16.mxu1 %v5047_v47  ;;  %4572 = vmatprep.subr.bf16.mxu0 %v5047_v47 }
  0x51   :  { %5030 = vmatpush3.bf16.msra.mxu1 %v5048_v48  ;;  %4573 = vmatpush3.bf16.msra.mxu0 %v5048_v48 }
  0x52   :  { %5023 = vmatprep.subr.bf16.mxu1 %v5049_v49  ;;  %4574 = vmatprep.subr.bf16.mxu0 %v5049_v49 }
  0x55   :  { %5031 = vmatpush3.bf16.msra.mxu1 %v5050_v50 }
  0x56   :  { %4672 = vmatprep.subr.bf16.mxu1 %v5035_v34 }
  0x57   :  { %634 = vsyncadd [#allocation6 + $0x1], 4096  ;;  %4575 = vmatpush3.bf16.msra.mxu0 %v5050_v50  ;;  %v5056_v53 = vld [vmem:[%s7943_s0 + $0x90] ss:$8 sps:$4 sm:$0xff]   ;;  %v5099_v54 = vld [vmem:[%s7943_s0] ss:$8 sps:$4 sm:$0xff]  }
  0x58   :  { %1052 = vmatmul.mubr.bf16.vlgmr.msra.gmra.mrb[0].mxu1 %v5051_v51  ;;  %v5101_v55 = vld [vmem:[%s7943_s0 + $0x4] ss:$8 sps:$4 sm:$0xff]   ;;  %v5105_v57 = vld [vmem:[%s7943_s0 + $0x14] ss:$8 sps:$4 sm:$0xff]   ;;  %v5059_v58 = vld [vmem:[%s7943_s0 + $0xa0] ss:$8 sps:$4 sm:$0xff]  }
  0x59   :  { %4673 = vmatpush3.bf16.msra.mxu1 %v5036_v35  ;;  %1059 = vmatprep.mubr.bf16.mxu1 %v5054_v52  ;;  %v5057_v56 = vld [vmem:[%s7943_s0 + $0xa4] ss:$8 sps:$4 sm:$0xff]   ;;  %v5060_v59 = vld [vmem:[%s7943_s0 + $0xb4] ss:$8 sps:$4 sm:$0xff]   ;;  %v5107_v60 = vld [vmem:[%s7943_s0 + $0x10] ss:$8 sps:$4 sm:$0xff]  }
  0x5a   :  { %4674 = vmatprep.subr.bf16.mxu1 %v5037_v36  ;;  %987 = vmatprep.mubr.bf16.mxu0 %v5101_v55  ;;  %v5111_v61 = vld [vmem:[%s7943_s0 + $0x24] ss:$8 sps:$4 sm:$0xff]   ;;  %v5113_v62 = vld [vmem:[%s7943_s0 + $0x20] ss:$8 sps:$4 sm:$0xff]   ;;  %v5062_v63 = vld [vmem:[%s7943_s0 + $0xb0] ss:$8 sps:$4 sm:$0xff]  }
  0x5b   :  { %988 = vmatmul.mubr.bf16.vlgmr.msra.gmra.mrb[0].mxu0 %v5099_v54  ;;  %v5117_v0 = vld [vmem:[%s7943_s0 + $0x34] ss:$8 sps:$4 sm:$0xff]   ;;  %v5063_v1 = vld [vmem:[%s7943_s0 + $0xc4] ss:$8 sps:$4 sm:$0xff]   ;;  %v5119_v2 = vld [vmem:[%s7943_s0 + $0x30] ss:$8 sps:$4 sm:$0xff]  }
  0x5c   :  { %995 = vmatprep.mubr.bf16.mxu0 %v5105_v57  ;;  %v5065_v3 = vld [vmem:[%s7943_s0 + $0xc0] ss:$8 sps:$4 sm:$0xff]   ;;  %v5123_v4 = vld [vmem:[%s7943_s0 + $0x44] ss:$8 sps:$4 sm:$0xff]   ;;  %v5066_v5 = vld [vmem:[%s7943_s0 + $0xd4] ss:$8 sps:$4 sm:$0xff]  }
  0x5d   :  { %4675 = vmatpush3.bf16.msra.mxu1 %v5038_v37  ;;  %v5125_v6 = vld [vmem:[%s7943_s0 + $0x40] ss:$8 sps:$4 sm:$0xff]   ;;  %v5068_v7 = vld [vmem:[%s7943_s0 + $0xd0] ss:$8 sps:$4 sm:$0xff]   ;;  %v5129_v8 = vld [vmem:[%s7943_s0 + $0x54] ss:$8 sps:$4 sm:$0xff]  }
  0x5e   :  { %4676 = vmatprep.subr.bf16.mxu1 %v5039_v38  ;;  %v5069_v9 = vld [vmem:[%s7943_s0 + $0xe4] ss:$8 sps:$4 sm:$0xff]   ;;  %v5131_v10 = vld [vmem:[%s7943_s0 + $0x50] ss:$8 sps:$4 sm:$0xff]   ;;  %v5071_v11 = vld [vmem:[%s7943_s0 + $0xe0] ss:$8 sps:$4 sm:$0xff]  }
  0x5f   :  { %v5135_v12 = vld [vmem:[%s7943_s0 + $0x64] ss:$8 sps:$4 sm:$0xff]   ;;  %v5072_v13 = vld [vmem:[%s7943_s0 + $0xf4] ss:$8 sps:$4 sm:$0xff]   ;;  %v5137_v14 = vld [vmem:[%s7943_s0 + $0x60] ss:$8 sps:$4 sm:$0xff]  }
  0x60   :  { %1060 = vmatmul.mubr.bf16.gmra.mrb[4].mxu1 %v5056_v53  ;;  %v5074_v15 = vld [vmem:[%s7943_s0 + $0xf0] ss:$8 sps:$4 sm:$0xff]   ;;  %v5141_v16 = vld [vmem:[%s7943_s0 + $0x74] ss:$8 sps:$4 sm:$0xff]   ;;  %v5077_v17 = vld [vmem:[%s7944_s1 + $0x4] ss:$8 sps:$4 sm:$0xff]  }
  0x61   :  { %1067 = vmatprep.mubr.bf16.mxu1 %v5057_v56  ;;  %4677 = vmatpush3.bf16.msra.mxu1 %v5040_v39  ;;  %v5143_v18 = vld [vmem:[%s7943_s0 + $0x70] ss:$8 sps:$4 sm:$0xff]   ;;  %v5075_v19 = vld [vmem:[%s7944_s1] ss:$8 sps:$4 sm:$0xff]   ;;  %v5078_v20 = vld [vmem:[%s7944_s1 + $0x14] ss:$8 sps:$4 sm:$0xff]  }
  0x62   :  { %4678 = vmatprep.subr.bf16.mxu1 %v5041_v40  ;;  %v5080_v21 = vld [vmem:[%s7944_s1 + $0x10] ss:$8 sps:$4 sm:$0xff]   ;;  %v5081_v22 = vld [vmem:[%s7944_s1 + $0x24] ss:$8 sps:$4 sm:$0xff]   ;;  %v5083_v23 = vld [vmem:[%s7944_s1 + $0x20] ss:$8 sps:$4 sm:$0xff]  }
  0x63   :  { %996 = vmatmul.mubr.bf16.gmra.mrb[4].mxu0 %v5107_v60  ;;  %v5084_v24 = vld [vmem:[%s7944_s1 + $0x34] ss:$8 sps:$4 sm:$0xff]   ;;  %v5086_v25 = vld [vmem:[%s7944_s1 + $0x30] ss:$8 sps:$4 sm:$0xff]   ;;  %v5087_v26 = vld [vmem:[%s7944_s1 + $0x44] ss:$8 sps:$4 sm:$0xff]  }
  0x64   :  { %1003 = vmatprep.mubr.bf16.mxu0 %v5111_v61  ;;  %v5089_v27 = vld [vmem:[%s7944_s1 + $0x40] ss:$8 sps:$4 sm:$0xff]   ;;  %v5090_v28 = vld [vmem:[%s7944_s1 + $0x54] ss:$8 sps:$4 sm:$0xff]   ;;  %v5092_v29 = vld [vmem:[%s7944_s1 + $0x50] ss:$8 sps:$4 sm:$0xff]  }
  0x65   :  { %4679 = vmatpush3.bf16.msra.mxu1 %v5042_v41  ;;  %v5093_v30 = vld [vmem:[%s7944_s1 + $0x64] ss:$8 sps:$4 sm:$0xff]   ;;  %v5095_v31 = vld [vmem:[%s7944_s1 + $0x60] ss:$8 sps:$4 sm:$0xff]   ;;  %v5096_v32 = vld [vmem:[%s7944_s1 + $0x74] ss:$8 sps:$4 sm:$0xff]  }
  0x66   :  { %4680 = vmatprep.subr.bf16.mxu1 %v5043_v42  ;;  %v5098_v33 = vld [vmem:[%s7944_s1 + $0x70] ss:$8 sps:$4 sm:$0xff]   ;;  %v5102_v34 = vld [vmem:[%s7944_s1 + $0x84] ss:$8 sps:$4 sm:$0xff]   ;;  %v5104_v35 = vld [vmem:[%s7944_s1 + $0x80] ss:$8 sps:$4 sm:$0xff]  }
  0x67   :  { %v5108_v36 = vld [vmem:[%s7944_s1 + $0x94] ss:$8 sps:$4 sm:$0xff]   ;;  %v5110_v37 = vld [vmem:[%s7944_s1 + $0x90] ss:$8 sps:$4 sm:$0xff]   ;;  %v5114_v38 = vld [vmem:[%s7944_s1 + $0xa4] ss:$8 sps:$4 sm:$0xff]  }
  0x68   :  { %1068 = vmatmul.mubr.bf16.gmra.mrb[8].mxu1 %v5059_v58  ;;  %v5116_v39 = vld [vmem:[%s7944_s1 + $0xa0] ss:$8 sps:$4 sm:$0xff]   ;;  %v5120_v40 = vld [vmem:[%s7944_s1 + $0xb4] ss:$8 sps:$4 sm:$0xff]   ;;  %v5122_v41 = vld [vmem:[%s7944_s1 + $0xb0] ss:$8 sps:$4 sm:$0xff]  }
  0x69   :  { %1075 = vmatprep.mubr.bf16.mxu1 %v5060_v59  ;;  %4681 = vmatpush3.bf16.msra.mxu1 %v5044_v43  ;;  %v5126_v42 = vld [vmem:[%s7944_s1 + $0xc4] ss:$8 sps:$4 sm:$0xff]   ;;  %v5128_v43 = vld [vmem:[%s7944_s1 + $0xc0] ss:$8 sps:$4 sm:$0xff]   ;;  %v5134_v45 = vld [vmem:[%s7944_s1 + $0xd0] ss:$8 sps:$4 sm:$0xff]  }
  0x6a   :  { %4682 = vmatprep.subr.bf16.mxu1 %v5045_v44  ;;  %v5132_v44 = vld [vmem:[%s7944_s1 + $0xd4] ss:$8 sps:$4 sm:$0xff]  }
  0x6b   :  { %1004 = vmatmul.mubr.bf16.gmra.mrb[8].mxu0 %v5113_v62 }
  0x6c   :  { %1011 = vmatprep.mubr.bf16.mxu0 %v5117_v0 }
  0x6d   :  { %4683 = vmatpush3.bf16.msra.mxu1 %v5046_v46  ;;  %v5138_v46 = vld [vmem:[%s7944_s1 + $0xe4] ss:$8 sps:$4 sm:$0xff]  }
  0x6e   :  { %4684 = vmatprep.subr.bf16.mxu1 %v5047_v47  ;;  %v5140_v47 = vld [vmem:[%s7944_s1 + $0xe0] ss:$8 sps:$4 sm:$0xff]  }
  0x70   :  { %1076 = vmatmul.mubr.bf16.gmra.mrb[12].mxu1 %v5062_v63 }
  0x71   :  { %1083 = vmatprep.mubr.bf16.mxu1 %v5063_v1  ;;  %4685 = vmatpush3.bf16.msra.mxu1 %v5048_v48  ;;  %v5144_v48 = vld [vmem:[%s7944_s1 + $0xf4] ss:$8 sps:$4 sm:$0xff]  }
  0x72   :  { %4686 = vmatprep.subr.bf16.mxu1 %v5049_v49  ;;  %v5146_v49 = vld [vmem:[%s7944_s1 + $0xf0] ss:$8 sps:$4 sm:$0xff]  }
  0x73   :  { %1012 = vmatmul.mubr.bf16.gmra.mrb[12].mxu0 %v5119_v2 }
  0x74   :  { %1019 = vmatprep.mubr.bf16.mxu0 %v5123_v4 }
  0x75   :  { %4687 = vmatpush3.bf16.msra.mxu1 %v5050_v50 }
  0x78   :  { %1084 = vmatmul.mubr.bf16.gmra.mrb[16].mxu1 %v5065_v3 }
  0x79   :  { %1091 = vmatprep.mubr.bf16.mxu1 %v5066_v5 }
  0x7b   :  { %1020 = vmatmul.mubr.bf16.gmra.mrb[16].mxu0 %v5125_v6 }
  0x7c   :  { %1027 = vmatprep.mubr.bf16.mxu0 %v5129_v8 }
  0x80   :  { %1092 = vmatmul.mubr.bf16.gmra.mrb[20].mxu1 %v5068_v7 }
  0x81   :  { %1099 = vmatprep.mubr.bf16.mxu1 %v5069_v9 }
  0x83   :  { %1028 = vmatmul.mubr.bf16.gmra.mrb[20].mxu0 %v5131_v10 }
  0x84   :  { %1035 = vmatprep.mubr.bf16.mxu0 %v5135_v12 }
  0x88   :  { %1100 = vmatmul.mubr.bf16.gmra.mrb[24].mxu1 %v5071_v11 }
  0x89   :  { %1107 = vmatprep.mubr.bf16.mxu1 %v5072_v13 }
  0x8b   :  { %1036 = vmatmul.mubr.bf16.gmra.mrb[24].mxu0 %v5137_v14 }
  0x8c   :  { %1043 = vmatprep.mubr.bf16.mxu0 %v5141_v16 }
  0x90   :  { %1108 = vmatmul.mubr.bf16.gmra.mrb[28].mxu1 %v5074_v15 }
  0x91   :  { %1340 = vmatprep.mubr.bf16.mxu1 %v5077_v17 }
  0x93   :  { %1044 = vmatmul.mubr.bf16.gmra.mrb[28].mxu0 %v5143_v18 }
  0x98   :  { %1341 = vmatmul.mubr.bf16.vlgmr.msra.gmra.mrb[32].mxu1 %v5075_v19 }
  0x99   :  { %1348 = vmatprep.mubr.bf16.mxu1 %v5078_v20 }
  0xa0   :  { %1349 = vmatmul.mubr.bf16.gmra.mrb[36].mxu1 %v5080_v21 }
  0xa1   :  { %1356 = vmatprep.mubr.bf16.mxu1 %v5081_v22 }
  0xa8   :  { %1357 = vmatmul.mubr.bf16.gmra.mrb[40].mxu1 %v5083_v23 }
  0xa9   :  { %1364 = vmatprep.mubr.bf16.mxu1 %v5084_v24 }
  0xb0   :  { %1365 = vmatmul.mubr.bf16.gmra.mrb[44].mxu1 %v5086_v25 }
  0xb1   :  { %1372 = vmatprep.mubr.bf16.mxu1 %v5087_v26 }
  0xb8   :  { %1373 = vmatmul.mubr.bf16.gmra.mrb[48].mxu1 %v5089_v27 }
  0xb9   :  { %1380 = vmatprep.mubr.bf16.mxu1 %v5090_v28 }
  0xc0   :  { %1381 = vmatmul.mubr.bf16.gmra.mrb[52].mxu1 %v5092_v29 }
  0xc1   :  { %1388 = vmatprep.mubr.bf16.mxu1 %v5093_v30 }
  0xc8   :  { %1389 = vmatmul.mubr.bf16.gmra.mrb[56].mxu1 %v5095_v31 }
  0xc9   :  { %1396 = vmatprep.mubr.bf16.mxu1 %v5096_v32 }
  0xd0   :  { %1397 = vmatmul.mubr.bf16.gmra.mrb[60].mxu1 %v5098_v33 }
  0xd1   :  { %1404 = vmatprep.mubr.bf16.mxu1 %v5102_v34 }
  0xd8   :  { %1405 = vmatmul.mubr.bf16.gmra.mrb[64].mxu1 %v5104_v35 }
  0xd9   :  { %1412 = vmatprep.mubr.bf16.mxu1 %v5108_v36 }
  0xe0   :  { %1413 = vmatmul.mubr.bf16.gmra.mrb[68].mxu1 %v5110_v37 }
  0xe1   :  { %1420 = vmatprep.mubr.bf16.mxu1 %v5114_v38 }
  0xe8   :  { %1421 = vmatmul.mubr.bf16.gmra.mrb[72].mxu1 %v5116_v39 }
  0xe9   :  { %1428 = vmatprep.mubr.bf16.mxu1 %v5120_v40 }
  0xf0   :  { %1429 = vmatmul.mubr.bf16.gmra.mrb[76].mxu1 %v5122_v41 }
  0xf1   :  { %1436 = vmatprep.mubr.bf16.mxu1 %v5126_v42 }
  0xf8   :  { %1437 = vmatmul.mubr.bf16.gmra.mrb[80].mxu1 %v5128_v43 }
  0xf9   :  { %1444 = vmatprep.mubr.bf16.mxu1 %v5132_v44 }
 0x100   :  { %1445 = vmatmul.mubr.bf16.gmra.mrb[84].mxu1 %v5134_v45 }
 0x101   :  { %1452 = vmatprep.mubr.bf16.mxu1 %v5138_v46 }
 0x108   :  { %1453 = vmatmul.mubr.bf16.gmra.mrb[88].mxu1 %v5140_v47 }
 0x109   :  { %1460 = vmatprep.mubr.bf16.mxu1 %v5144_v48 }
 0x110   :  { %1461 = vmatmul.mubr.bf16.gmra.mrb[92].mxu1 %v5146_v49 }
 0x12b   :  { %v4624_v50 = vpop.f32.mrb[0].mxu1 }
 0x12c   :  { %v4625_v51 = vpop.f32.mrb[1].mxu1 }
 0x12d   :  { %v6202_v52 = vadd.f32 %v4625_v51, %v4624_v50  ;;  %v4627_v53 = vpop.f32.mrb[2].mxu1 }
 0x12e   :  { %v4628_v54 = vpop.f32.mrb[3].mxu1  ;;  %v4576_v57 = vpop.f32.mrb[0].mxu0 }
 0x12f   :  { %v6204_v55 = vadd.f32 %v4628_v54, %v4627_v53  ;;  %v4577_v59 = vpop.f32.mrb[1].mxu0 }
 0x130   :  { %v6208_v61 = vadd.f32 %v4577_v59, %v4576_v57  ;;  %v4579_v62 = vpop.f32.mrb[2].mxu0 }
 0x131   :  { %v4580_v1 = vpop.f32.mrb[3].mxu0 }
 0x132   :  { %v6212_v3 = vadd.f32 %v4580_v1, %v4579_v62 }
 0x133   :  { %v4630_v58 = vpop.f32.mrb[4].mxu1 }
 0x134   :  { %v4631_v60 = vpop.f32.mrb[5].mxu1 }
 0x135   :  { %v6210_v63 = vadd.f32 %v4631_v60, %v4630_v58  ;;  %v4633_v0 = vpop.f32.mrb[6].mxu1 }
 0x136   :  { %v4634_v2 = vpop.f32.mrb[7].mxu1  ;;  %v4582_v7 = vpop.f32.mrb[4].mxu0 }
 0x137   :  { %8065 = vst [vmem:[#allocation20_spill] sm:$0xff] %v6210_v63  ;;  %v6214_v4 = vadd.f32 %v4634_v2, %v4633_v0  ;;  %v4583_v9 = vpop.f32.mrb[5].mxu0 }
 0x138   :  { %v6220_v11 = vadd.f32 %v4583_v9, %v4582_v7  ;;  %v4585_v12 = vpop.f32.mrb[6].mxu0 }
 0x139   :  { %v4586_v15 = vpop.f32.mrb[7].mxu0 }
 0x13a   :  { %v6224_v17 = vadd.f32 %v4586_v15, %v4585_v12 }
 0x13b   :  { %v4636_v8 = vpop.f32.mrb[8].mxu1 }
 0x13c   :  { %v4637_v10 = vpop.f32.mrb[9].mxu1 }
 0x13d   :  { %v6222_v13 = vadd.f32 %v4637_v10, %v4636_v8  ;;  %v4639_v14 = vpop.f32.mrb[10].mxu1 }
 0x13e   :  { %v4640_v16 = vpop.f32.mrb[11].mxu1  ;;  %v4588_v21 = vpop.f32.mrb[8].mxu0 }
 0x13f   :  { %8066 = vst [vmem:[#allocation21_spill] sm:$0xff] %v6222_v13  ;;  %v6226_v18 = vadd.f32 %v4640_v16, %v4639_v14  ;;  %v4589_v23 = vpop.f32.mrb[9].mxu0 }
 0x140   :  { %v6232_v25 = vadd.f32 %v4589_v23, %v4588_v21  ;;  %v4591_v26 = vpop.f32.mrb[10].mxu0 }
 0x141   :  { %8067 = vst [vmem:[#allocation22_spill] sm:$0xff] %v6226_v18  ;;  %v4592_v29 = vpop.f32.mrb[11].mxu0 }
 0x142   :  { %v6236_v31 = vadd.f32 %v4592_v29, %v4591_v26 }
 0x143   :  { %v4642_v22 = vpop.f32.mrb[12].mxu1 }
 0x144   :  { %v4643_v24 = vpop.f32.mrb[13].mxu1 }
 0x145   :  { %v6234_v27 = vadd.f32 %v4643_v24, %v4642_v22  ;;  %v4645_v28 = vpop.f32.mrb[14].mxu1 }
 0x146   :  { %v4646_v30 = vpop.f32.mrb[15].mxu1  ;;  %v4594_v35 = vpop.f32.mrb[12].mxu0 }
 0x147   :  { %8068 = vst [vmem:[#allocation23_spill] sm:$0xff] %v6234_v27  ;;  %v6238_v32 = vadd.f32 %v4646_v30, %v4645_v28  ;;  %v4595_v37 = vpop.f32.mrb[13].mxu0 }
 0x148   :  { %v6244_v39 = vadd.f32 %v4595_v37, %v4594_v35  ;;  %v4597_v40 = vpop.f32.mrb[14].mxu0 }
 0x149   :  { %8069 = vst [vmem:[#allocation24_spill] sm:$0xff] %v6238_v32  ;;  %v4598_v43 = vpop.f32.mrb[15].mxu0 }
 0x14a   :  { %v6248_v45 = vadd.f32 %v4598_v43, %v4597_v40 }
 0x14b   :  { %v4648_v36 = vpop.f32.mrb[16].mxu1 }
 0x14c   :  { %v4649_v38 = vpop.f32.mrb[17].mxu1 }
 0x14d   :  { %v6246_v41 = vadd.f32 %v4649_v38, %v4648_v36  ;;  %v4651_v42 = vpop.f32.mrb[18].mxu1 }
 0x14e   :  { %v4652_v44 = vpop.f32.mrb[19].mxu1  ;;  %v4600_v49 = vpop.f32.mrb[16].mxu0 }
 0x14f   :  { %8070 = vst [vmem:[#allocation25_spill] sm:$0xff] %v6246_v41  ;;  %v6250_v46 = vadd.f32 %v4652_v44, %v4651_v42  ;;  %v4601_v51 = vpop.f32.mrb[17].mxu0 }
 0x150   :  { %v6256_v54 = vadd.f32 %v4601_v51, %v4600_v49  ;;  %v4603_v57 = vpop.f32.mrb[18].mxu0 }
 0x151   :  { %8071 = vst [vmem:[#allocation26_spill] sm:$0xff] %v6250_v46  ;;  %v4604_v60 = vpop.f32.mrb[19].mxu0 }
 0x152   :  { %v6260_v0 = vadd.f32 %v4604_v60, %v4603_v57 }
 0x153   :  { %v4654_v50 = vpop.f32.mrb[20].mxu1 }
 0x154   :  { %v4655_v53 = vpop.f32.mrb[21].mxu1 }
 0x155   :  { %v6258_v58 = vadd.f32 %v4655_v53, %v4654_v50  ;;  %v4657_v59 = vpop.f32.mrb[22].mxu1 }
 0x156   :  { %v4658_v62 = vpop.f32.mrb[23].mxu1  ;;  %v4606_v8 = vpop.f32.mrb[20].mxu0 }
 0x157   :  { %8072 = vst [vmem:[#allocation27_spill] sm:$0xff] %v6258_v58  ;;  %v6262_v1 = vadd.f32 %v4658_v62, %v4657_v59  ;;  %v4607_v10 = vpop.f32.mrb[21].mxu0 }
 0x158   :  { %v6268_v14 = vadd.f32 %v4607_v10, %v4606_v8  ;;  %v4609_v15 = vpop.f32.mrb[22].mxu0 }
 0x159   :  { %8073 = vst [vmem:[#allocation28_spill] sm:$0xff] %v6262_v1  ;;  %v4610_v22 = vpop.f32.mrb[23].mxu0 }
 0x15a   :  { %v6272_v24 = vadd.f32 %v4610_v22, %v4609_v15 }
 0x15b   :  { %v4660_v9 = vpop.f32.mrb[24].mxu1 }
 0x15c   :  { %v4661_v12 = vpop.f32.mrb[25].mxu1 }
 0x15d   :  { %v6270_v16 = vadd.f32 %v4661_v12, %v4660_v9  ;;  %v4663_v21 = vpop.f32.mrb[26].mxu1 }
 0x15e   :  { %v4664_v23 = vpop.f32.mrb[27].mxu1  ;;  %v4612_v30 = vpop.f32.mrb[24].mxu0 }
 0x15f   :  { %8074 = vst [vmem:[#allocation29_spill] sm:$0xff] %v6270_v16  ;;  %v6274_v26 = vadd.f32 %v4664_v23, %v4663_v21  ;;  %v4613_v36 = vpop.f32.mrb[25].mxu0 }
 0x160   :  { %v6280_v38 = vadd.f32 %v4613_v36, %v4612_v30  ;;  %v4615_v40 = vpop.f32.mrb[26].mxu0 }
 0x161   :  { %8075 = vst [vmem:[#allocation30_spill] sm:$0xff] %v6274_v26  ;;  %v4616_v44 = vpop.f32.mrb[27].mxu0 }
 0x162   :  { %v6284_v50 = vadd.f32 %v4616_v44, %v4615_v40 }
 0x163   :  { %v4666_v35 = vpop.f32.mrb[28].mxu1 }
 0x164   :  { %v4667_v37 = vpop.f32.mrb[29].mxu1 }
 0x165   :  { %v6282_v42 = vadd.f32 %v4667_v37, %v4666_v35  ;;  %v4669_v43 = vpop.f32.mrb[30].mxu1 }
 0x166   :  { %v4670_v49 = vpop.f32.mrb[31].mxu1  ;;  %v4618_v59 = vpop.f32.mrb[28].mxu0 }
 0x167   :  { %8076 = vst [vmem:[#allocation31_spill] sm:$0xff] %v6282_v42  ;;  %v6286_v51 = vadd.f32 %v4670_v49, %v4669_v43  ;;  %v4619_v62 = vpop.f32.mrb[29].mxu0 }
 0x168   :  { %v6292_v9 = vadd.f32 %v4619_v62, %v4618_v59  ;;  %v4621_v10 = vpop.f32.mrb[30].mxu0 }
 0x169   :  { %8077 = vst [vmem:[#allocation32_spill] sm:$0xff] %v6286_v51  ;;  %v4622_v21 = vpop.f32.mrb[31].mxu0 }
 0x16a   :  { %v6296_v23 = vadd.f32 %v4622_v21, %v4621_v10 }
 0x16b   :  { %v4688_v60 = vpop.f32.mrb[32].mxu1 }
 0x16c   :  { %v4689_v8 = vpop.f32.mrb[33].mxu1 }
 0x16d   :  { %v6294_v12 = vadd.f32 %v4689_v8, %v4688_v60  ;;  %v4691_v15 = vpop.f32.mrb[34].mxu1 }
 0x16e   :  { %v4692_v22 = vpop.f32.mrb[35].mxu1 }
 0x16f   :  { %v6298_v30 = vadd.f32 %v4692_v22, %v4691_v15 }
 0x173   :  { %v4694_v37 = vpop.f32.mrb[36].mxu1 }
 0x174   :  { %v4695_v40 = vpop.f32.mrb[37].mxu1 }
 0x175   :  { %v6304_v43 = vadd.f32 %v4695_v40, %v4694_v37  ;;  %v4697_v44 = vpop.f32.mrb[38].mxu1 }
 0x176   :  { %v4698_v49 = vpop.f32.mrb[39].mxu1 }
 0x177   :  { %v6306_v59 = vadd.f32 %v4698_v49, %v4697_v44 }
 0x17b   :  { %v4700_v62 = vpop.f32.mrb[40].mxu1 }
 0x17c   :  { %v4701_v8 = vpop.f32.mrb[41].mxu1 }
 0x17d   :  { %v6310_v10 = vadd.f32 %v4701_v8, %v4700_v62  ;;  %v4703_v15 = vpop.f32.mrb[42].mxu1 }
 0x17e   :  { %v4704_v21 = vpop.f32.mrb[43].mxu1 }
 0x17f   :  { %v6312_v22 = vadd.f32 %v4704_v21, %v4703_v15 }
 0x183   :  { %v4706_v37 = vpop.f32.mrb[44].mxu1 }
 0x184   :  { %v4707_v40 = vpop.f32.mrb[45].mxu1 }
 0x185   :  { %v6316_v29 = vadd.f32 %v4707_v40, %v4706_v37  ;;  %v4709_v44 = vpop.f32.mrb[46].mxu1 }
 0x186   :  { %v4710_v49 = vpop.f32.mrb[47].mxu1 }
 0x187   :  { %v6318_v7 = vadd.f32 %v4710_v49, %v4709_v44 }
 0x18b   :  { %v4712_v62 = vpop.f32.mrb[48].mxu1 }
 0x18c   :  { %v4713_v8 = vpop.f32.mrb[49].mxu1 }
 0x18d   :  { %v6322_v34 = vadd.f32 %v4713_v8, %v4712_v62  ;;  %v4715_v15 = vpop.f32.mrb[50].mxu1 }
 0x18e   :  { %v4716_v21 = vpop.f32.mrb[51].mxu1 }
 0x18f   :  { %v6324_v20 = vadd.f32 %v4716_v21, %v4715_v15 }
 0x193   :  { %v4718_v37 = vpop.f32.mrb[52].mxu1 }
 0x194   :  { %v4719_v40 = vpop.f32.mrb[53].mxu1 }
 0x195   :  { %v6328_v56 = vadd.f32 %v4719_v40, %v4718_v37  ;;  %v4721_v44 = vpop.f32.mrb[54].mxu1 }
 0x196   :  { %v4722_v49 = vpop.f32.mrb[55].mxu1 }
 0x197   :  { %v6330_v35 = vadd.f32 %v4722_v49, %v4721_v44 }
 0x19b   :  { %v4724_v62 = vpop.f32.mrb[56].mxu1 }
 0x19c   :  { %v4725_v8 = vpop.f32.mrb[57].mxu1 }
 0x19d   :  { %v6334_v28 = vadd.f32 %v4725_v8, %v4724_v62  ;;  %v4727_v15 = vpop.f32.mrb[58].mxu1 }
 0x19e   :  { %v4728_v21 = vpop.f32.mrb[59].mxu1 }
 0x19f   :  { %v6336_v2 = vadd.f32 %v4728_v21, %v4727_v15 }
 0x1a3   :  { %v4730_v37 = vpop.f32.mrb[60].mxu1 }
 0x1a4   :  { %v4731_v40 = vpop.f32.mrb[61].mxu1 }
 0x1a5   :  { %v6340_v47 = vadd.f32 %v4731_v40, %v4730_v37  ;;  %v4733_v44 = vpop.f32.mrb[62].mxu1 }
 0x1a6   :  { %v4734_v49 = vpop.f32.mrb[63].mxu1 }
 0x1a7   :  { %v6342_v48 = vadd.f32 %v4734_v49, %v4733_v44 }
 0x1ab   :  { %v4736_v62 = vpop.f32.mrb[64].mxu1 }
 0x1ac   :  { %v4737_v8 = vpop.f32.mrb[65].mxu1 }
 0x1ad   :  { %v6346_v33 = vadd.f32 %v4737_v8, %v4736_v62  ;;  %v4739_v15 = vpop.f32.mrb[66].mxu1 }
 0x1ae   :  { %v4740_v21 = vpop.f32.mrb[67].mxu1 }
 0x1af   :  { %v6348_v57 = vadd.f32 %v4740_v21, %v4739_v15 }
 0x1b3   :  { %v4742_v37 = vpop.f32.mrb[68].mxu1 }
 0x1b4   :  { %v4743_v40 = vpop.f32.mrb[69].mxu1 }
 0x1b5   :  { %v6352_v19 = vadd.f32 %v4743_v40, %v4742_v37  ;;  %v4745_v44 = vpop.f32.mrb[70].mxu1 }
 0x1b6   :  { %v4746_v49 = vpop.f32.mrb[71].mxu1 }
 0x1b7   :  { %v6354_v60 = vadd.f32 %v4746_v49, %v4745_v44 }
 0x1bb   :  { %v4748_v62 = vpop.f32.mrb[72].mxu1 }
 0x1bc   :  { %v4749_v8 = vpop.f32.mrb[73].mxu1 }
 0x1bd   :  { %v6358_v5 = vadd.f32 %v4749_v8, %v4748_v62  ;;  %v4751_v15 = vpop.f32.mrb[74].mxu1 }
 0x1be   :  { %v4752_v21 = vpop.f32.mrb[75].mxu1 }
 0x1bf   :  { %v4753_v36 = vadd.f32 %v4752_v21, %v4751_v15 }
 0x1c1   :  { %v1495_v6 = vpack.c.bf16 %v4753_v36, %v6358_v5 }
 0x1c3   :  { %v4754_v42 = vpop.f32.mrb[76].mxu1 }
 0x1c4   :  { %v4755_v51 = vpop.f32.mrb[77].mxu1 }
 0x1c5   :  { %v4756_v37 = vadd.f32 %v4755_v51, %v4754_v42  ;;  %v4757_v40 = vpop.f32.mrb[78].mxu1 }
 0x1c6   :  { %v4758_v16 = vpop.f32.mrb[79].mxu1 }
 0x1c7   :  { %v4759_v26 = vadd.f32 %v4758_v16, %v4757_v40 }
 0x1c9   :  { %v1496_v44 = vpack.c.bf16 %v4759_v26, %v4756_v37 }
 0x1cb   :  { %v4760_v49 = vpop.f32.mrb[80].mxu1 }
 0x1cc   :  { %v4761_v58 = vpop.f32.mrb[81].mxu1 }
 0x1cd   :  { %v4762_v1 = vadd.f32 %v4761_v58, %v4760_v49  ;;  %v4763_v53 = vpop.f32.mrb[82].mxu1 }
 0x1ce   :  { %v4764_v41 = vpop.f32.mrb[83].mxu1 }
 0x1cf   :  { %v4765_v46 = vadd.f32 %v4764_v41, %v4763_v53 }
 0x1d1   :  { %v1497_v62 = vpack.c.bf16 %v4765_v46, %v4762_v1 }
 0x1d3   :  { %v4766_v8 = vpop.f32.mrb[84].mxu1 }
 0x1d4   :  { %v4767_v27 = vpop.f32.mrb[85].mxu1 }
 0x1d5   :  { %v4768_v32 = vadd.f32 %v4767_v27, %v4766_v8  ;;  %v4769_v15 = vpop.f32.mrb[86].mxu1  ;;  %v8078_v27 = vpack.c.bf16 %v6298_v30, %v6294_v12 }
 0x1d6   :  { %v4770_v21 = vpop.f32.mrb[87].mxu1 }
 0x1d7   :  { %v4771_v5 = vadd.f32 %v4770_v21, %v4769_v15  ;;  %1537 = vmatprep.subr.bf16.mxu0 %v8078_v27 }
 0x1d9   :  { %v1498_v36 = vpack.c.bf16 %v4771_v5, %v4768_v32 }
 0x1db   :  { %v4772_v13 = vpop.f32.mrb[88].mxu1 }
 0x1dc   :  { %v4773_v42 = vpop.f32.mrb[89].mxu1 }
 0x1dd   :  { %v4774_v51 = vadd.f32 %v4773_v42, %v4772_v13  ;;  %v4775_v18 = vpop.f32.mrb[90].mxu1 }
 0x1de   :  { %v4776_v16 = vpop.f32.mrb[91].mxu1 }
 0x1df   :  { %v4777_v26 = vadd.f32 %v4776_v16, %v4775_v18 }
 0x1e1   :  { %v1499_v37 = vpack.c.bf16 %v4777_v26, %v4774_v51 }
 0x1e3   :  { %v4778_v40 = vpop.f32.mrb[92].mxu1 }
 0x1e4   :  { %v4779_v58 = vpop.f32.mrb[93].mxu1 }
 0x1e5   :  { %v4780_v49 = vadd.f32 %v4779_v58, %v4778_v40  ;;  %v4781_v63 = vpop.f32.mrb[94].mxu1 }
 0x1e6   :  { %v4782_v41 = vpop.f32.mrb[95].mxu1 }
 0x1e7   :  { %v4783_v46 = vadd.f32 %v4782_v41, %v4781_v63 }
 0x1e9   :  { %v1500_v1 = vpack.c.bf16 %v4783_v46, %v4780_v49 }
 0x1ea   :  { %5607 = dma.done.wait [#allocation6], 4096 }
 0x1eb   :  { %5608 = vsyncadd [#allocation6], 4294963200  ;;  %v8079_v13 = vpack.c.bf16 %v6212_v3, %v6208_v61  ;;  %v8080_v18 = vpack.c.bf16 %v6306_v59, %v6304_v43  ;;  %v8081_v32 = vpack.c.bf16 %v6224_v17, %v6220_v11  ;;  %v8082_v63 = vpack.c.bf16 %v6312_v22, %v6310_v10  ;;  %v1506_v53 = vld [vmem:[#allocation2 + $0x8] sm:$0xff]  ;;  %v6441_v43 = vld [vmem:[#allocation2 + $0x18] sm:$0xff] }
 0x1ec   :  { %1569 = vmatprep.mubr.bf16.mxu0 %v1506_v53  ;;  %1821 = vmatprep.mubr.bf16.mxu1 %v1506_v53  ;;  %v8083_v12 = vpack.c.bf16 %v6236_v31, %v6232_v25  ;;  %v8084_v61 = vpack.c.bf16 %v6318_v7, %v6316_v29  ;;  %v8085_v3 = vpack.c.bf16 %v6248_v45, %v6244_v39  ;;  %v8100_v7 = vld [vmem:[#allocation21_spill] sm:$0xff]  ;;  %v6445_v59 = vld [vmem:[#allocation2 + $0x10] sm:$0xff]  ;;  %v6451_v10 = vld [vmem:[#allocation2 + $0x20] sm:$0xff] }
 0x1ed   :  { %1538 = vmatpush1.bf16.msra.mxu0 %v8079_v13  ;;  %v8086_v11 = vpack.c.bf16 %v6324_v20, %v6322_v34  ;;  %v8087_v17 = vpack.c.bf16 %v6260_v0, %v6256_v54  ;;  %v8088_v25 = vpack.c.bf16 %v6330_v35, %v6328_v56  ;;  %v8089_v31 = vpack.c.bf16 %v6272_v24, %v6268_v14  ;;  %v8103_v24 = vld [vmem:[#allocation23_spill] sm:$0xff]  ;;  %v6439_v35 = vld [vmem:[#allocation2] sm:$0xff]  ;;  %v6469_v21 = vld [vmem:[#allocation2 + $0x50] sm:$0xff] }
 0x1ee   :  { %1539 = vmatprep.subr.bf16.mxu0 %v8080_v18  ;;  %v8090_v39 = vpack.c.bf16 %v6336_v2, %v6334_v28  ;;  %v8091_v20 = vpack.c.bf16 %v6284_v50, %v6280_v38  ;;  %v8092_v34 = vpack.c.bf16 %v6342_v48, %v6340_v47  ;;  %v8093_v56 = vpack.c.bf16 %v6296_v23, %v6292_v9  ;;  %v8097_v2 = vld [vmem:[#allocation20_spill] sm:$0xff]  ;;  %v8099_v48 = vld [vmem:[#allocation22_spill] sm:$0xff]  ;;  %v8109_v38 = vld [vmem:[#allocation27_spill] sm:$0xff] }
 0x1ef   :  { %v8094_v45 = vpack.c.bf16 %v6348_v57, %v6346_v33  ;;  %v8095_v54 = vpack.c.bf16 %v6204_v55, %v6202_v52  ;;  %v8096_v0 = vpack.c.bf16 %v6354_v60, %v6352_v19  ;;  %v8098_v47 = vpack.c.bf16 %v6214_v4, %v8097_v2  ;;  %v8102_v33 = vld [vmem:[#allocation24_spill] sm:$0xff]  ;;  %v8105_v52 = vld [vmem:[#allocation26_spill] sm:$0xff]  ;;  %v8106_v55 = vld [vmem:[#allocation25_spill] sm:$0xff] }
 0x1f0   :  { %v8101_v14 = vpack.c.bf16 %v8099_v48, %v8100_v7  ;;  %v8104_v28 = vpack.c.bf16 %v8102_v33, %v8103_v24  ;;  %v8107_v29 = vpack.c.bf16 %v8105_v52, %v8106_v55  ;;  %v8108_v19 = vld [vmem:[#allocation28_spill] sm:$0xff]  ;;  %v8112_v50 = vld [vmem:[#allocation29_spill] sm:$0xff]  ;;  %v8115_v23 = vld [vmem:[#allocation31_spill] sm:$0xff] }
 0x1f1   :  { %1540 = vmatpush1.bf16.msra.mxu0 %v8081_v32  ;;  %v8110_v4 = vpack.c.bf16 %v8108_v19, %v8109_v38  ;;  %v8114_v9 = vld [vmem:[#allocation32_spill] sm:$0xff]  ;;  %v6447_v60 = vld [vmem:[#allocation2 + $0x28] sm:$0xff]  ;;  %v6453_v22 = vld [vmem:[#allocation2 + $0x38] sm:$0xff] }
 0x1f2   :  { %1541 = vmatprep.subr.bf16.mxu0 %v8082_v63  ;;  %v8116_v30 = vpack.c.bf16 %v8114_v9, %v8115_v23  ;;  %v6463_v8 = vld [vmem:[#allocation2 + $0x40] sm:$0xff]  ;;  %v6465_v15 = vld [vmem:[#allocation2 + $0x58] sm:$0xff]  ;;  %v6471_v5 = vld [vmem:[#allocation2 + $0x68] sm:$0xff] }
 0x1f3   :  { %v6477_v42 = vld [vmem:[#allocation2 + $0x78] sm:$0xff]  ;;  %v6481_v51 = vld [vmem:[#allocation2 + $0x70] sm:$0xff]  ;;  %v6483_v16 = vld [vmem:[#allocation2 + $0x88] sm:$0xff] }
 0x1f4   :  { %v6487_v26 = vld [vmem:[#allocation2 + $0x80] sm:$0xff]  ;;  %v6493_v40 = vld [vmem:[#allocation2 + $0x90] sm:$0xff]  ;;  %v6495_v58 = vld [vmem:[#allocation2 + $0xa8] sm:$0xff] }
 0x1f5   :  { %1542 = vmatpush1.bf16.msra.mxu0 %v8083_v12  ;;  %v6499_v49 = vld [vmem:[#allocation2 + $0xa0] sm:$0xff]  ;;  %v6501_v41 = vld [vmem:[#allocation2 + $0xb8] sm:$0xff]  ;;  %v6505_v46 = vld [vmem:[#allocation2 + $0xb0] sm:$0xff] }
 0x1f6   :  { %1543 = vmatprep.subr.bf16.mxu0 %v8084_v61  ;;  %v6511_v27 = vld [vmem:[#allocation2 + $0xc0] sm:$0xff]  ;;  %v6513_v13 = vld [vmem:[#allocation2 + $0xd8] sm:$0xff]  ;;  %v6517_v18 = vld [vmem:[#allocation2 + $0xd0] sm:$0xff] }
 0x1f7   :  { %v6519_v32 = vld [vmem:[#allocation2 + $0xe8] sm:$0xff]  ;;  %v6523_v63 = vld [vmem:[#allocation2 + $0xe0] sm:$0xff]  ;;  %v6525_v53 = vld [vmem:[#allocation2 + $0xf8] sm:$0xff] }
 0x1f8   :  { %v6529_v12 = vld [vmem:[#allocation2 + $0xf0] sm:$0xff] }
 0x1f9   :  { %1544 = vmatpush1.bf16.msra.mxu0 %v8085_v3 }
 0x1fa   :  { %1545 = vmatprep.subr.bf16.mxu0 %v8086_v11 }
 0x1fd   :  { %1546 = vmatpush1.bf16.msra.mxu0 %v8087_v17 }
 0x1fe   :  { %1547 = vmatprep.subr.bf16.mxu0 %v8088_v25 }
 0x201   :  { %1548 = vmatpush1.bf16.msra.mxu0 %v8089_v31 }
 0x202   :  { %1549 = vmatprep.subr.bf16.mxu0 %v8090_v39 }
 0x205   :  { %1550 = vmatpush1.bf16.msra.mxu0 %v8091_v20 }
 0x206   :  { %1551 = vmatprep.subr.bf16.mxu0 %v8092_v34 }
 0x209   :  { %1552 = vmatpush1.bf16.msra.mxu0 %v8093_v56 }
 0x20a   :  { %1553 = vmatprep.subr.bf16.mxu0 %v8094_v45 }
 0x20d   :  { %1554 = vmatpush1.bf16.msra.mxu0 %v8095_v54 }
 0x20e   :  { %1555 = vmatprep.subr.bf16.mxu0 %v8096_v0 }
 0x211   :  { %1556 = vmatpush1.bf16.msra.mxu0 %v8098_v47 }
 0x212   :  { %1557 = vmatprep.subr.bf16.mxu0 %v1495_v6  ;;  %v8111_v6 = vld [vmem:[#allocation30_spill] sm:$0xff] }
 0x213   :  { %v8113_v57 = vpack.c.bf16 %v8111_v6, %v8112_v50 }
 0x215   :  { %1558 = vmatpush1.bf16.msra.mxu0 %v8101_v14 }
 0x216   :  { %1559 = vmatprep.subr.bf16.mxu0 %v1496_v44  ;;  %v6457_v44 = vld [vmem:[#allocation2 + $0x30] sm:$0xff] }
 0x219   :  { %1560 = vmatpush1.bf16.msra.mxu0 %v8104_v28 }
 0x21a   :  { %1561 = vmatprep.subr.bf16.mxu0 %v1497_v62  ;;  %v6459_v62 = vld [vmem:[#allocation2 + $0x48] sm:$0xff] }
 0x21d   :  { %1562 = vmatpush1.bf16.msra.mxu0 %v8107_v29 }
 0x21e   :  { %1563 = vmatprep.subr.bf16.mxu0 %v1498_v36  ;;  %v6475_v36 = vld [vmem:[#allocation2 + $0x60] sm:$0xff] }
 0x221   :  { %1564 = vmatpush1.bf16.msra.mxu0 %v8110_v4 }
 0x222   :  { %1565 = vmatprep.subr.bf16.mxu0 %v1499_v37  ;;  %v6489_v37 = vld [vmem:[#allocation2 + $0x98] sm:$0xff] }
 0x225   :  { %1566 = vmatpush1.bf16.msra.mxu0 %v8113_v57 }
 0x226   :  { %1567 = vmatprep.subr.bf16.mxu0 %v1500_v1  ;;  %v6507_v1 = vld [vmem:[#allocation2 + $0xc8] sm:$0xff] }
 0x229   :  { %1568 = vmatpush1.bf16.msra.mxu0 %v8116_v30 }
 0x22c   :  { %1570 = vmatmul.mubr.bf16.vlgmr.msra.gmra.mrb[32].mxu0 %v6439_v35 }
 0x22d   :  { %1579 = vmatprep.mubr.bf16.mxu0 %v6441_v43 }
 0x234   :  { %1580 = vmatmul.mubr.bf16.gmra.mrb[36].mxu0 %v6445_v59 }
 0x235   :  { %1589 = vmatprep.mubr.bf16.mxu0 %v6447_v60 }
 0x23c   :  { %1590 = vmatmul.mubr.bf16.gmra.mrb[40].mxu0 %v6451_v10 }
 0x23d   :  { %1599 = vmatprep.mubr.bf16.mxu0 %v6453_v22 }
 0x244   :  { %1600 = vmatmul.mubr.bf16.gmra.mrb[44].mxu0 %v6457_v44 }
 0x245   :  { %1609 = vmatprep.mubr.bf16.mxu0 %v6459_v62 }
 0x24c   :  { %1610 = vmatmul.mubr.bf16.gmra.mrb[48].mxu0 %v6463_v8 }
 0x24d   :  { %1619 = vmatprep.mubr.bf16.mxu0 %v6465_v15 }
 0x254   :  { %1620 = vmatmul.mubr.bf16.gmra.mrb[52].mxu0 %v6469_v21 }
 0x255   :  { %1629 = vmatprep.mubr.bf16.mxu0 %v6471_v5 }
 0x25c   :  { %1630 = vmatmul.mubr.bf16.gmra.mrb[56].mxu0 %v6475_v36 }
 0x25d   :  { %1639 = vmatprep.mubr.bf16.mxu0 %v6477_v42 }
 0x264   :  { %1640 = vmatmul.mubr.bf16.gmra.mrb[60].mxu0 %v6481_v51 }
 0x265   :  { %1649 = vmatprep.mubr.bf16.mxu0 %v6483_v16 }
 0x26c   :  { %1650 = vmatmul.mubr.bf16.gmra.mrb[64].mxu0 %v6487_v26 }
 0x26d   :  { %1659 = vmatprep.mubr.bf16.mxu0 %v6489_v37 }
 0x274   :  { %1660 = vmatmul.mubr.bf16.gmra.mrb[68].mxu0 %v6493_v40 }
 0x275   :  { %1669 = vmatprep.mubr.bf16.mxu0 %v6495_v58 }
 0x27c   :  { %1670 = vmatmul.mubr.bf16.gmra.mrb[72].mxu0 %v6499_v49 }
 0x27d   :  { %1679 = vmatprep.mubr.bf16.mxu0 %v6501_v41 }
 0x284   :  { %1680 = vmatmul.mubr.bf16.gmra.mrb[76].mxu0 %v6505_v46 }
 0x285   :  { %1689 = vmatprep.mubr.bf16.mxu0 %v6507_v1 }
 0x28c   :  { %1690 = vmatmul.mubr.bf16.gmra.mrb[80].mxu0 %v6511_v27 }
 0x28d   :  { %1699 = vmatprep.mubr.bf16.mxu0 %v6513_v13 }
 0x294   :  { %1700 = vmatmul.mubr.bf16.gmra.mrb[84].mxu0 %v6517_v18 }
 0x295   :  { %1709 = vmatprep.mubr.bf16.mxu0 %v6519_v32 }
 0x29c   :  { %1710 = vmatmul.mubr.bf16.gmra.mrb[88].mxu0 %v6523_v63 }
 0x29d   :  { %1719 = vmatprep.mubr.bf16.mxu0 %v6525_v53 }
 0x2a4   :  { %1720 = vmatmul.mubr.bf16.gmra.mrb[92].mxu0 %v6529_v12 }
 0x2ff   :  { %v6532_v61 = vpop.f32.mrb[32].mxu0 }
 0x300   :  { %1730 = vst [vmem:[#allocation4] sm:$0xff] %v6532_v61  ;;  %v6536_v3 = vmax.f32 %v6532_v61, 0.0  ;;  %v1573_v11 = vpop.f32.mrb[33].mxu0 }
 0x301   :  { %v6538_v17 = vmax.f32 %v1573_v11, 0.0  ;;  %v6540_v25 = vpop.f32.mrb[34].mxu0 }
 0x302   :  { %8117 = vst [vmem:[#allocation20_spill] sm:$0xff] %v6536_v3  ;;  %1731 = vst [vmem:[#allocation4 + $0x8] sm:$0xff] %v6540_v25  ;;  %v6544_v31 = vmax.f32 %v6540_v25, 0.0  ;;  %v1577_v39 = vpop.f32.mrb[35].mxu0 }
 0x303   :  { %8118 = vst [vmem:[#allocation22_spill] sm:$0xff] %v6538_v17  ;;  %v6548_v34 = vmax.f32 %v1577_v39, 0.0 }
 0x304   :  { %8119 = vst [vmem:[#allocation21_spill] sm:$0xff] %v6544_v31 }
 0x305   :  { %8120 = vst [vmem:[#allocation24_spill] sm:$0xff] %v6548_v34 }
 0x307   :  { %v6550_v56 = vpop.f32.mrb[36].mxu0 }
 0x308   :  { %1732 = vst [vmem:[#allocation4 + $0x10] sm:$0xff] %v6550_v56  ;;  %v6554_v45 = vmax.f32 %v6550_v56, 0.0  ;;  %v1583_v54 = vpop.f32.mrb[37].mxu0 }
 0x309   :  { %v6556_v0 = vmax.f32 %v1583_v54, 0.0  ;;  %v6558_v2 = vpop.f32.mrb[38].mxu0 }
 0x30a   :  { %8121 = vst [vmem:[#allocation23_spill] sm:$0xff] %v6554_v45  ;;  %1733 = vst [vmem:[#allocation4 + $0x18] sm:$0xff] %v6558_v2  ;;  %v6564_v48 = vmax.f32 %v6558_v2, 0.0  ;;  %v1587_v7 = vpop.f32.mrb[39].mxu0 }
 0x30b   :  { %8122 = vst [vmem:[#allocation26_spill] sm:$0xff] %v6556_v0  ;;  %v6566_v14 = vmax.f32 %v1587_v7, 0.0 }
 0x30c   :  { %8123 = vst [vmem:[#allocation25_spill] sm:$0xff] %v6564_v48 }
 0x30d   :  { %8124 = vst [vmem:[#allocation28_spill] sm:$0xff] %v6566_v14 }
 0x30f   :  { %v6568_v33 = vpop.f32.mrb[40].mxu0 }
 0x310   :  { %1734 = vst [vmem:[#allocation4 + $0x20] sm:$0xff] %v6568_v33  ;;  %v6572_v24 = vmax.f32 %v6568_v33, 0.0  ;;  %v1593_v28 = vpop.f32.mrb[41].mxu0 }
 0x311   :  { %v6574_v52 = vmax.f32 %v1593_v28, 0.0  ;;  %v6576_v55 = vpop.f32.mrb[42].mxu0 }
 0x312   :  { %8125 = vst [vmem:[#allocation27_spill] sm:$0xff] %v6572_v24  ;;  %1735 = vst [vmem:[#allocation4 + $0x28] sm:$0xff] %v6576_v55  ;;  %v6582_v19 = vmax.f32 %v6576_v55, 0.0  ;;  %v1597_v38 = vpop.f32.mrb[43].mxu0 }
 0x313   :  { %8126 = vst [vmem:[#allocation30_spill] sm:$0xff] %v6574_v52  ;;  %v6584_v4 = vmax.f32 %v1597_v38, 0.0 }
 0x314   :  { %8127 = vst [vmem:[#allocation29_spill] sm:$0xff] %v6582_v19 }
 0x315   :  { %8128 = vst [vmem:[#allocation32_spill] sm:$0xff] %v6584_v4 }
 0x317   :  { %v6586_v6 = vpop.f32.mrb[44].mxu0 }
 0x318   :  { %1736 = vst [vmem:[#allocation4 + $0x30] sm:$0xff] %v6586_v6  ;;  %v6590_v50 = vmax.f32 %v6586_v6, 0.0  ;;  %v1603_v57 = vpop.f32.mrb[45].mxu0 }
 0x319   :  { %v6592_v9 = vmax.f32 %v1603_v57, 0.0  ;;  %v6594_v23 = vpop.f32.mrb[46].mxu0 }
 0x31a   :  { %8129 = vst [vmem:[#allocation31_spill] sm:$0xff] %v6590_v50  ;;  %1737 = vst [vmem:[#allocation4 + $0x38] sm:$0xff] %v6594_v23  ;;  %v6600_v11 = vmax.f32 %v6594_v23, 0.0  ;;  %v1607_v39 = vpop.f32.mrb[47].mxu0 }
 0x31b   :  { %8130 = vst [vmem:[#allocation33_spill] sm:$0xff] %v6592_v9  ;;  %v6602_v54 = vmax.f32 %v1607_v39, 0.0 }
 0x31c   :  { %8131 = vst [vmem:[#allocation34_spill] sm:$0xff] %v6600_v11 }
 0x31d   :  { %8132 = vst [vmem:[#allocation35_spill] sm:$0xff] %v6602_v54 }
 0x31f   :  { %v6604_v7 = vpop.f32.mrb[48].mxu0 }
 0x320   :  { %1738 = vst [vmem:[#allocation4 + $0x40] sm:$0xff] %v6604_v7  ;;  %v6608_v28 = vmax.f32 %v6604_v7, 0.0  ;;  %v1613_v38 = vpop.f32.mrb[49].mxu0 }
 0x321   :  { %v6610_v57 = vmax.f32 %v1613_v38, 0.0  ;;  %v6612_v29 = vpop.f32.mrb[50].mxu0 }
 0x322   :  { %8133 = vst [vmem:[#allocation36_spill] sm:$0xff] %v6608_v28  ;;  %1739 = vst [vmem:[#allocation4 + $0x48] sm:$0xff] %v6612_v29  ;;  %v6618_v39 = vmax.f32 %v6612_v29, 0.0  ;;  %v1617_v47 = vpop.f32.mrb[51].mxu0 }
 0x323   :  { %8134 = vst [vmem:[#allocation37_spill] sm:$0xff] %v6610_v57  ;;  %v6620_v20 = vmax.f32 %v1617_v47, 0.0 }
 0x324   :  { %8135 = vst [vmem:[#allocation38_spill] sm:$0xff] %v6618_v39 }
 0x325   :  { %8136 = vst [vmem:[#allocation39_spill] sm:$0xff] %v6620_v20 }
 0x327   :  { %v6622_v11 = vpop.f32.mrb[52].mxu0 }
 0x328   :  { %1740 = vst [vmem:[#allocation4 + $0x50] sm:$0xff] %v6622_v11  ;;  %v6626_v38 = vmax.f32 %v6622_v11, 0.0  ;;  %v1623_v28 = vpop.f32.mrb[53].mxu0 }
 0x329   :  { %v6628_v57 = vmax.f32 %v1623_v28, 0.0  ;;  %v6630_v50 = vpop.f32.mrb[54].mxu0 }
 0x32a   :  { %8137 = vst [vmem:[#allocation40_spill] sm:$0xff] %v6626_v38  ;;  %1741 = vst [vmem:[#allocation4 + $0x58] sm:$0xff] %v6630_v50  ;;  %v6636_v47 = vmax.f32 %v6630_v50, 0.0  ;;  %v1627_v39 = vpop.f32.mrb[55].mxu0 }
 0x32b   :  { %8138 = vst [vmem:[#allocation41_spill] sm:$0xff] %v6628_v57  ;;  %v6638_v20 = vmax.f32 %v1627_v39, 0.0 }
 0x32c   :  { %8139 = vst [vmem:[#allocation42_spill] sm:$0xff] %v6636_v47 }
 0x32d   :  { %8140 = vst [vmem:[#allocation43_spill] sm:$0xff] %v6638_v20 }
 0x32f   :  { %v6640_v54 = vpop.f32.mrb[56].mxu0 }
 0x330   :  { %1742 = vst [vmem:[#allocation4 + $0x60] sm:$0xff] %v6640_v54  ;;  %v6644_v28 = vmax.f32 %v6640_v54, 0.0  ;;  %v1633_v38 = vpop.f32.mrb[57].mxu0 }
 0x331   :  { %v6646_v57 = vmax.f32 %v1633_v38, 0.0  ;;  %v6648_v9 = vpop.f32.mrb[58].mxu0 }
 0x332   :  { %8141 = vst [vmem:[#allocation44_spill] sm:$0xff] %v6644_v28  ;;  %1743 = vst [vmem:[#allocation4 + $0x68] sm:$0xff] %v6648_v9  ;;  %v6654_v39 = vmax.f32 %v6648_v9, 0.0  ;;  %v1637_v47 = vpop.f32.mrb[59].mxu0 }
 0x333   :  { %8142 = vst [vmem:[#allocation45_spill] sm:$0xff] %v6646_v57  ;;  %v6656_v20 = vmax.f32 %v1637_v47, 0.0 }
 0x334   :  { %8143 = vst [vmem:[#allocation46_spill] sm:$0xff] %v6654_v39 }
 0x335   :  { %8144 = vst [vmem:[#allocation47_spill] sm:$0xff] %v6656_v20 }
 0x337   :  { %v6658_v19 = vpop.f32.mrb[60].mxu0 }
 0x338   :  { %1744 = vst [vmem:[#allocation4 + $0x70] sm:$0xff] %v6658_v19  ;;  %v6662_v38 = vmax.f32 %v6658_v19, 0.0  ;;  %v1643_v28 = vpop.f32.mrb[61].mxu0 }
 0x339   :  { %v6664_v57 = vmax.f32 %v1643_v28, 0.0  ;;  %v6666_v24 = vpop.f32.mrb[62].mxu0 }
 0x33a   :  { %8145 = vst [vmem:[#allocation48_spill] sm:$0xff] %v6662_v38  ;;  %1745 = vst [vmem:[#allocation4 + $0x78] sm:$0xff] %v6666_v24  ;;  %v6672_v47 = vmax.f32 %v6666_v24, 0.0  ;;  %v1647_v39 = vpop.f32.mrb[63].mxu0 }
 0x33b   :  { %8146 = vst [vmem:[#allocation49_spill] sm:$0xff] %v6664_v57  ;;  %v6674_v20 = vmax.f32 %v1647_v39, 0.0  ;;  %v8153_v39 = vpack.c.bf16 %v6540_v25, %v6532_v61  ;;  %v8158_v61 = vpack.c.bf16 %v6558_v2, %v6550_v56  ;;  %v8163_v56 = vpack.c.bf16 %v6576_v55, %v6568_v33 }
 0x33c   :  { %8147 = vst [vmem:[#allocation50_spill] sm:$0xff] %v6672_v47 }
 0x33d   :  { %8148 = vst [vmem:[#allocation51_spill] sm:$0xff] %v6674_v20 }
 0x33f   :  { %v1651_v4 = vpop.f32.mrb[64].mxu0 }
 0x340   :  { %1746 = vst [vmem:[#allocation4 + $0x80] sm:$0xff] %v1651_v4  ;;  %v6676_v52 = vmax.f32 %v1651_v4, 0.0  ;;  %v1653_v38 = vpop.f32.mrb[65].mxu0 }
 0x341   :  { %v6678_v28 = vmax.f32 %v1653_v38, 0.0  ;;  %v1655_v57 = vpop.f32.mrb[66].mxu0 }
 0x342   :  { %8149 = vst [vmem:[#allocation52_spill] sm:$0xff] %v6676_v52  ;;  %1747 = vst [vmem:[#allocation4 + $0x88] sm:$0xff] %v1655_v57  ;;  %v6680_v48 = vmax.f32 %v1655_v57, 0.0  ;;  %v1657_v45 = vpop.f32.mrb[67].mxu0  ;;  %v1781_v14 = vpack.c.bf16 %v1655_v57, %v1651_v4 }
 0x343   :  { %8150 = vst [vmem:[#allocation53_spill] sm:$0xff] %v6678_v28  ;;  %v6682_v30 = vmax.f32 %v1657_v45, 0.0 }
 0x344   :  { %8151 = vst [vmem:[#allocation54_spill] sm:$0xff] %v6680_v48  ;;  %4784 = vmatprep.subr.bf16.mxu1 %v1781_v14 }
 0x345   :  { %8152 = vst [vmem:[#allocation55_spill] sm:$0xff] %v6682_v30  ;;  %4785 = vmatpush3.bf16.msra.mxu1 %v8153_v39 }
 0x347   :  { %v1661_v47 = vpop.f32.mrb[68].mxu0 }
 0x348   :  { %1748 = vst [vmem:[#allocation4 + $0x90] sm:$0xff] %v1661_v47  ;;  %v6687_v20 = vmax.f32 %v1661_v47, 0.0  ;;  %v1663_v52 = vpop.f32.mrb[69].mxu0 }
 0x349   :  { %v6689_v38 = vmax.f32 %v1663_v52, 0.0  ;;  %v1665_v28 = vpop.f32.mrb[70].mxu0 }
 0x34a   :  { %8154 = vst [vmem:[#allocation56_spill] sm:$0xff] %v6687_v20  ;;  %1749 = vst [vmem:[#allocation4 + $0x98] sm:$0xff] %v1665_v28  ;;  %v1782_v0 = vpack.c.bf16 %v1665_v28, %v1661_v47  ;;  %v6691_v48 = vmax.f32 %v1665_v28, 0.0  ;;  %v1667_v4 = vpop.f32.mrb[71].mxu0 }
 0x34b   :  { %8155 = vst [vmem:[#allocation57_spill] sm:$0xff] %v6689_v38  ;;  %v6693_v45 = vmax.f32 %v1667_v4, 0.0 }
 0x34c   :  { %8156 = vst [vmem:[#allocation58_spill] sm:$0xff] %v6691_v48  ;;  %4786 = vmatprep.subr.bf16.mxu1 %v1782_v0 }
 0x34d   :  { %8157 = vst [vmem:[#allocation59_spill] sm:$0xff] %v6693_v45  ;;  %4787 = vmatpush3.bf16.msra.mxu1 %v8158_v61 }
 0x34f   :  { %v1671_v25 = vpop.f32.mrb[72].mxu0 }
 0x350   :  { %1750 = vst [vmem:[#allocation4 + $0xa0] sm:$0xff] %v1671_v25  ;;  %v6698_v14 = vmax.f32 %v1671_v25, 0.0  ;;  %v1673_v57 = vpop.f32.mrb[73].mxu0 }
 0x351   :  { %v6700_v52 = vmax.f32 %v1673_v57, 0.0  ;;  %v1675_v39 = vpop.f32.mrb[74].mxu0  ;;  %v5147_v57 = vld [vmem:[%s7948_s5] ss:$8 sps:$4 sm:$0xff]  }
 0x352   :  { %8159 = vst [vmem:[#allocation60_spill] sm:$0xff] %v6698_v14  ;;  %1751 = vst [vmem:[#allocation4 + $0xa8] sm:$0xff] %v1675_v39  ;;  %v1783_v47 = vpack.c.bf16 %v1675_v39, %v1671_v25  ;;  %v6702_v28 = vmax.f32 %v1675_v39, 0.0  ;;  %v1677_v48 = vpop.f32.mrb[75].mxu0  ;;  %v5149_v25 = vld [vmem:[%s7948_s5 + $0x4] ss:$8 sps:$4 sm:$0xff]  }
 0x353   :  { %8160 = vst [vmem:[#allocation61_spill] sm:$0xff] %v6700_v52  ;;  %v6704_v4 = vmax.f32 %v1677_v48, 0.0  ;;  %2062 = vmatprep.subr.bf16.mxu0 %v5149_v25 }
 0x354   :  { %8161 = vst [vmem:[#allocation62_spill] sm:$0xff] %v6702_v28  ;;  %4788 = vmatprep.subr.bf16.mxu1 %v1783_v47  ;;  %2063 = vmatpush1.bf16.msra.mxu0 %v5147_v57 }
 0x355   :  { %8162 = vst [vmem:[#allocation63_spill] sm:$0xff] %v6704_v4  ;;  %4789 = vmatpush3.bf16.msra.mxu1 %v8163_v56 }
 0x357   :  { %v1681_v0 = vpop.f32.mrb[76].mxu0 }
 0x358   :  { %1752 = vst [vmem:[#allocation4 + $0xb0] sm:$0xff] %v1681_v0  ;;  %v6709_v2 = vmax.f32 %v1681_v0, 0.0  ;;  %v1683_v61 = vpop.f32.mrb[77].mxu0 }
 0x359   :  { %v6717_v48 = vmax.f32 %v1683_v61, 0.0  ;;  %v1685_v39 = vpop.f32.mrb[78].mxu0 }
 0x35a   :  { %8164 = vst [vmem:[#allocation64_spill] sm:$0xff] %v6709_v2  ;;  %1753 = vst [vmem:[#allocation4 + $0xb8] sm:$0xff] %v1685_v39  ;;  %v1784_v47 = vpack.c.bf16 %v1685_v39, %v1681_v0  ;;  %v6719_v33 = vmax.f32 %v1685_v39, 0.0  ;;  %v1687_v55 = vpop.f32.mrb[79].mxu0  ;;  %v8168_v2 = vpack.c.bf16 %v6594_v23, %v6586_v6  ;;  %v8173_v6 = vpack.c.bf16 %v6612_v29, %v6604_v7 }
 0x35b   :  { %8165 = vst [vmem:[#allocation65_spill] sm:$0xff] %v6717_v48  ;;  %v6721_v56 = vmax.f32 %v1687_v55, 0.0 }
 0x35c   :  { %8166 = vst [vmem:[#allocation66_spill] sm:$0xff] %v6719_v33  ;;  %4790 = vmatprep.subr.bf16.mxu1 %v1784_v47  ;;  %v5150_v47 = vld [vmem:[%s7948_s5 + $0x10] ss:$8 sps:$4 sm:$0xff]  }
 0x35d   :  { %8167 = vst [vmem:[#allocation67_spill] sm:$0xff] %v6721_v56  ;;  %4791 = vmatpush3.bf16.msra.mxu1 %v8168_v2 }
 0x35f   :  { %v1691_v28 = vpop.f32.mrb[80].mxu0 }
 0x360   :  { %1754 = vst [vmem:[#allocation4 + $0xc0] sm:$0xff] %v1691_v28  ;;  %v6726_v14 = vmax.f32 %v1691_v28, 0.0  ;;  %v1693_v61 = vpop.f32.mrb[81].mxu0 }
 0x361   :  { %v6728_v48 = vmax.f32 %v1693_v61, 0.0  ;;  %v1695_v0 = vpop.f32.mrb[82].mxu0 }
 0x362   :  { %8169 = vst [vmem:[#allocation68_spill] sm:$0xff] %v6726_v14  ;;  %1755 = vst [vmem:[#allocation4 + $0xc8] sm:$0xff] %v1695_v0  ;;  %v1785_v39 = vpack.c.bf16 %v1695_v0, %v1691_v28  ;;  %v6730_v33 = vmax.f32 %v1695_v0, 0.0  ;;  %v1697_v25 = vpop.f32.mrb[83].mxu0  ;;  %v5152_v28 = vld [vmem:[%s7948_s5 + $0x14] ss:$8 sps:$4 sm:$0xff]  }
 0x363   :  { %8170 = vst [vmem:[#allocation69_spill] sm:$0xff] %v6728_v48  ;;  %v6732_v55 = vmax.f32 %v1697_v25, 0.0  ;;  %2064 = vmatprep.subr.bf16.mxu0 %v5152_v28 }
 0x364   :  { %8171 = vst [vmem:[#allocation70_spill] sm:$0xff] %v6730_v33  ;;  %4792 = vmatprep.subr.bf16.mxu1 %v1785_v39  ;;  %2065 = vmatpush1.bf16.msra.mxu0 %v5150_v47 }
 0x365   :  { %8172 = vst [vmem:[#allocation71_spill] sm:$0xff] %v6732_v55  ;;  %4793 = vmatpush3.bf16.msra.mxu1 %v8173_v6  ;;  %v8178_v6 = vpack.c.bf16 %v6630_v50, %v6622_v11  ;;  %v8183_v50 = vpack.c.bf16 %v6648_v9, %v6640_v54  ;;  %v5158_v9 = vld [vmem:[%s7948_s5 + $0x34] ss:$8 sps:$4 sm:$0xff]  }
 0x367   :  { %v1701_v23 = vpop.f32.mrb[84].mxu0 }
 0x368   :  { %1756 = vst [vmem:[#allocation4 + $0xd0] sm:$0xff] %v1701_v23  ;;  %v6737_v2 = vmax.f32 %v1701_v23, 0.0  ;;  %v1703_v57 = vpop.f32.mrb[85].mxu0 }
 0x369   :  { %v6745_v61 = vmax.f32 %v1703_v57, 0.0  ;;  %v1705_v0 = vpop.f32.mrb[86].mxu0 }
 0x36a   :  { %8174 = vst [vmem:[#allocation72_spill] sm:$0xff] %v6737_v2  ;;  %1757 = vst [vmem:[#allocation4 + $0xd8] sm:$0xff] %v1705_v0  ;;  %v1786_v39 = vpack.c.bf16 %v1705_v0, %v1701_v23  ;;  %v6747_v29 = vmax.f32 %v1705_v0, 0.0  ;;  %v1707_v7 = vpop.f32.mrb[87].mxu0 }
 0x36b   :  { %8175 = vst [vmem:[#allocation73_spill] sm:$0xff] %v6745_v61  ;;  %v6749_v25 = vmax.f32 %v1707_v7, 0.0 }
 0x36c   :  { %8176 = vst [vmem:[#allocation74_spill] sm:$0xff] %v6747_v29  ;;  %4794 = vmatprep.subr.bf16.mxu1 %v1786_v39 }
 0x36d   :  { %8177 = vst [vmem:[#allocation75_spill] sm:$0xff] %v6749_v25  ;;  %4795 = vmatpush3.bf16.msra.mxu1 %v8178_v6  ;;  %v5153_v6 = vld [vmem:[%s7948_s5 + $0x20] ss:$8 sps:$4 sm:$0xff]  }
 0x36f   :  { %v1711_v2 = vpop.f32.mrb[88].mxu0 }
 0x370   :  { %1758 = vst [vmem:[#allocation4 + $0xe0] sm:$0xff] %v1711_v2  ;;  %v6754_v33 = vmax.f32 %v1711_v2, 0.0  ;;  %v1713_v57 = vpop.f32.mrb[89].mxu0 }
 0x371   :  { %v6756_v61 = vmax.f32 %v1713_v57, 0.0  ;;  %v1715_v23 = vpop.f32.mrb[90].mxu0 }
 0x372   :  { %8179 = vst [vmem:[#allocation76_spill] sm:$0xff] %v6754_v33  ;;  %1759 = vst [vmem:[#allocation4 + $0xe8] sm:$0xff] %v1715_v23  ;;  %v1787_v0 = vpack.c.bf16 %v1715_v23, %v1711_v2  ;;  %v6758_v29 = vmax.f32 %v1715_v23, 0.0  ;;  %v1717_v28 = vpop.f32.mrb[91].mxu0  ;;  %v5155_v2 = vld [vmem:[%s7948_s5 + $0x24] ss:$8 sps:$4 sm:$0xff]  }
 0x373   :  { %8180 = vst [vmem:[#allocation77_spill] sm:$0xff] %v6756_v61  ;;  %v6760_v7 = vmax.f32 %v1717_v28, 0.0  ;;  %2066 = vmatprep.subr.bf16.mxu0 %v5155_v2  ;;  %v5159_v2 = vld [vmem:[%s7948_s5 + $0x40] ss:$8 sps:$4 sm:$0xff]  }
 0x374   :  { %8181 = vst [vmem:[#allocation78_spill] sm:$0xff] %v6758_v29  ;;  %4796 = vmatprep.subr.bf16.mxu1 %v1787_v0  ;;  %2067 = vmatpush1.bf16.msra.mxu0 %v5153_v6  ;;  %v5164_v6 = vld [vmem:[%s7948_s5 + $0x54] ss:$8 sps:$4 sm:$0xff]  }
 0x375   :  { %8182 = vst [vmem:[#allocation79_spill] sm:$0xff] %v6760_v7  ;;  %4797 = vmatpush3.bf16.msra.mxu1 %v8183_v50  ;;  %2068 = vmatprep.subr.bf16.mxu0 %v5158_v9 }
 0x377   :  { %v1721_v11 = vpop.f32.mrb[92].mxu0 }
 0x378   :  { %1760 = vst [vmem:[#allocation4 + $0xf0] sm:$0xff] %v1721_v11  ;;  %v6765_v47 = vmax.f32 %v1721_v11, 0.0  ;;  %v1723_v39 = vpop.f32.mrb[93].mxu0 }
 0x379   :  { %v6773_v57 = vmax.f32 %v1723_v39, 0.0  ;;  %v1725_v23 = vpop.f32.mrb[94].mxu0  ;;  %v5161_v39 = vld [vmem:[%s7948_s5 + $0x44] ss:$8 sps:$4 sm:$0xff]  }
 0x37a   :  { %8184 = vst [vmem:[#allocation80_spill] sm:$0xff] %v6765_v47  ;;  %1761 = vst [vmem:[#allocation4 + $0xf8] sm:$0xff] %v1725_v23  ;;  %v1788_v54 = vpack.c.bf16 %v1725_v23, %v1721_v11  ;;  %v6778_v0 = vmax.f32 %v1725_v23, 0.0  ;;  %v1727_v28 = vpop.f32.mrb[95].mxu0  ;;  %v5156_v47 = vld [vmem:[%s7948_s5 + $0x30] ss:$8 sps:$4 sm:$0xff]   ;;  %v8188_v11 = vpack.c.bf16 %v6666_v24, %v6658_v19 }
 0x37b   :  { %8185 = vst [vmem:[#allocation81_spill] sm:$0xff] %v6773_v57  ;;  %v6780_v50 = vmax.f32 %v1727_v28, 0.0  ;;  %2069 = vmatpush1.bf16.msra.mxu0 %v5156_v47  ;;  %v5162_v24 = vld [vmem:[%s7948_s5 + $0x50] ss:$8 sps:$4 sm:$0xff]   ;;  %v5167_v19 = vld [vmem:[%s7948_s5 + $0x64] ss:$8 sps:$4 sm:$0xff]  }
 0x37c   :  { %8186 = vst [vmem:[#allocation82_spill] sm:$0xff] %v6778_v0  ;;  %4798 = vmatprep.subr.bf16.mxu1 %v1788_v54  ;;  %2070 = vmatprep.subr.bf16.mxu0 %v5161_v39  ;;  %v5168_v47 = vld [vmem:[%s7948_s5 + $0x70] ss:$8 sps:$4 sm:$0xff]  }
 0x37d   :  { %8187 = vst [vmem:[#allocation83_spill] sm:$0xff] %v6780_v50  ;;  %4799 = vmatpush3.bf16.msra.mxu1 %v8188_v11 }
 0x37f   :  { %2071 = vmatpush1.bf16.msra.mxu0 %v5159_v2 }
 0x380   :  { %1822 = vmatmul.mubr.bf16.vlgmr.msra.gmra.mrb[96].mxu1 %v6439_v35  ;;  %2072 = vmatprep.subr.bf16.mxu0 %v5164_v6  ;;  %v5165_v35 = vld [vmem:[%s7948_s5 + $0x60] ss:$8 sps:$4 sm:$0xff]  }
 0x381   :  { %1829 = vmatprep.mubr.bf16.mxu1 %v6441_v43  ;;  %v5170_v43 = vld [vmem:[%s7948_s5 + $0x74] ss:$8 sps:$4 sm:$0xff]   ;;  %s5616_s5 = smov [#allocation4]  }
 0x382   :  { %s1769_s28 = sshll.u32 %s5616_s5, 4  ;;  %s1770_s28 = int_to_ptr.vmem [resolvable:$true] %s1769_s28 }
 0x383   :  { %2073 = vmatpush1.bf16.msra.mxu0 %v5162_v24  ;;  %s5563_s29 = scalar_lea.vmem %s1770_s28, 4096  ;;  %p5568_p1 = scmp.lt.s32.totalorder %s1770_s28, %s1770_s28 }
 0x384   :  { %2074 = vmatprep.subr.bf16.mxu0 %v5167_v19  ;;  %p5564_p0 = scmp.ne.s32.totalorder %s1770_s28, %s5563_s29  ;;  %p5569_p2 = scmp.lt.s32.totalorder %s5563_s29, %s5563_s29 }
 0x386   :  { %p5570_p3 = por %p5569_p2, %p5568_p1 }
 0x387   :  { %2075 = vmatpush1.bf16.msra.mxu0 %v5165_v35 }
 0x388   :  { %1830 = vmatmul.mubr.bf16.gmra.mrb[100].mxu1 %v6445_v59  ;;  %2076 = vmatprep.subr.bf16.mxu0 %v5170_v43  ;;  %v5615_v59 = vmov 0   ;;  %p5571_p4 = pnand %p5570_p3, %p5564_p0 }
 0x389   :  { %1837 = vmatprep.mubr.bf16.mxu1 %v6447_v60  ;;  %2094 = vmatprep.mubr.bf16.mxu0 %v5615_v59 }
 0x38b   :  { %2077 = vmatpush1.bf16.msra.mxu0 %v5168_v47 }
 0x390   :  { %1838 = vmatmul.mubr.bf16.gmra.mrb[104].mxu1 %v6451_v10 }
 0x391   :  { %1845 = vmatprep.mubr.bf16.mxu1 %v6453_v22 }
 0x398   :  { %1846 = vmatmul.mubr.bf16.gmra.mrb[108].mxu1 %v6457_v44 }
 0x399   :  { %1853 = vmatprep.mubr.bf16.mxu1 %v6459_v62 }
 0x3a0   :  { %1854 = vmatmul.mubr.bf16.gmra.mrb[112].mxu1 %v6463_v8 }
 0x3a1   :  { %1861 = vmatprep.mubr.bf16.mxu1 %v6465_v15 }
 0x3a8   :  { %1862 = vmatmul.mubr.bf16.gmra.mrb[116].mxu1 %v6469_v21 }
 0x3a9   :  { %1869 = vmatprep.mubr.bf16.mxu1 %v6471_v5 }
 0x3b0   :  { %1870 = vmatmul.mubr.bf16.gmra.mrb[120].mxu1 %v6475_v36 }
 0x3b1   :  { %1877 = vmatprep.mubr.bf16.mxu1 %v6477_v42 }
 0x3b8   :  { %1878 = vmatmul.mubr.bf16.gmra.mrb[124].mxu1 %v6481_v51 }
 0x3b9   :  { %1885 = vmatprep.mubr.bf16.mxu1 %v6483_v16 }
 0x3c0   :  { %1886 = vmatmul.mubr.bf16.gmra.mrb[128].mxu1 %v6487_v26 }
 0x3c1   :  { %1893 = vmatprep.mubr.bf16.mxu1 %v6489_v37 }
 0x3c8   :  { %1894 = vmatmul.mubr.bf16.gmra.mrb[132].mxu1 %v6493_v40 }
 0x3c9   :  { %1901 = vmatprep.mubr.bf16.mxu1 %v6495_v58 }
 0x3d0   :  { %1902 = vmatmul.mubr.bf16.gmra.mrb[136].mxu1 %v6499_v49 }
 0x3d1   :  { %1909 = vmatprep.mubr.bf16.mxu1 %v6501_v41 }
 0x3d8   :  { %1910 = vmatmul.mubr.bf16.gmra.mrb[140].mxu1 %v6505_v46 }
 0x3d9   :  { %1917 = vmatprep.mubr.bf16.mxu1 %v6507_v1 }
 0x3e0   :  { %1918 = vmatmul.mubr.bf16.gmra.mrb[144].mxu1 %v6511_v27 }
 0x3e1   :  { %1925 = vmatprep.mubr.bf16.mxu1 %v6513_v13 }
 0x3e8   :  { %1926 = vmatmul.mubr.bf16.gmra.mrb[148].mxu1 %v6517_v18 }
 0x3e9   :  { %1933 = vmatprep.mubr.bf16.mxu1 %v6519_v32 }
 0x3f0   :  { %1934 = vmatmul.mubr.bf16.gmra.mrb[152].mxu1 %v6523_v63 }
 0x3f1   :  { %1941 = vmatprep.mubr.bf16.mxu1 %v6525_v53 }
 0x3f8   :  { %1942 = vmatmul.mubr.bf16.gmra.mrb[156].mxu1 %v6529_v12 }
 0x453   :  { %v4800_v60 = vpop.f32.mrb[96].mxu1 }
 0x454   :  { %v4801_v10 = vpop.f32.mrb[97].mxu1 }
 0x455   :  { %v4802_v22 = vadd.f32 %v4801_v10, %v4800_v60  ;;  %v4803_v44 = vpop.f32.mrb[98].mxu1 }
 0x456   :  { %v4804_v62 = vpop.f32.mrb[99].mxu1 }
 0x457   :  { %v4805_v8 = vadd.f32 %v4804_v62, %v4803_v44 }
 0x459   :  { %v1950_v15 = vpack.c.bf16 %v4805_v8, %v4802_v22 }
 0x45b   :  { %v4806_v21 = vpop.f32.mrb[100].mxu1  ;;  %2095 = vmatmul.mubr.bf16.vlgmr.msra.gmra.mrb[96].mxu0 %v1950_v15 }
 0x45c   :  { %v4807_v5 = vpop.f32.mrb[101].mxu1  ;;  %2104 = vmatprep.mubr.bf16.mxu0 %v5615_v59 }
 0x45d   :  { %v4808_v36 = vadd.f32 %v4807_v5, %v4806_v21  ;;  %v4809_v42 = vpop.f32.mrb[102].mxu1 }
 0x45e   :  { %v4810_v51 = vpop.f32.mrb[103].mxu1 }
 0x45f   :  { %v4811_v16 = vadd.f32 %v4810_v51, %v4809_v42 }
 0x461   :  { %v1951_v26 = vpack.c.bf16 %v4811_v16, %v4808_v36 }
 0x463   :  { %v4812_v37 = vpop.f32.mrb[104].mxu1  ;;  %2105 = vmatmul.mubr.bf16.gmra.mrb[100].mxu0 %v1951_v26 }
 0x464   :  { %v4813_v40 = vpop.f32.mrb[105].mxu1  ;;  %2114 = vmatprep.mubr.bf16.mxu0 %v5615_v59 }
 0x465   :  { %v4814_v58 = vadd.f32 %v4813_v40, %v4812_v37  ;;  %v4815_v49 = vpop.f32.mrb[106].mxu1 }
 0x466   :  { %v4816_v41 = vpop.f32.mrb[107].mxu1 }
 0x467   :  { %v4817_v46 = vadd.f32 %v4816_v41, %v4815_v49 }
 0x469   :  { %v1952_v1 = vpack.c.bf16 %v4817_v46, %v4814_v58 }
 0x46b   :  { %v4818_v27 = vpop.f32.mrb[108].mxu1  ;;  %2115 = vmatmul.mubr.bf16.gmra.mrb[104].mxu0 %v1952_v1 }
 0x46c   :  { %v4819_v13 = vpop.f32.mrb[109].mxu1  ;;  %2124 = vmatprep.mubr.bf16.mxu0 %v5615_v59 }
 0x46d   :  { %v4820_v18 = vadd.f32 %v4819_v13, %v4818_v27  ;;  %v4821_v32 = vpop.f32.mrb[110].mxu1 }
 0x46e   :  { %v4822_v63 = vpop.f32.mrb[111].mxu1 }
 0x46f   :  { %v4823_v53 = vadd.f32 %v4822_v63, %v4821_v32 }
 0x471   :  { %v1953_v12 = vpack.c.bf16 %v4823_v53, %v4820_v18 }
 0x473   :  { %v4824_v23 = vpop.f32.mrb[112].mxu1  ;;  %2125 = vmatmul.mubr.bf16.gmra.mrb[108].mxu0 %v1953_v12 }
 0x474   :  { %v4825_v9 = vpop.f32.mrb[113].mxu1  ;;  %2134 = vmatprep.mubr.bf16.mxu0 %v5615_v59 }
 0x475   :  { %v4826_v54 = vadd.f32 %v4825_v9, %v4824_v23  ;;  %v4827_v28 = vpop.f32.mrb[114].mxu1 }
 0x476   :  { %v4828_v39 = vpop.f32.mrb[115].mxu1 }
 0x477   :  { %v4829_v11 = vadd.f32 %v4828_v39, %v4827_v28 }
 0x479   :  { %v1954_v2 = vpack.c.bf16 %v4829_v11, %v4826_v54 }
 0x47b   :  { %v4830_v6 = vpop.f32.mrb[116].mxu1  ;;  %2135 = vmatmul.mubr.bf16.gmra.mrb[112].mxu0 %v1954_v2 }
 0x47c   :  { %v4831_v24 = vpop.f32.mrb[117].mxu1  ;;  %2144 = vmatprep.mubr.bf16.mxu0 %v5615_v59 }
 0x47d   :  { %v4832_v19 = vadd.f32 %v4831_v24, %v4830_v6  ;;  %v4833_v35 = vpop.f32.mrb[118].mxu1 }
 0x47e   :  { %v4834_v43 = vpop.f32.mrb[119].mxu1 }
 0x47f   :  { %v4835_v47 = vadd.f32 %v4834_v43, %v4833_v35 }
 0x481   :  { %v1955_v60 = vpack.c.bf16 %v4835_v47, %v4832_v19 }
 0x483   :  { %v4836_v10 = vpop.f32.mrb[120].mxu1  ;;  %2145 = vmatmul.mubr.bf16.gmra.mrb[116].mxu0 %v1955_v60 }
 0x484   :  { %v4837_v22 = vpop.f32.mrb[121].mxu1  ;;  %2154 = vmatprep.mubr.bf16.mxu0 %v5615_v59 }
 0x485   :  { %v4838_v44 = vadd.f32 %v4837_v22, %v4836_v10  ;;  %v4839_v62 = vpop.f32.mrb[122].mxu1 }
 0x486   :  { %v4840_v8 = vpop.f32.mrb[123].mxu1 }
 0x487   :  { %v4841_v15 = vadd.f32 %v4840_v8, %v4839_v62 }
 0x489   :  { %v1956_v21 = vpack.c.bf16 %v4841_v15, %v4838_v44 }
 0x48b   :  { %v4842_v5 = vpop.f32.mrb[124].mxu1  ;;  %2155 = vmatmul.mubr.bf16.gmra.mrb[120].mxu0 %v1956_v21 }
 0x48c   :  { %v4843_v36 = vpop.f32.mrb[125].mxu1  ;;  %2164 = vmatprep.mubr.bf16.mxu0 %v5615_v59 }
 0x48d   :  { %v4844_v42 = vadd.f32 %v4843_v36, %v4842_v5  ;;  %v4845_v51 = vpop.f32.mrb[126].mxu1 }
 0x48e   :  { %v4846_v16 = vpop.f32.mrb[127].mxu1 }
 0x48f   :  { %v4847_v26 = vadd.f32 %v4846_v16, %v4845_v51 }
 0x491   :  { %v1957_v37 = vpack.c.bf16 %v4847_v26, %v4844_v42 }
 0x493   :  { %v4848_v40 = vpop.f32.mrb[128].mxu1  ;;  %2165 = vmatmul.mubr.bf16.gmra.mrb[124].mxu0 %v1957_v37 }
 0x494   :  { %v4849_v58 = vpop.f32.mrb[129].mxu1  ;;  %2174 = vmatprep.mubr.bf16.mxu0 %v5615_v59 }
 0x495   :  { %v4850_v49 = vadd.f32 %v4849_v58, %v4848_v40  ;;  %v4851_v41 = vpop.f32.mrb[130].mxu1 }
 0x496   :  { %v4852_v46 = vpop.f32.mrb[131].mxu1 }
 0x497   :  { %v4853_v1 = vadd.f32 %v4852_v46, %v4851_v41 }
 0x499   :  { %v1958_v27 = vpack.c.bf16 %v4853_v1, %v4850_v49 }
 0x49b   :  { %v4854_v13 = vpop.f32.mrb[132].mxu1  ;;  %2175 = vmatmul.mubr.bf16.gmra.mrb[128].mxu0 %v1958_v27 }
 0x49c   :  { %v4855_v18 = vpop.f32.mrb[133].mxu1  ;;  %2184 = vmatprep.mubr.bf16.mxu0 %v5615_v59 }
 0x49d   :  { %v4856_v32 = vadd.f32 %v4855_v18, %v4854_v13  ;;  %v4857_v63 = vpop.f32.mrb[134].mxu1 }
 0x49e   :  { %v4858_v53 = vpop.f32.mrb[135].mxu1 }
 0x49f   :  { %v4859_v12 = vadd.f32 %v4858_v53, %v4857_v63 }
 0x4a1   :  { %v1959_v23 = vpack.c.bf16 %v4859_v12, %v4856_v32 }
 0x4a3   :  { %v4860_v9 = vpop.f32.mrb[136].mxu1  ;;  %2185 = vmatmul.mubr.bf16.gmra.mrb[132].mxu0 %v1959_v23 }
 0x4a4   :  { %v4861_v54 = vpop.f32.mrb[137].mxu1  ;;  %2194 = vmatprep.mubr.bf16.mxu0 %v5615_v59 }
 0x4a5   :  { %v4862_v28 = vadd.f32 %v4861_v54, %v4860_v9  ;;  %v4863_v39 = vpop.f32.mrb[138].mxu1 }
 0x4a6   :  { %v4864_v11 = vpop.f32.mrb[139].mxu1 }
 0x4a7   :  { %v4865_v2 = vadd.f32 %v4864_v11, %v4863_v39 }
 0x4a9   :  { %v1960_v6 = vpack.c.bf16 %v4865_v2, %v4862_v28 }
 0x4ab   :  { %v4866_v24 = vpop.f32.mrb[140].mxu1  ;;  %2195 = vmatmul.mubr.bf16.gmra.mrb[136].mxu0 %v1960_v6 }
 0x4ac   :  { %v4867_v19 = vpop.f32.mrb[141].mxu1  ;;  %2204 = vmatprep.mubr.bf16.mxu0 %v5615_v59 }
 0x4ad   :  { %v4868_v35 = vadd.f32 %v4867_v19, %v4866_v24  ;;  %v4869_v43 = vpop.f32.mrb[142].mxu1 }
 0x4ae   :  { %v4870_v47 = vpop.f32.mrb[143].mxu1 }
 0x4af   :  { %v4871_v60 = vadd.f32 %v4870_v47, %v4869_v43 }
 0x4b1   :  { %v1961_v10 = vpack.c.bf16 %v4871_v60, %v4868_v35 }
 0x4b3   :  { %v4872_v22 = vpop.f32.mrb[144].mxu1  ;;  %2205 = vmatmul.mubr.bf16.gmra.mrb[140].mxu0 %v1961_v10 }
 0x4b4   :  { %v4873_v44 = vpop.f32.mrb[145].mxu1  ;;  %2214 = vmatprep.mubr.bf16.mxu0 %v5615_v59 }
 0x4b5   :  { %v4874_v62 = vadd.f32 %v4873_v44, %v4872_v22  ;;  %v4875_v8 = vpop.f32.mrb[146].mxu1 }
 0x4b6   :  { %v4876_v15 = vpop.f32.mrb[147].mxu1 }
 0x4b7   :  { %v4877_v21 = vadd.f32 %v4876_v15, %v4875_v8 }
 0x4b9   :  { %v1962_v5 = vpack.c.bf16 %v4877_v21, %v4874_v62 }
 0x4bb   :  { %v4878_v36 = vpop.f32.mrb[148].mxu1  ;;  %2215 = vmatmul.mubr.bf16.gmra.mrb[144].mxu0 %v1962_v5 }
 0x4bc   :  { %v4879_v42 = vpop.f32.mrb[149].mxu1  ;;  %2224 = vmatprep.mubr.bf16.mxu0 %v5615_v59 }
 0x4bd   :  { %v4880_v51 = vadd.f32 %v4879_v42, %v4878_v36  ;;  %v4881_v16 = vpop.f32.mrb[150].mxu1 }
 0x4be   :  { %v4882_v26 = vpop.f32.mrb[151].mxu1 }
 0x4bf   :  { %v4883_v37 = vadd.f32 %v4882_v26, %v4881_v16 }
 0x4c1   :  { %v1963_v40 = vpack.c.bf16 %v4883_v37, %v4880_v51 }
 0x4c3   :  { %v4884_v58 = vpop.f32.mrb[152].mxu1  ;;  %2225 = vmatmul.mubr.bf16.gmra.mrb[148].mxu0 %v1963_v40 }
 0x4c4   :  { %v4885_v49 = vpop.f32.mrb[153].mxu1  ;;  %2234 = vmatprep.mubr.bf16.mxu0 %v5615_v59 }
 0x4c5   :  { %v4886_v41 = vadd.f32 %v4885_v49, %v4884_v58  ;;  %v4887_v46 = vpop.f32.mrb[154].mxu1 }
 0x4c6   :  { %v4888_v1 = vpop.f32.mrb[155].mxu1 }
 0x4c7   :  { %v4889_v27 = vadd.f32 %v4888_v1, %v4887_v46 }
 0x4c9   :  { %v1964_v13 = vpack.c.bf16 %v4889_v27, %v4886_v41 }
 0x4cb   :  { %v4890_v18 = vpop.f32.mrb[156].mxu1  ;;  %2235 = vmatmul.mubr.bf16.gmra.mrb[152].mxu0 %v1964_v13 }
 0x4cc   :  { %v4891_v32 = vpop.f32.mrb[157].mxu1  ;;  %2244 = vmatprep.mubr.bf16.mxu0 %v5615_v59 }
 0x4cd   :  { %v4892_v63 = vadd.f32 %v4891_v32, %v4890_v18  ;;  %v4893_v53 = vpop.f32.mrb[158].mxu1 }
 0x4ce   :  { %v4894_v12 = vpop.f32.mrb[159].mxu1 }
 0x4cf   :  { %v4895_v23 = vadd.f32 %v4894_v12, %v4893_v53 }
 0x4d1   :  { %v1965_v9 = vpack.c.bf16 %v4895_v23, %v4892_v63 }
 0x4d3   :  { %2245 = vmatmul.mubr.bf16.gmra.mrb[156].mxu0 %v1965_v9 }
 0x4d4   :  { %5574 = shalt.err (!%p5571_p4)  }
 0x4d5   :  { %s5575_s10 = scalar_lea.hbm %s7950_s7, 4096 }
 0x4d6   :  { %p5576_p5 = scmp.ne.s32.totalorder %s7950_s7, %s5575_s10  ;;  %p5579_p6 = scmp.lt.u32.totalorder %s5575_s10, %s7950_s7 }
 0x4d8   :  { %p5581_p7 = pnand %p5579_p6, %p5576_p5 }
 0x4da   :  { %5584 = shalt.err (!%p5581_p7)  }
 0x4db   :  { %1772 = dma.vmem_to_hbm [thread:$0]  %s1770_s28, 4096, %s7950_s7, [#allocation7] }
 0x4dc   :  { %s5617_s7 = smov [#allocation5]  }
 0x4dd   :  { %s2327_s17 = sshll.u32 %s5617_s7, 4  ;;  %s2328_s17 = int_to_ptr.vmem [resolvable:$true] %s2327_s17 }
 0x4de   :  { %s5585_s18 = scalar_lea.vmem %s2328_s17, 8192  ;;  %p5590_p9 = scmp.lt.s32.totalorder %s2328_s17, %s2328_s17 }
 0x4df   :  { %p5586_p8 = scmp.ne.s32.totalorder %s2328_s17, %s5585_s18  ;;  %p5591_p10 = scmp.lt.s32.totalorder %s5585_s18, %s5585_s18 }
 0x4e1   :  { %p5592_p11 = por %p5591_p10, %p5590_p9 }
 0x4e3   :  { %p5593_p12 = pnand %p5592_p11, %p5586_p8 }
 0x52e   :  { %v2096_v59 = vpop.f32.mrb[96].mxu0 }
 0x52f   :  { %2255 = vst [vmem:[#allocation5] sm:$0xff] %v2096_v59  ;;  %v2098_v54 = vpop.f32.mrb[97].mxu0 }
 0x530   :  { %2256 = vst [vmem:[#allocation5 + $0x8] sm:$0xff] %v2098_v54  ;;  %v2100_v28 = vpop.f32.mrb[98].mxu0 }
 0x531   :  { %2257 = vst [vmem:[#allocation5 + $0x10] sm:$0xff] %v2100_v28  ;;  %v2102_v39 = vpop.f32.mrb[99].mxu0 }
 0x532   :  { %2258 = vst [vmem:[#allocation5 + $0x18] sm:$0xff] %v2102_v39 }
 0x536   :  { %v2106_v11 = vpop.f32.mrb[100].mxu0 }
 0x537   :  { %2259 = vst [vmem:[#allocation5 + $0x20] sm:$0xff] %v2106_v11  ;;  %v2108_v2 = vpop.f32.mrb[101].mxu0 }
 0x538   :  { %2260 = vst [vmem:[#allocation5 + $0x28] sm:$0xff] %v2108_v2  ;;  %v2110_v6 = vpop.f32.mrb[102].mxu0 }
 0x539   :  { %2261 = vst [vmem:[#allocation5 + $0x30] sm:$0xff] %v2110_v6  ;;  %v2112_v24 = vpop.f32.mrb[103].mxu0 }
 0x53a   :  { %2262 = vst [vmem:[#allocation5 + $0x38] sm:$0xff] %v2112_v24 }
 0x53e   :  { %v2116_v19 = vpop.f32.mrb[104].mxu0 }
 0x53f   :  { %2263 = vst [vmem:[#allocation5 + $0x40] sm:$0xff] %v2116_v19  ;;  %v2118_v35 = vpop.f32.mrb[105].mxu0 }
 0x540   :  { %2264 = vst [vmem:[#allocation5 + $0x48] sm:$0xff] %v2118_v35  ;;  %v2120_v43 = vpop.f32.mrb[106].mxu0 }
 0x541   :  { %2265 = vst [vmem:[#allocation5 + $0x50] sm:$0xff] %v2120_v43  ;;  %v2122_v47 = vpop.f32.mrb[107].mxu0 }
 0x542   :  { %2266 = vst [vmem:[#allocation5 + $0x58] sm:$0xff] %v2122_v47 }
 0x546   :  { %v2126_v60 = vpop.f32.mrb[108].mxu0 }
 0x547   :  { %2267 = vst [vmem:[#allocation5 + $0x60] sm:$0xff] %v2126_v60  ;;  %v2128_v10 = vpop.f32.mrb[109].mxu0 }
 0x548   :  { %2268 = vst [vmem:[#allocation5 + $0x68] sm:$0xff] %v2128_v10  ;;  %v2130_v22 = vpop.f32.mrb[110].mxu0 }
 0x549   :  { %2269 = vst [vmem:[#allocation5 + $0x70] sm:$0xff] %v2130_v22  ;;  %v2132_v44 = vpop.f32.mrb[111].mxu0 }
 0x54a   :  { %2270 = vst [vmem:[#allocation5 + $0x78] sm:$0xff] %v2132_v44 }
 0x54e   :  { %v2136_v62 = vpop.f32.mrb[112].mxu0 }
 0x54f   :  { %2271 = vst [vmem:[#allocation5 + $0x80] sm:$0xff] %v2136_v62  ;;  %v2138_v8 = vpop.f32.mrb[113].mxu0 }
 0x550   :  { %2272 = vst [vmem:[#allocation5 + $0x88] sm:$0xff] %v2138_v8  ;;  %v2140_v15 = vpop.f32.mrb[114].mxu0 }
 0x551   :  { %2273 = vst [vmem:[#allocation5 + $0x90] sm:$0xff] %v2140_v15  ;;  %v2142_v21 = vpop.f32.mrb[115].mxu0 }
 0x552   :  { %2274 = vst [vmem:[#allocation5 + $0x98] sm:$0xff] %v2142_v21 }
 0x556   :  { %v2146_v5 = vpop.f32.mrb[116].mxu0 }
 0x557   :  { %2275 = vst [vmem:[#allocation5 + $0xa0] sm:$0xff] %v2146_v5  ;;  %v2148_v36 = vpop.f32.mrb[117].mxu0 }
 0x558   :  { %2276 = vst [vmem:[#allocation5 + $0xa8] sm:$0xff] %v2148_v36  ;;  %v2150_v42 = vpop.f32.mrb[118].mxu0 }
 0x559   :  { %2277 = vst [vmem:[#allocation5 + $0xb0] sm:$0xff] %v2150_v42  ;;  %v2152_v51 = vpop.f32.mrb[119].mxu0 }
 0x55a   :  { %2278 = vst [vmem:[#allocation5 + $0xb8] sm:$0xff] %v2152_v51 }
 0x55e   :  { %v2156_v16 = vpop.f32.mrb[120].mxu0 }
 0x55f   :  { %2279 = vst [vmem:[#allocation5 + $0xc0] sm:$0xff] %v2156_v16  ;;  %v2158_v26 = vpop.f32.mrb[121].mxu0 }
 0x560   :  { %2280 = vst [vmem:[#allocation5 + $0xc8] sm:$0xff] %v2158_v26  ;;  %v2160_v37 = vpop.f32.mrb[122].mxu0 }
 0x561   :  { %2281 = vst [vmem:[#allocation5 + $0xd0] sm:$0xff] %v2160_v37  ;;  %v2162_v40 = vpop.f32.mrb[123].mxu0 }
 0x562   :  { %2282 = vst [vmem:[#allocation5 + $0xd8] sm:$0xff] %v2162_v40 }
 0x566   :  { %v2166_v58 = vpop.f32.mrb[124].mxu0 }
 0x567   :  { %2283 = vst [vmem:[#allocation5 + $0xe0] sm:$0xff] %v2166_v58  ;;  %v2168_v49 = vpop.f32.mrb[125].mxu0 }
 0x568   :  { %2284 = vst [vmem:[#allocation5 + $0xe8] sm:$0xff] %v2168_v49  ;;  %v2170_v41 = vpop.f32.mrb[126].mxu0 }
 0x569   :  { %2285 = vst [vmem:[#allocation5 + $0xf0] sm:$0xff] %v2170_v41  ;;  %v2172_v46 = vpop.f32.mrb[127].mxu0 }
 0x56a   :  { %2286 = vst [vmem:[#allocation5 + $0xf8] sm:$0xff] %v2172_v46 }
 0x56e   :  { %v2176_v1 = vpop.f32.mrb[128].mxu0 }
 0x56f   :  { %2287 = vst [vmem:[#allocation5 + $0x100] sm:$0xff] %v2176_v1  ;;  %v2178_v27 = vpop.f32.mrb[129].mxu0 }
 0x570   :  { %2288 = vst [vmem:[#allocation5 + $0x108] sm:$0xff] %v2178_v27  ;;  %v2180_v13 = vpop.f32.mrb[130].mxu0 }
 0x571   :  { %2289 = vst [vmem:[#allocation5 + $0x110] sm:$0xff] %v2180_v13  ;;  %v2182_v18 = vpop.f32.mrb[131].mxu0 }
 0x572   :  { %2290 = vst [vmem:[#allocation5 + $0x118] sm:$0xff] %v2182_v18 }
 0x576   :  { %v2186_v32 = vpop.f32.mrb[132].mxu0 }
 0x577   :  { %2291 = vst [vmem:[#allocation5 + $0x120] sm:$0xff] %v2186_v32  ;;  %v2188_v63 = vpop.f32.mrb[133].mxu0 }
 0x578   :  { %2292 = vst [vmem:[#allocation5 + $0x128] sm:$0xff] %v2188_v63  ;;  %v2190_v53 = vpop.f32.mrb[134].mxu0 }
 0x579   :  { %2293 = vst [vmem:[#allocation5 + $0x130] sm:$0xff] %v2190_v53  ;;  %v2192_v12 = vpop.f32.mrb[135].mxu0 }
 0x57a   :  { %2294 = vst [vmem:[#allocation5 + $0x138] sm:$0xff] %v2192_v12 }
 0x57e   :  { %v2196_v23 = vpop.f32.mrb[136].mxu0 }
 0x57f   :  { %2295 = vst [vmem:[#allocation5 + $0x140] sm:$0xff] %v2196_v23  ;;  %v2198_v9 = vpop.f32.mrb[137].mxu0 }
 0x580   :  { %2296 = vst [vmem:[#allocation5 + $0x148] sm:$0xff] %v2198_v9  ;;  %v2200_v59 = vpop.f32.mrb[138].mxu0 }
 0x581   :  { %2297 = vst [vmem:[#allocation5 + $0x150] sm:$0xff] %v2200_v59  ;;  %v2202_v54 = vpop.f32.mrb[139].mxu0 }
 0x582   :  { %2298 = vst [vmem:[#allocation5 + $0x158] sm:$0xff] %v2202_v54 }
 0x586   :  { %v2206_v28 = vpop.f32.mrb[140].mxu0 }
 0x587   :  { %2299 = vst [vmem:[#allocation5 + $0x160] sm:$0xff] %v2206_v28  ;;  %v2208_v39 = vpop.f32.mrb[141].mxu0 }
 0x588   :  { %2300 = vst [vmem:[#allocation5 + $0x168] sm:$0xff] %v2208_v39  ;;  %v2210_v11 = vpop.f32.mrb[142].mxu0 }
 0x589   :  { %2301 = vst [vmem:[#allocation5 + $0x170] sm:$0xff] %v2210_v11  ;;  %v2212_v2 = vpop.f32.mrb[143].mxu0 }
 0x58a   :  { %2302 = vst [vmem:[#allocation5 + $0x178] sm:$0xff] %v2212_v2 }
 0x58e   :  { %v2216_v6 = vpop.f32.mrb[144].mxu0 }
 0x58f   :  { %2303 = vst [vmem:[#allocation5 + $0x180] sm:$0xff] %v2216_v6  ;;  %v2218_v24 = vpop.f32.mrb[145].mxu0 }
 0x590   :  { %2304 = vst [vmem:[#allocation5 + $0x188] sm:$0xff] %v2218_v24  ;;  %v2220_v19 = vpop.f32.mrb[146].mxu0 }
 0x591   :  { %2305 = vst [vmem:[#allocation5 + $0x190] sm:$0xff] %v2220_v19  ;;  %v2222_v35 = vpop.f32.mrb[147].mxu0 }
 0x592   :  { %2306 = vst [vmem:[#allocation5 + $0x198] sm:$0xff] %v2222_v35 }
 0x596   :  { %v2226_v43 = vpop.f32.mrb[148].mxu0 }
 0x597   :  { %2307 = vst [vmem:[#allocation5 + $0x1a0] sm:$0xff] %v2226_v43  ;;  %v2228_v47 = vpop.f32.mrb[149].mxu0 }
 0x598   :  { %2308 = vst [vmem:[#allocation5 + $0x1a8] sm:$0xff] %v2228_v47  ;;  %v2230_v60 = vpop.f32.mrb[150].mxu0 }
 0x599   :  { %2309 = vst [vmem:[#allocation5 + $0x1b0] sm:$0xff] %v2230_v60  ;;  %v2232_v10 = vpop.f32.mrb[151].mxu0 }
 0x59a   :  { %2310 = vst [vmem:[#allocation5 + $0x1b8] sm:$0xff] %v2232_v10 }
 0x59e   :  { %v2236_v22 = vpop.f32.mrb[152].mxu0 }
 0x59f   :  { %2311 = vst [vmem:[#allocation5 + $0x1c0] sm:$0xff] %v2236_v22  ;;  %v2238_v44 = vpop.f32.mrb[153].mxu0 }
 0x5a0   :  { %2312 = vst [vmem:[#allocation5 + $0x1c8] sm:$0xff] %v2238_v44  ;;  %v2240_v62 = vpop.f32.mrb[154].mxu0 }
 0x5a1   :  { %2313 = vst [vmem:[#allocation5 + $0x1d0] sm:$0xff] %v2240_v62  ;;  %v2242_v8 = vpop.f32.mrb[155].mxu0 }
 0x5a2   :  { %2314 = vst [vmem:[#allocation5 + $0x1d8] sm:$0xff] %v2242_v8 }
 0x5a6   :  { %v2246_v15 = vpop.f32.mrb[156].mxu0 }
 0x5a7   :  { %2315 = vst [vmem:[#allocation5 + $0x1e0] sm:$0xff] %v2246_v15  ;;  %v2248_v21 = vpop.f32.mrb[157].mxu0 }
 0x5a8   :  { %2316 = vst [vmem:[#allocation5 + $0x1e8] sm:$0xff] %v2248_v21  ;;  %v2250_v5 = vpop.f32.mrb[158].mxu0 }
 0x5a9   :  { %2317 = vst [vmem:[#allocation5 + $0x1f0] sm:$0xff] %v2250_v5  ;;  %v2252_v36 = vpop.f32.mrb[159].mxu0 }
 0x5aa   :  { %2318 = vst [vmem:[#allocation5 + $0x1f8] sm:$0xff] %v2252_v36 }
 0x5ab   :  { %5596 = shalt.err (!%p5593_p12)  }
 0x5ac   :  { %s5597_s20 = scalar_lea.hbm %s7951_s8, 8192 }
 0x5ad   :  { %p5598_p13 = scmp.ne.s32.totalorder %s7951_s8, %s5597_s20  ;;  %p5601_p0 = scmp.lt.u32.totalorder %s5597_s20, %s7951_s8 }
 0x5af   :  { %p5603_p1 = pnand %p5601_p0, %p5598_p13 }
 0x5b1   :  { %5606 = shalt.err (!%p5603_p1)  }
 0x5b2   :  { %2330 = dma.vmem_to_hbm [thread:$0]  %s2328_s17, 8192, %s7951_s8, [#allocation7 + $0x1]  ;;  %v2413_v42 = vpack.c.bf16 %v6548_v34, %v6538_v17  ;;  %v2397_v51 = vpack.c.bf16 %v6544_v31, %v6536_v3  ;;  %v8189_v16 = vld [vmem:[#allocation26_spill] sm:$0xff]  ;;  %v8190_v26 = vld [vmem:[#allocation28_spill] sm:$0xff] }
 0x5b3   :  { %v2414_v37 = vpack.c.bf16 %v8190_v26, %v8189_v16 }
 0x5b4   :  { %5609 = dma.done.wait [#allocation6 + $0x1], 4096 }
 0x5b5   :  { %5610 = vsyncadd [#allocation6 + $0x1], 4294963200  ;;  %2461 = vmatprep.subr.bf16.mxu1 %v2413_v42  ;;  %v8191_v40 = vld [vmem:[#allocation23_spill] sm:$0xff]  ;;  %v8192_v58 = vld [vmem:[#allocation25_spill] sm:$0xff]  ;;  %vm4191_vm0 = vcmask 7168   ;;  %vm4224_vm1 = vcmask 15360  }
 0x5b6   :  { %2462 = vmatpush1.bf16.msra.mxu1 %v2397_v51  ;;  %v2398_v49 = vpack.c.bf16 %v8192_v58, %v8191_v40  ;;  %v8193_v41 = vld [vmem:[#allocation30_spill] sm:$0xff]  ;;  %v8194_v46 = vld [vmem:[#allocation32_spill] sm:$0xff]  ;;  %v8195_v27 = vld [vmem:[#allocation27_spill] sm:$0xff]  ;;  %vm4257_vm2 = vcmask 23552   ;;  %vm4290_vm3 = vcmask 31744  }
 0x5b7   :  { %2463 = vmatprep.subr.bf16.mxu1 %v2414_v37  ;;  %v2415_v1 = vpack.c.bf16 %v8194_v46, %v8193_v41  ;;  %v8196_v13 = vld [vmem:[#allocation29_spill] sm:$0xff]  ;;  %v8198_v53 = vld [vmem:[#allocation35_spill] sm:$0xff]  ;;  %v8200_v9 = vld [vmem:[#allocation34_spill] sm:$0xff] }
 0x5b8   :  { %v2399_v18 = vpack.c.bf16 %v8196_v13, %v8195_v27  ;;  %v2430_v32 = vld [vmem:[#allocation3 + $0x8] sm:$0xff]  ;;  %v8199_v23 = vld [vmem:[#allocation31_spill] sm:$0xff]  ;;  %v8203_v11 = vld [vmem:[#allocation36_spill] sm:$0xff] }
 0x5b9   :  { %v8197_v63 = vld [vmem:[#allocation33_spill] sm:$0xff]  ;;  %2493 = vmatprep.mubr.bf16.mxu1 %v2430_v32  ;;  %v2400_v59 = vpack.c.bf16 %v8200_v9, %v8199_v23  ;;  %v8202_v28 = vld [vmem:[#allocation39_spill] sm:$0xff]  ;;  %v8204_v2 = vld [vmem:[#allocation38_spill] sm:$0xff] }
 0x5ba   :  { %2464 = vmatpush1.bf16.msra.mxu1 %v2398_v49  ;;  %v2416_v12 = vpack.c.bf16 %v8198_v53, %v8197_v63  ;;  %v8201_v54 = vld [vmem:[#allocation37_spill] sm:$0xff]  ;;  %v2401_v6 = vpack.c.bf16 %v8204_v2, %v8203_v11  ;;  %v8206_v19 = vld [vmem:[#allocation43_spill] sm:$0xff]  ;;  %v8207_v43 = vld [vmem:[#allocation40_spill] sm:$0xff] }
 0x5bb   :  { %2465 = vmatprep.subr.bf16.mxu1 %v2415_v1  ;;  %v2417_v39 = vpack.c.bf16 %v8202_v28, %v8201_v54  ;;  %v8205_v24 = vld [vmem:[#allocation41_spill] sm:$0xff]  ;;  %v8208_v47 = vld [vmem:[#allocation42_spill] sm:$0xff]  ;;  %v8210_v22 = vld [vmem:[#allocation47_spill] sm:$0xff] }
 0x5bc   :  { %v2418_v35 = vpack.c.bf16 %v8206_v19, %v8205_v24  ;;  %v2402_v60 = vpack.c.bf16 %v8208_v47, %v8207_v43  ;;  %v8209_v10 = vld [vmem:[#allocation45_spill] sm:$0xff]  ;;  %v8211_v62 = vld [vmem:[#allocation44_spill] sm:$0xff]  ;;  %v8212_v8 = vld [vmem:[#allocation46_spill] sm:$0xff] }
 0x5bd   :  { %v2419_v44 = vpack.c.bf16 %v8210_v22, %v8209_v10  ;;  %v2403_v15 = vpack.c.bf16 %v8212_v8, %v8211_v62  ;;  %v8213_v21 = vld [vmem:[#allocation49_spill] sm:$0xff]  ;;  %v8214_v5 = vld [vmem:[#allocation51_spill] sm:$0xff]  ;;  %v8215_v42 = vld [vmem:[#allocation48_spill] sm:$0xff] }
 0x5be   :  { %2466 = vmatpush1.bf16.msra.mxu1 %v2399_v18  ;;  %v2420_v36 = vpack.c.bf16 %v8214_v5, %v8213_v21  ;;  %v8216_v51 = vld [vmem:[#allocation50_spill] sm:$0xff]  ;;  %v8217_v49 = vld [vmem:[#allocation53_spill] sm:$0xff]  ;;  %v8218_v18 = vld [vmem:[#allocation52_spill] sm:$0xff] }
 0x5bf   :  { %2467 = vmatprep.subr.bf16.mxu1 %v2416_v12  ;;  %v2404_v37 = vpack.c.bf16 %v8216_v51, %v8215_v42  ;;  %v2421_v1 = vpack.c.bf16 %v6682_v30, %v8217_v49  ;;  %v8219_v32 = vld [vmem:[#allocation54_spill] sm:$0xff]  ;;  %v5175_v22 = vld [vmem:[%s7949_s6 + $0x20] sm:$0xff]  }
 0x5c0   :  { %v2405_v12 = vpack.c.bf16 %v8219_v32, %v8218_v18  ;;  %v8225_v30 = vld [vmem:[#allocation66_spill] sm:$0xff]  ;;  %v5172_v32 = vld [vmem:[%s7949_s6 + $0x8] sm:$0xff]  }
 0x5c1   :  { %v5177_v5 = vld [vmem:[%s7949_s6 + $0x30] sm:$0xff]  }
 0x5c2   :  { %2468 = vmatpush1.bf16.msra.mxu1 %v2400_v59  ;;  %v2422_v59 = vpack.c.bf16 %v6693_v45, %v6689_v38  ;;  %v5173_v45 = vld [vmem:[%s7949_s6 + $0x10] sm:$0xff]  }
 0x5c3   :  { %2469 = vmatprep.subr.bf16.mxu1 %v2417_v39  ;;  %v8220_v39 = vld [vmem:[#allocation58_spill] sm:$0xff] }
 0x5c6   :  { %2470 = vmatpush1.bf16.msra.mxu1 %v2401_v6  ;;  %v2406_v6 = vpack.c.bf16 %v8220_v39, %v6687_v20 }
 0x5c7   :  { %2471 = vmatprep.subr.bf16.mxu1 %v2418_v35  ;;  %v2423_v35 = vpack.c.bf16 %v6704_v4, %v6700_v52 }
 0x5ca   :  { %2472 = vmatpush1.bf16.msra.mxu1 %v2402_v60  ;;  %v8221_v60 = vld [vmem:[#allocation60_spill] sm:$0xff] }
 0x5cb   :  { %2473 = vmatprep.subr.bf16.mxu1 %v2419_v44  ;;  %v8222_v44 = vld [vmem:[#allocation62_spill] sm:$0xff] }
 0x5ce   :  { %2474 = vmatpush1.bf16.msra.mxu1 %v2403_v15  ;;  %v2407_v15 = vpack.c.bf16 %v8222_v44, %v8221_v60  ;;  %v8229_v44 = vld [vmem:[#allocation74_spill] sm:$0xff] }
 0x5cf   :  { %2475 = vmatprep.subr.bf16.mxu1 %v2420_v36  ;;  %v8223_v36 = vld [vmem:[#allocation65_spill] sm:$0xff] }
 0x5d2   :  { %2476 = vmatpush1.bf16.msra.mxu1 %v2404_v37  ;;  %v2424_v37 = vpack.c.bf16 %v6721_v56, %v8223_v36 }
 0x5d3   :  { %2477 = vmatprep.subr.bf16.mxu1 %v2421_v1  ;;  %v8224_v1 = vld [vmem:[#allocation64_spill] sm:$0xff] }
 0x5d4   :  { %v2408_v49 = vpack.c.bf16 %v8225_v30, %v8224_v1 }
 0x5d6   :  { %2478 = vmatpush1.bf16.msra.mxu1 %v2405_v12  ;;  %v2425_v12 = vpack.c.bf16 %v6732_v55, %v6728_v48  ;;  %v2432_v48 = vld [vmem:[#allocation3 + $0x18] sm:$0xff] }
 0x5d7   :  { %2479 = vmatprep.subr.bf16.mxu1 %v2422_v59  ;;  %v8226_v59 = vld [vmem:[#allocation70_spill] sm:$0xff] }
 0x5d8   :  { %v2409_v4 = vpack.c.bf16 %v8226_v59, %v6726_v14 }
 0x5da   :  { %2480 = vmatpush1.bf16.msra.mxu1 %v2406_v6  ;;  %v8227_v6 = vld [vmem:[#allocation73_spill] sm:$0xff] }
 0x5db   :  { %2481 = vmatprep.subr.bf16.mxu1 %v2423_v35  ;;  %v2426_v52 = vpack.c.bf16 %v6749_v25, %v8227_v6  ;;  %v8228_v35 = vld [vmem:[#allocation72_spill] sm:$0xff] }
 0x5dc   :  { %v2410_v60 = vpack.c.bf16 %v8229_v44, %v8228_v35 }
 0x5de   :  { %2482 = vmatpush1.bf16.msra.mxu1 %v2407_v15  ;;  %v2427_v15 = vpack.c.bf16 %v6760_v7, %v6756_v61  ;;  %v2434_v7 = vld [vmem:[#allocation3 + $0x28] sm:$0xff]  ;;  %v2436_v61 = vld [vmem:[#allocation3 + $0x38] sm:$0xff] }
 0x5df   :  { %2483 = vmatprep.subr.bf16.mxu1 %v2424_v37  ;;  %v2411_v37 = vpack.c.bf16 %v6758_v29, %v6754_v33  ;;  %v2438_v29 = vld [vmem:[#allocation3 + $0x48] sm:$0xff]  ;;  %v2440_v33 = vld [vmem:[#allocation3 + $0x58] sm:$0xff] }
 0x5e2   :  { %2484 = vmatpush1.bf16.msra.mxu1 %v2408_v49  ;;  %v2428_v49 = vpack.c.bf16 %v6780_v50, %v6773_v57 }
 0x5e3   :  { %2485 = vmatprep.subr.bf16.mxu1 %v2425_v12  ;;  %v8230_v12 = vld [vmem:[#allocation80_spill] sm:$0xff] }
 0x5e4   :  { %v2412_v55 = vpack.c.bf16 %v6778_v0, %v8230_v12 }
 0x5e6   :  { %2486 = vmatpush1.bf16.msra.mxu1 %v2409_v4  ;;  %v2429_v4 = vld [vmem:[#allocation3] sm:$0xff] }
 0x5e7   :  { %2487 = vmatprep.subr.bf16.mxu1 %v2426_v52  ;;  %v2431_v52 = vld [vmem:[#allocation3 + $0x10] sm:$0xff] }
 0x5ea   :  { %2488 = vmatpush1.bf16.msra.mxu1 %v2410_v60  ;;  %v2433_v60 = vld [vmem:[#allocation3 + $0x20] sm:$0xff] }
 0x5eb   :  { %2489 = vmatprep.subr.bf16.mxu1 %v2427_v15  ;;  %v2435_v15 = vld [vmem:[#allocation3 + $0x30] sm:$0xff] }
 0x5ee   :  { %2490 = vmatpush1.bf16.msra.mxu1 %v2411_v37  ;;  %v2437_v37 = vld [vmem:[#allocation3 + $0x40] sm:$0xff] }
 0x5ef   :  { %2491 = vmatprep.subr.bf16.mxu1 %v2428_v49  ;;  %v2442_v49 = vld [vmem:[#allocation3 + $0x68] sm:$0xff] }
 0x5f2   :  { %2492 = vmatpush1.bf16.msra.mxu1 %v2412_v55  ;;  %v2439_v55 = vld [vmem:[#allocation3 + $0x50] sm:$0xff] }
 0x5f5   :  { %2494 = vmatmul.mubr.bf16.vlgmr.msra.gmra.mrb[160].mxu1 %v2429_v4  ;;  %v2444_v4 = vld [vmem:[#allocation3 + $0x78] sm:$0xff] }
 0x5f6   :  { %2503 = vmatprep.mubr.bf16.mxu1 %v2432_v48  ;;  %v2441_v48 = vld [vmem:[#allocation3 + $0x60] sm:$0xff] }
 0x5fd   :  { %2504 = vmatmul.mubr.bf16.gmra.mrb[164].mxu1 %v2431_v52  ;;  %v2446_v52 = vld [vmem:[#allocation3 + $0x88] sm:$0xff] }
 0x5fe   :  { %2513 = vmatprep.mubr.bf16.mxu1 %v2434_v7  ;;  %v2443_v7 = vld [vmem:[#allocation3 + $0x70] sm:$0xff] }
 0x605   :  { %2514 = vmatmul.mubr.bf16.gmra.mrb[168].mxu1 %v2433_v60  ;;  %v2448_v60 = vld [vmem:[#allocation3 + $0x98] sm:$0xff] }
 0x606   :  { %2523 = vmatprep.mubr.bf16.mxu1 %v2436_v61  ;;  %v2445_v61 = vld [vmem:[#allocation3 + $0x80] sm:$0xff] }
 0x60d   :  { %2524 = vmatmul.mubr.bf16.gmra.mrb[172].mxu1 %v2435_v15  ;;  %v2450_v15 = vld [vmem:[#allocation3 + $0xa8] sm:$0xff] }
 0x60e   :  { %2533 = vmatprep.mubr.bf16.mxu1 %v2438_v29  ;;  %v2447_v29 = vld [vmem:[#allocation3 + $0x90] sm:$0xff] }
 0x615   :  { %2534 = vmatmul.mubr.bf16.gmra.mrb[176].mxu1 %v2437_v37  ;;  %v2452_v37 = vld [vmem:[#allocation3 + $0xb8] sm:$0xff] }
 0x616   :  { %2543 = vmatprep.mubr.bf16.mxu1 %v2440_v33  ;;  %v2449_v33 = vld [vmem:[#allocation3 + $0xa0] sm:$0xff] }
 0x61d   :  { %2544 = vmatmul.mubr.bf16.gmra.mrb[180].mxu1 %v2439_v55  ;;  %v2451_v55 = vld [vmem:[#allocation3 + $0xb0] sm:$0xff] }
 0x61e   :  { %2553 = vmatprep.mubr.bf16.mxu1 %v2442_v49  ;;  %v2454_v49 = vld [vmem:[#allocation3 + $0xc8] sm:$0xff] }
 0x625   :  { %2554 = vmatmul.mubr.bf16.gmra.mrb[184].mxu1 %v2441_v48  ;;  %v2453_v48 = vld [vmem:[#allocation3 + $0xc0] sm:$0xff] }
 0x626   :  { %2563 = vmatprep.mubr.bf16.mxu1 %v2444_v4  ;;  %v2456_v4 = vld [vmem:[#allocation3 + $0xd8] sm:$0xff] }
 0x62d   :  { %2564 = vmatmul.mubr.bf16.gmra.mrb[188].mxu1 %v2443_v7  ;;  %v2455_v7 = vld [vmem:[#allocation3 + $0xd0] sm:$0xff] }
 0x62e   :  { %2573 = vmatprep.mubr.bf16.mxu1 %v2446_v52  ;;  %v2458_v52 = vld [vmem:[#allocation3 + $0xe8] sm:$0xff] }
 0x635   :  { %2574 = vmatmul.mubr.bf16.gmra.mrb[192].mxu1 %v2445_v61  ;;  %v2457_v61 = vld [vmem:[#allocation3 + $0xe0] sm:$0xff] }
 0x636   :  { %2583 = vmatprep.mubr.bf16.mxu1 %v2448_v60  ;;  %v2460_v60 = vld [vmem:[#allocation3 + $0xf8] sm:$0xff] }
 0x63d   :  { %2584 = vmatmul.mubr.bf16.gmra.mrb[196].mxu1 %v2447_v29  ;;  %v2459_v29 = vld [vmem:[#allocation3 + $0xf0] sm:$0xff] }
 0x63e   :  { %2593 = vmatprep.mubr.bf16.mxu1 %v2450_v15 }
 0x645   :  { %2594 = vmatmul.mubr.bf16.gmra.mrb[200].mxu1 %v2449_v33 }
 0x646   :  { %2603 = vmatprep.mubr.bf16.mxu1 %v2452_v37 }
 0x64d   :  { %2604 = vmatmul.mubr.bf16.gmra.mrb[204].mxu1 %v2451_v55 }
 0x64e   :  { %2613 = vmatprep.mubr.bf16.mxu1 %v2454_v49 }
 0x655   :  { %2614 = vmatmul.mubr.bf16.gmra.mrb[208].mxu1 %v2453_v48 }
 0x656   :  { %2623 = vmatprep.mubr.bf16.mxu1 %v2456_v4 }
 0x65d   :  { %2624 = vmatmul.mubr.bf16.gmra.mrb[212].mxu1 %v2455_v7 }
 0x65e   :  { %2633 = vmatprep.mubr.bf16.mxu1 %v2458_v52 }
 0x665   :  { %2634 = vmatmul.mubr.bf16.gmra.mrb[216].mxu1 %v2457_v61 }
 0x666   :  { %2643 = vmatprep.mubr.bf16.mxu1 %v2460_v60 }
 0x66d   :  { %2644 = vmatmul.mubr.bf16.gmra.mrb[220].mxu1 %v2459_v29 }
 0x6c8   :  { %v6947_v15 = vpop.f32.mrb[160].mxu1 }
 0x6c9   :  { %v6949_v33 = vpop.f32.mrb[161].mxu1  ;;  %v2654_v37 = vmul.f32 %v6947_v15, %v6947_v15 }
 0x6ca   :  { %v6953_v55 = vpop.f32.mrb[162].mxu1 }
 0x6cb   :  { %2686 = vadd.xlane.f32.xlu0 %v2654_v37  ;;  %v6955_v49 = vpop.f32.mrb[163].mxu1  ;;  %v2655_v48 = vmul.f32 %v6953_v55, %v6953_v55 }
 0x6cf   :  { %2688 = vadd.xlane.f32.xlu0 %v2655_v48 }
 0x6d0   :  { %v6959_v4 = vpop.f32.mrb[164].mxu1 }
 0x6d1   :  { %v6961_v7 = vpop.f32.mrb[165].mxu1  ;;  %v2656_v52 = vmul.f32 %v6959_v4, %v6959_v4 }
 0x6d2   :  { %v6965_v61 = vpop.f32.mrb[166].mxu1 }
 0x6d3   :  { %2690 = vadd.xlane.f32.xlu1 %v2656_v52  ;;  %v6967_v60 = vpop.f32.mrb[167].mxu1  ;;  %v2657_v29 = vmul.f32 %v6965_v61, %v6965_v61 }
 0x6d7   :  { %2692 = vadd.xlane.f32.xlu1 %v2657_v29 }
 0x6d8   :  { %v6971_v37 = vpop.f32.mrb[168].mxu1 }
 0x6d9   :  { %v6973_v50 = vpop.f32.mrb[169].mxu1  ;;  %v2658_v48 = vmul.f32 %v6971_v37, %v6971_v37 }
 0x6da   :  { %8231 = vst [vmem:[#allocation84_spill] sm:$0xff] %v6973_v50  ;;  %v6977_v57 = vpop.f32.mrb[170].mxu1 }
 0x6db   :  { %2694 = vadd.xlane.f32.xlu0 %v2658_v48  ;;  %v6979_v0 = vpop.f32.mrb[171].mxu1  ;;  %v2659_v52 = vmul.f32 %v6977_v57, %v6977_v57 }
 0x6dd   :  { %2696 = vadd.xlane.f32.xlu1 %v2659_v52 }
 0x6e0   :  { %v6983_v12 = vpop.f32.mrb[172].mxu1 }
 0x6e1   :  { %v6985_v59 = vpop.f32.mrb[173].mxu1  ;;  %v2660_v29 = vmul.f32 %v6983_v12, %v6983_v12 }
 0x6e2   :  { %v6989_v14 = vpop.f32.mrb[174].mxu1 }
 0x6e3   :  { %2698 = vadd.xlane.f32.xlu0 %v2660_v29  ;;  %v6991_v25 = vpop.f32.mrb[175].mxu1  ;;  %v2661_v48 = vmul.f32 %v6989_v14, %v6989_v14 }
 0x6e4   :  { %8232 = vst [vmem:[#allocation85_spill] sm:$0xff] %v6991_v25 }
 0x6e5   :  { %2700 = vadd.xlane.f32.xlu1 %v2661_v48  ;;  %v5171_v48 = vld [vmem:[%s7949_s6] sm:$0xff]  }
 0x6e6   :  { %4936 = vmatprep.subr.bf16.mxu0 %v5171_v48 }
 0x6e7   :  { %4937 = vmatpush3.bf16.msra.mxu0 %v5171_v48 }
 0x6e8   :  { %v6995_v6 = vpop.f32.mrb[176].mxu1  ;;  %4938 = vmatprep.subr.bf16.mxu0 %v5172_v32 }
 0x6e9   :  { %v6997_v44 = vpop.f32.mrb[177].mxu1  ;;  %v2662_v52 = vmul.f32 %v6995_v6, %v6995_v6 }
 0x6ea   :  { %v7001_v35 = vpop.f32.mrb[178].mxu1 }
 0x6eb   :  { %2702 = vadd.xlane.f32.xlu0 %v2662_v52  ;;  %v7003_v56 = vpop.f32.mrb[179].mxu1  ;;  %v2663_v29 = vmul.f32 %v7001_v35, %v7001_v35  ;;  %4939 = vmatpush3.bf16.msra.mxu0 %v5172_v32 }
 0x6ec   :  { %8233 = vst [vmem:[#allocation86_spill] sm:$0xff] %v7003_v56  ;;  %4940 = vmatprep.subr.bf16.mxu0 %v5173_v45 }
 0x6ed   :  { %2704 = vadd.xlane.f32.xlu1 %v2663_v29 }
 0x6ef   :  { %4941 = vmatpush3.bf16.msra.mxu0 %v5173_v45 }
 0x6f0   :  { %v7010_v36 = vpop.f32.mrb[180].mxu1 }
 0x6f1   :  { %v7012_v30 = vpop.f32.mrb[181].mxu1  ;;  %v2664_v1 = vmul.f32 %v7010_v36, %v7010_v36 }
 0x6f2   :  { %v7016_v52 = vpop.f32.mrb[182].mxu1 }
 0x6f3   :  { %2706 = vadd.xlane.f32.xlu0 %v2664_v1  ;;  %v7021_v29 = vpop.f32.mrb[183].mxu1  ;;  %v2665_v18 = vmul.f32 %v7016_v52, %v7016_v52 }
 0x6f4   :  { %8234 = vst [vmem:[#allocation87_spill] sm:$0xff] %v7021_v29 }
 0x6f5   :  { %2708 = vadd.xlane.f32.xlu1 %v2665_v18  ;;  %v5174_v18 = vld [vmem:[%s7949_s6 + $0x18] sm:$0xff]  }
 0x6f6   :  { %4942 = vmatprep.subr.bf16.mxu0 %v5174_v18 }
 0x6f7   :  { %4943 = vmatpush3.bf16.msra.mxu0 %v5174_v18 }
 0x6f8   :  { %v7028_v48 = vpop.f32.mrb[184].mxu1  ;;  %4944 = vmatprep.subr.bf16.mxu0 %v5175_v22 }
 0x6f9   :  { %v7030_v38 = vpop.f32.mrb[185].mxu1  ;;  %v2666_v1 = vmul.f32 %v7028_v48, %v7028_v48 }
 0x6fa   :  { %v7034_v39 = vpop.f32.mrb[186].mxu1 }
 0x6fb   :  { %2710 = vadd.xlane.f32.xlu0 %v2666_v1  ;;  %v7039_v32 = vpop.f32.mrb[187].mxu1  ;;  %v2667_v20 = vmul.f32 %v7034_v39, %v7034_v39  ;;  %4945 = vmatpush3.bf16.msra.mxu0 %v5175_v22 }
 0x6fd   :  { %2712 = vadd.xlane.f32.xlu1 %v2667_v20  ;;  %v5176_v20 = vld [vmem:[%s7949_s6 + $0x28] sm:$0xff]  }
 0x6fe   :  { %4946 = vmatprep.subr.bf16.mxu0 %v5176_v20 }
 0x6ff   :  { %4947 = vmatpush3.bf16.msra.mxu0 %v5176_v20  ;;  %v5178_v20 = vld [vmem:[%s7949_s6 + $0x38] sm:$0xff]  }
 0x700   :  { %v7046_v45 = vpop.f32.mrb[188].mxu1  ;;  %4948 = vmatprep.subr.bf16.mxu0 %v5177_v5 }
 0x701   :  { %v7048_v10 = vpop.f32.mrb[189].mxu1  ;;  %v2668_v1 = vmul.f32 %v7046_v45, %v7046_v45 }
 0x702   :  { %8235 = vst [vmem:[#allocation88_spill] sm:$0xff] %v7048_v10  ;;  %v7052_v8 = vpop.f32.mrb[190].mxu1 }
 0x703   :  { %2714 = vadd.xlane.f32.xlu0 %v2668_v1  ;;  %v7057_v18 = vpop.f32.mrb[191].mxu1  ;;  %v2669_v62 = vmul.f32 %v7052_v8, %v7052_v8  ;;  %4949 = vmatpush3.bf16.msra.mxu0 %v5177_v5 }
 0x704   :  { %8236 = vst [vmem:[#allocation89_spill] sm:$0xff] %v7057_v18  ;;  %4950 = vmatprep.subr.bf16.mxu0 %v5178_v20 }
 0x705   :  { %2716 = vadd.xlane.f32.xlu1 %v2669_v62 }
 0x707   :  { %4951 = vmatpush3.bf16.msra.mxu0 %v5178_v20 }
 0x708   :  { %v7064_v22 = vpop.f32.mrb[192].mxu1 }
 0x709   :  { %v7066_v21 = vpop.f32.mrb[193].mxu1  ;;  %v2670_v1 = vmul.f32 %v7064_v22, %v7064_v22 }
 0x70a   :  { %8237 = vst [vmem:[#allocation90_spill] sm:$0xff] %v7066_v21  ;;  %v7070_v51 = vpop.f32.mrb[194].mxu1 }
 0x70b   :  { %2718 = vadd.xlane.f32.xlu0 %v2670_v1  ;;  %v7072_v42 = vpop.f32.mrb[195].mxu1  ;;  %v2671_v62 = vmul.f32 %v7070_v51, %v7070_v51 }
 0x70d   :  { %2720 = vadd.xlane.f32.xlu1 %v2671_v62 }
 0x710   :  { %v7079_v28 = vpop.f32.mrb[196].mxu1 }
 0x711   :  { %v7081_v54 = vpop.f32.mrb[197].mxu1  ;;  %v2672_v5 = vmul.f32 %v7079_v28, %v7079_v28 }
 0x712   :  { %v7085_v1 = vpop.f32.mrb[198].mxu1 }
 0x713   :  { %2722 = vadd.xlane.f32.xlu0 %v2672_v5  ;;  %v7087_v2 = vpop.f32.mrb[199].mxu1  ;;  %v2673_v62 = vmul.f32 %v7085_v1, %v7085_v1 }
 0x715   :  { %2724 = vadd.xlane.f32.xlu1 %v2673_v62 }
 0x718   :  { %v7091_v11 = vpop.f32.mrb[200].mxu1 }
 0x719   :  { %v7093_v19 = vpop.f32.mrb[201].mxu1  ;;  %v2674_v20 = vmul.f32 %v7091_v11, %v7091_v11 }
 0x71a   :  { %v7097_v24 = vpop.f32.mrb[202].mxu1 }
 0x71b   :  { %2726 = vadd.xlane.f32.xlu0 %v2674_v20  ;;  %v7099_v47 = vpop.f32.mrb[203].mxu1  ;;  %v2675_v5 = vmul.f32 %v7097_v24, %v7097_v24 }
 0x71d   :  { %2728 = vadd.xlane.f32.xlu1 %v2675_v5 }
 0x720   :  { %v7103_v43 = vpop.f32.mrb[204].mxu1 }
 0x721   :  { %v7105_v46 = vpop.f32.mrb[205].mxu1  ;;  %v2676_v62 = vmul.f32 %v7103_v43, %v7103_v43 }
 0x722   :  { %v7109_v41 = vpop.f32.mrb[206].mxu1 }
 0x723   :  { %2730 = vadd.xlane.f32.xlu0 %v2676_v62  ;;  %v7111_v13 = vpop.f32.mrb[207].mxu1  ;;  %v2677_v20 = vmul.f32 %v7109_v41, %v7109_v41 }
 0x725   :  { %2732 = vadd.xlane.f32.xlu1 %v2677_v20 }
 0x728   :  { %v7115_v27 = vpop.f32.mrb[208].mxu1 }
 0x729   :  { %v7117_v53 = vpop.f32.mrb[209].mxu1  ;;  %v2678_v5 = vmul.f32 %v7115_v27, %v7115_v27 }
 0x72a   :  { %v7121_v63 = vpop.f32.mrb[210].mxu1 }
 0x72b   :  { %2734 = vadd.xlane.f32.xlu0 %v2678_v5  ;;  %v7123_v9 = vpop.f32.mrb[211].mxu1  ;;  %v2679_v62 = vmul.f32 %v7121_v63, %v7121_v63 }
 0x72d   :  { %2736 = vadd.xlane.f32.xlu1 %v2679_v62 }
 0x730   :  { %v7127_v23 = vpop.f32.mrb[212].mxu1 }
 0x731   :  { %8238 = vst [vmem:[#allocation91_spill] sm:$0xff] %v7127_v23  ;;  %v7129_v34 = vpop.f32.mrb[213].mxu1  ;;  %v2680_v20 = vmul.f32 %v7127_v23, %v7127_v23 }
 0x732   :  { %v7133_v17 = vpop.f32.mrb[214].mxu1 }
 0x733   :  { %8239 = vst [vmem:[#allocation92_spill] sm:$0xff] %v7133_v17  ;;  %2738 = vadd.xlane.f32.xlu0 %v2680_v20  ;;  %v7135_v31 = vpop.f32.mrb[215].mxu1  ;;  %v2681_v5 = vmul.f32 %v7133_v17, %v7133_v17 }
 0x735   :  { %2740 = vadd.xlane.f32.xlu1 %v2681_v5 }
 0x738   :  { %v7139_v3 = vpop.f32.mrb[216].mxu1 }
 0x739   :  { %8240 = vst [vmem:[#allocation93_spill] sm:$0xff] %v7139_v3  ;;  %v7141_v26 = vpop.f32.mrb[217].mxu1  ;;  %v2682_v62 = vmul.f32 %v7139_v3, %v7139_v3 }
 0x73a   :  { %v7145_v16 = vpop.f32.mrb[218].mxu1 }
 0x73b   :  { %8241 = vst [vmem:[#allocation94_spill] sm:$0xff] %v7145_v16  ;;  %2742 = vadd.xlane.f32.xlu0 %v2682_v62  ;;  %v7147_v58 = vpop.f32.mrb[219].mxu1  ;;  %v2683_v20 = vmul.f32 %v7145_v16, %v7145_v16  ;;  %v3038_v16 = vmul.f32 %v6949_v33, %v6949_v33 }
 0x73d   :  { %2744 = vadd.xlane.f32.xlu1 %v2683_v20  ;;  %v3039_v20 = vmul.f32 %v6955_v49, %v6955_v49 }
 0x740   :  { %v7151_v40 = vpop.f32.mrb[220].mxu1 }
 0x741   :  { %8242 = vst [vmem:[#allocation95_spill] sm:$0xff] %v7151_v40  ;;  %v7153_v17 = vpop.f32.mrb[221].mxu1  ;;  %v2684_v5 = vmul.f32 %v7151_v40, %v7151_v40  ;;  %v3040_v40 = vmul.f32 %v6961_v7, %v6961_v7 }
 0x742   :  { %v7157_v23 = vpop.f32.mrb[222].mxu1 }
 0x743   :  { %8243 = vst [vmem:[#allocation96_spill] sm:$0xff] %v7157_v23  ;;  %2746 = vadd.xlane.f32.xlu0 %v2684_v5  ;;  %v7159_v3 = vpop.f32.mrb[223].mxu1  ;;  %v2685_v62 = vmul.f32 %v7157_v23, %v7157_v23  ;;  %v3041_v5 = vmul.f32 %v6967_v60, %v6967_v60  ;;  %v3042_v23 = vmul.f32 %v6973_v50, %v6973_v50 }
 0x745   :  { %2748 = vadd.xlane.f32.xlu1 %v2685_v62  ;;  %v3043_v62 = vmul.f32 %v6979_v0, %v6979_v0 }
 0x747   :  { %3070 = vadd.xlane.f32.xlu0 %v3038_v16  ;;  %v3044_v16 = vmul.f32 %v6985_v59, %v6985_v59 }
 0x749   :  { %3072 = vadd.xlane.f32.xlu1 %v3039_v20  ;;  %v3045_v20 = vmul.f32 %v6991_v25, %v6991_v25 }
 0x74b   :  { %3074 = vadd.xlane.f32.xlu0 %v3040_v40  ;;  %v3046_v40 = vmul.f32 %v6997_v44, %v6997_v44 }
 0x74d   :  { %3076 = vadd.xlane.f32.xlu1 %v3041_v5  ;;  %v3047_v5 = vmul.f32 %v7003_v56, %v7003_v56 }
 0x74f   :  { %3078 = vadd.xlane.f32.xlu0 %v3042_v23 }
 0x751   :  { %3080 = vadd.xlane.f32.xlu1 %v3043_v62  ;;  %v3048_v62 = vmul.f32 %v7012_v30, %v7012_v30 }
 0x753   :  { %3082 = vadd.xlane.f32.xlu0 %v3044_v16  ;;  %v3049_v16 = vmul.f32 %v7021_v29, %v7021_v29 }
 0x755   :  { %3084 = vadd.xlane.f32.xlu1 %v3045_v20 }
 0x757   :  { %3086 = vadd.xlane.f32.xlu0 %v3046_v40  ;;  %v3050_v40 = vmul.f32 %v7030_v38, %v7030_v38 }
 0x758   :  { %v2687_v23 = vpop.xlane.xlu0 %2686 }
 0x759   :  { %v2750_v50 = vmax.f32 %v2687_v23, 1e-24  ;;  %3088 = vadd.xlane.f32.xlu1 %v3047_v5  ;;  %v3051_v23 = vmul.f32 %v7039_v32, %v7039_v32 }
 0x75b   :  { %5179 = vrsqrt.f32 %v2750_v50  ;;  %3090 = vadd.xlane.f32.xlu0 %v3048_v62  ;;  %v3052_v50 = vmul.f32 %v7048_v10, %v7048_v10 }
 0x75c   :  { %v2689_v25 = vpop.xlane.xlu0 %2688 }
 0x75d   :  { %v2751_v20 = vmax.f32 %v2689_v25, 1e-24  ;;  %3092 = vadd.xlane.f32.xlu1 %v3049_v16  ;;  %v3053_v25 = vmul.f32 %v7057_v18, %v7057_v18  ;;  %v3056_v18 = vmul.f32 %v7081_v54, %v7081_v54 }
 0x75f   :  { %5181 = vrsqrt.f32 %v2751_v20  ;;  %3094 = vadd.xlane.f32.xlu0 %v3050_v40  ;;  %v3054_v20 = vmul.f32 %v7066_v21, %v7066_v21 }
 0x760   :  { %v2691_v5 = vpop.xlane.xlu1 %2690 }
 0x761   :  { %v2752_v56 = vmax.f32 %v2691_v5, 1e-24  ;;  %3096 = vadd.xlane.f32.xlu1 %v3051_v23  ;;  %v3055_v23 = vmul.f32 %v7072_v42, %v7072_v42 }
 0x763   :  { %5183 = vrsqrt.f32 %v2752_v56  ;;  %3098 = vadd.xlane.f32.xlu0 %v3052_v50 }
 0x764   :  { %v2693_v62 = vpop.xlane.xlu1 %2692 }
 0x765   :  { %v5180_v16 = vpop.eup %5179  ;;  %v2753_v29 = vmax.f32 %v2693_v62, 1e-24  ;;  %3100 = vadd.xlane.f32.xlu1 %v3053_v25 }
 0x766   :  { %v2814_v40 = vmul.f32 %v5180_v16, %v6947_v15  ;;  %v3057_v15 = vmul.f32 %v7087_v2, %v7087_v2 }
 0x767   :  { %5185 = vrsqrt.f32 %v2753_v29  ;;  %3102 = vadd.xlane.f32.xlu0 %v3054_v20  ;;  %v3058_v20 = vmul.f32 %v7093_v19, %v7093_v19 }
 0x768   :  { %v4484_v5 = vmul.f32 -1.442695, %v2814_v40  ;;  %v2695_v56 = vpop.xlane.xlu0 %2694 }
 0x769   :  { %v5182_v50 = vpop.eup %5181  ;;  %v2754_v10 = vmax.f32 %v2695_v56, 1e-24  ;;  %3104 = vadd.xlane.f32.xlu1 %v3055_v23  ;;  %v3060_v56 = vmul.f32 %v7105_v46, %v7105_v46 }
 0x76a   :  { %v2815_v25 = vmul.f32 %v5182_v50, %v6953_v55  ;;  %v2697_v62 = vpop.xlane.xlu1 %2696  ;;  %5187 = vpow2.f32 %v4484_v5  ;;  %v3059_v55 = vmul.f32 %v7099_v47, %v7099_v47 }
 0x76b   :  { %5189 = vrsqrt.f32 %v2754_v10  ;;  %v2755_v21 = vmax.f32 %v2697_v62, 1e-24  ;;  %3106 = vadd.xlane.f32.xlu0 %v3056_v18 }
 0x76c   :  { %v4485_v29 = vmul.f32 -1.442695, %v2815_v25 }
 0x76d   :  { %v5184_v16 = vpop.eup %5183  ;;  %5191 = vrsqrt.f32 %v2755_v21  ;;  %3108 = vadd.xlane.f32.xlu1 %v3057_v15 }
 0x76e   :  { %v2816_v40 = vmul.f32 %v5184_v16, %v6959_v4  ;;  %5193 = vpow2.f32 %v4485_v29  ;;  %v3061_v4 = vmul.f32 %v7111_v13, %v7111_v13  ;;  %v3062_v16 = vmul.f32 %v7117_v53, %v7117_v53 }
 0x76f   :  { %3110 = vadd.xlane.f32.xlu0 %v3058_v20 }
 0x770   :  { %v4486_v10 = vmul.f32 -1.442695, %v2816_v40  ;;  %v2699_v23 = vpop.xlane.xlu0 %2698 }
 0x771   :  { %v5186_v18 = vpop.eup %5185  ;;  %v2756_v5 = vmax.f32 %v2699_v23, 1e-24  ;;  %3112 = vadd.xlane.f32.xlu1 %v3059_v55  ;;  %v3063_v55 = vmul.f32 %v7123_v9, %v7123_v9 }
 0x772   :  { %5195 = vpow2.f32 %v4486_v10  ;;  %v2817_v21 = vmul.f32 %v5186_v18, %v6965_v61  ;;  %v2701_v50 = vpop.xlane.xlu1 %2700 }
 0x773   :  { %5197 = vrsqrt.f32 %v2756_v5  ;;  %v2757_v25 = vmax.f32 %v2701_v50, 1e-24  ;;  %3114 = vadd.xlane.f32.xlu0 %v3060_v56 }
 0x774   :  { %v5188_v62 = vpop.eup %5187  ;;  %v4487_v15 = vmul.f32 -1.442695, %v2817_v21  ;;  %v3064_v21 = vmul.f32 %v7129_v34, %v7129_v34 }
 0x775   :  { %v5190_v29 = vpop.eup %5189  ;;  %5199 = vrsqrt.f32 %v2757_v25  ;;  %3116 = vadd.xlane.f32.xlu1 %v3061_v4  ;;  %v2942_v20 = vadd.f32 1.0, %v5188_v62  ;;  %v3065_v62 = vmul.f32 %v7135_v31, %v7135_v31 }
 0x776   :  { %5201 = vpow2.f32 %v4487_v15  ;;  %v2818_v40 = vmul.f32 %v5190_v29, %v6971_v37  ;;  %v3066_v29 = vmul.f32 %v7141_v26, %v7141_v26 }
 0x777   :  { %v5192_v61 = vpop.eup %5191  ;;  %3118 = vadd.xlane.f32.xlu0 %v3062_v16  ;;  %5203 = vrcp.f32 %v2942_v20 }
 0x778   :  { %v5194_v10 = vpop.eup %5193  ;;  %v4488_v23 = vmul.f32 -1.442695, %v2818_v40  ;;  %v2819_v18 = vmul.f32 %v5192_v61, %v6977_v57  ;;  %v2703_v5 = vpop.xlane.xlu0 %2702  ;;  %v3067_v61 = vmul.f32 %v7147_v58, %v7147_v58 }
 0x779   :  { %v2758_v56 = vmax.f32 %v2703_v5, 1e-24  ;;  %3120 = vadd.xlane.f32.xlu1 %v3063_v55  ;;  %v2943_v37 = vadd.f32 1.0, %v5194_v10 }
 0x77a   :  { %5205 = vpow2.f32 %v4488_v23  ;;  %v4489_v50 = vmul.f32 -1.442695, %v2819_v18  ;;  %v2705_v25 = vpop.xlane.xlu1 %2704 }
 0x77b   :  { %5207 = vrsqrt.f32 %v2758_v56  ;;  %v2759_v4 = vmax.f32 %v2705_v25, 1e-24  ;;  %3122 = vadd.xlane.f32.xlu0 %v3064_v21  ;;  %v3068_v56 = vmul.f32 %v7153_v17, %v7153_v17 }
 0x77c   :  { %v5196_v15 = vpop.eup %5195  ;;  %5209 = vpow2.f32 %v4489_v50 }
 0x77d   :  { %v5198_v57 = vpop.eup %5197  ;;  %5211 = vrsqrt.f32 %v2759_v4  ;;  %3124 = vadd.xlane.f32.xlu1 %v3065_v62  ;;  %v2944_v16 = vadd.f32 1.0, %v5196_v15 }
 0x77e   :  { %v2820_v20 = vmul.f32 %v5198_v57, %v6983_v12  ;;  %5213 = vrcp.f32 %v2943_v37  ;;  %v3069_v37 = vmul.f32 %v7159_v3, %v7159_v3 }
 0x77f   :  { %v5200_v40 = vpop.eup %5199  ;;  %3126 = vadd.xlane.f32.xlu0 %v3066_v29  ;;  %5215 = vrcp.f32 %v2944_v16 }
 0x780   :  { %v5202_v55 = vpop.eup %5201  ;;  %v4490_v10 = vmul.f32 -1.442695, %v2820_v20  ;;  %v2821_v23 = vmul.f32 %v5200_v40, %v6989_v14  ;;  %v2707_v18 = vpop.xlane.xlu0 %2706 }
 0x781   :  { %v2760_v5 = vmax.f32 %v2707_v18, 1e-24  ;;  %3128 = vadd.xlane.f32.xlu1 %v3067_v61  ;;  %v2945_v50 = vadd.f32 1.0, %v5202_v55  ;;  %v5204_v25 = vpop.eup %5203 }
 0x782   :  { %5217 = vpow2.f32 %v4490_v10  ;;  %v4491_v21 = vmul.f32 -1.442695, %v2821_v23  ;;  %v2709_v12 = vpop.xlane.xlu1 %2708 }
 0x783   :  { %5219 = vrsqrt.f32 %v2760_v5  ;;  %v2761_v4 = vmax.f32 %v2709_v12, 1e-24  ;;  %3130 = vadd.xlane.f32.xlu0 %v3068_v56 }
 0x784   :  { %v5206_v62 = vpop.eup %5205  ;;  %5221 = vpow2.f32 %v4491_v21 }
 0x785   :  { %v5208_v14 = vpop.eup %5207  ;;  %5223 = vrsqrt.f32 %v2761_v4  ;;  %3132 = vadd.xlane.f32.xlu1 %v3069_v37  ;;  %v2946_v15 = vadd.f32 1.0, %v5206_v62 }
 0x786   :  { %v5210_v57 = vpop.eup %5209  ;;  %v2822_v29 = vmul.f32 %v5208_v14, %v6995_v6  ;;  %5225 = vrcp.f32 %v2945_v50 }
 0x787   :  { %v5212_v16 = vpop.eup %5211  ;;  %v2947_v20 = vadd.f32 1.0, %v5210_v57  ;;  %5227 = vrcp.f32 %v2946_v15 }
 0x788   :  { %v5214_v40 = vpop.eup %5213  ;;  %v4492_v61 = vmul.f32 -1.442695, %v2822_v29  ;;  %v2823_v55 = vmul.f32 %v5212_v16, %v7001_v35  ;;  %v2711_v10 = vpop.xlane.xlu0 %2710 }
 0x789   :  { %v3422_v23 = vpack.c.bf16 %v5214_v40, %v5204_v25  ;;  %v2762_v18 = vmax.f32 %v2711_v10, 1e-24  ;;  %5229 = vrcp.f32 %v2947_v20  ;;  %v5216_v21 = vpop.eup %5215 }
 0x78a   :  { %5231 = vpow2.f32 %v4492_v61  ;;  %v4493_v5 = vmul.f32 -1.442695, %v2823_v55  ;;  %v2713_v56 = vpop.xlane.xlu1 %2712 }
 0x78b   :  { %4952 = vmatprep.mubr.bf16.mxu0 %v3422_v23  ;;  %5233 = vrsqrt.f32 %v2762_v18  ;;  %v2763_v12 = vmax.f32 %v2713_v56, 1e-24 }
 0x78c   :  { %v5218_v6 = vpop.eup %5217  ;;  %5235 = vpow2.f32 %v4493_v5 }
 0x78d   :  { %v5220_v50 = vpop.eup %5219  ;;  %5237 = vrsqrt.f32 %v2763_v12  ;;  %v2948_v37 = vadd.f32 1.0, %v5218_v6 }
 0x78e   :  { %v5222_v4 = vpop.eup %5221  ;;  %v2824_v35 = vmul.f32 %v5220_v50, %v7010_v36 }
 0x78f   :  { %v5224_v62 = vpop.eup %5223  ;;  %v2949_v14 = vadd.f32 1.0, %v5222_v4  ;;  %5239 = vrcp.f32 %v2948_v37 }
 0x790   :  { %v5226_v25 = vpop.eup %5225  ;;  %v4494_v15 = vmul.f32 -1.442695, %v2824_v35  ;;  %v2825_v57 = vmul.f32 %v5224_v62, %v7016_v52  ;;  %v2715_v29 = vpop.xlane.xlu0 %2714 }
 0x791   :  { %v3423_v16 = vpack.c.bf16 %v5226_v25, %v5216_v21  ;;  %v2764_v20 = vmax.f32 %v2715_v29, 1e-24  ;;  %5241 = vrcp.f32 %v2949_v14  ;;  %v5228_v40 = vpop.eup %5227 }
 0x792   :  { %5243 = vpow2.f32 %v4494_v15  ;;  %v4495_v61 = vmul.f32 -1.442695, %v2825_v57  ;;  %v2717_v55 = vpop.xlane.xlu1 %2716 }
 0x793   :  { %v5230_v10 = vpop.eup %5229  ;;  %4953 = vmatmul.mubr.bf16.vlgmr.msra.gmra.mrb[160].mxu0 %v3423_v16  ;;  %5245 = vrsqrt.f32 %v2764_v20  ;;  %v2765_v23 = vmax.f32 %v2717_v55, 1e-24 }
 0x794   :  { %v5232_v36 = vpop.eup %5231  ;;  %5247 = vpow2.f32 %v4495_v61  ;;  %v3424_v18 = vpack.c.bf16 %v5230_v10, %v5228_v40 }
 0x795   :  { %v5234_v5 = vpop.eup %5233  ;;  %5249 = vrsqrt.f32 %v2765_v23  ;;  %v2950_v56 = vadd.f32 1.0, %v5232_v36 }
 0x796   :  { %v5236_v52 = vpop.eup %5235  ;;  %v2826_v12 = vmul.f32 %v5234_v5, %v7028_v48  ;;  %4956 = vmatprep.mubr.bf16.mxu0 %v3424_v18 }
 0x797   :  { %v5238_v21 = vpop.eup %5237  ;;  %v2951_v6 = vadd.f32 1.0, %v5236_v52  ;;  %5251 = vrcp.f32 %v2950_v56 }
 0x798   :  { %v4496_v50 = vmul.f32 -1.442695, %v2826_v12  ;;  %v2827_v37 = vmul.f32 %v5238_v21, %v7034_v39  ;;  %v2719_v4 = vpop.xlane.xlu0 %2718 }
 0x799   :  { %v2766_v35 = vmax.f32 %v2719_v4, 1e-24  ;;  %5253 = vrcp.f32 %v2951_v6  ;;  %v5240_v62 = vpop.eup %5239 }
 0x79a   :  { %5255 = vpow2.f32 %v4496_v50  ;;  %v4497_v14 = vmul.f32 -1.442695, %v2827_v37  ;;  %v2721_v25 = vpop.xlane.xlu1 %2720 }
 0x79b   :  { %v5242_v15 = vpop.eup %5241  ;;  %5257 = vrsqrt.f32 %v2766_v35  ;;  %v2767_v57 = vmax.f32 %v2721_v25, 1e-24 }
 0x79c   :  { %v5244_v29 = vpop.eup %5243  ;;  %5259 = vpow2.f32 %v4497_v14  ;;  %v3425_v48 = vpack.c.bf16 %v5242_v15, %v5240_v62 }
 0x79d   :  { %v5246_v16 = vpop.eup %5245  ;;  %5261 = vrsqrt.f32 %v2767_v57  ;;  %v2952_v20 = vadd.f32 1.0, %v5244_v29 }
 0x79e   :  { %v5248_v40 = vpop.eup %5247  ;;  %v2828_v39 = vmul.f32 %v5246_v16, %v7046_v45  ;;  %4957 = vmatmul.mubr.bf16.gmra.mrb[164].mxu0 %v3425_v48 }
 0x79f   :  { %v5250_v61 = vpop.eup %5249  ;;  %v2953_v55 = vadd.f32 1.0, %v5248_v40  ;;  %5263 = vrcp.f32 %v2952_v20 }
 0x7a0   :  { %v4498_v10 = vmul.f32 -1.442695, %v2828_v39  ;;  %v2829_v23 = vmul.f32 %v5250_v61, %v7052_v8  ;;  %v2723_v36 = vpop.xlane.xlu0 %2722 }
 0x7a1   :  { %v2768_v18 = vmax.f32 %v2723_v36, 1e-24  ;;  %5265 = vrcp.f32 %v2953_v55  ;;  %v5252_v5 = vpop.eup %5251 }
 0x7a2   :  { %5267 = vpow2.f32 %v4498_v10  ;;  %v4499_v56 = vmul.f32 -1.442695, %v2829_v23  ;;  %v2725_v52 = vpop.xlane.xlu1 %2724 }
 0x7a3   :  { %v5254_v12 = vpop.eup %5253  ;;  %5269 = vrsqrt.f32 %v2768_v18  ;;  %v2769_v21 = vmax.f32 %v2725_v52, 1e-24 }
 0x7a4   :  { %v5256_v6 = vpop.eup %5255  ;;  %5271 = vpow2.f32 %v4499_v56  ;;  %v3426_v45 = vpack.c.bf16 %v5254_v12, %v5252_v5 }
 0x7a5   :  { %v5258_v50 = vpop.eup %5257  ;;  %5273 = vrsqrt.f32 %v2769_v21  ;;  %v2954_v37 = vadd.f32 1.0, %v5256_v6 }
 0x7a6   :  { %v5260_v4 = vpop.eup %5259  ;;  %v2830_v8 = vmul.f32 %v5258_v50, %v7064_v22  ;;  %4960 = vmatprep.mubr.bf16.mxu0 %v3426_v45 }
 0x7a7   :  { %v5262_v35 = vpop.eup %5261  ;;  %v2955_v62 = vadd.f32 1.0, %v5260_v4  ;;  %5275 = vrcp.f32 %v2954_v37 }
 0x7a8   :  { %v4500_v14 = vmul.f32 -1.442695, %v2830_v8  ;;  %v2831_v25 = vmul.f32 %v5262_v35, %v7070_v51  ;;  %v2727_v15 = vpop.xlane.xlu0 %2726 }
 0x7a9   :  { %v2770_v57 = vmax.f32 %v2727_v15, 1e-24  ;;  %5277 = vrcp.f32 %v2955_v62  ;;  %v5264_v29 = vpop.eup %5263 }
 0x7aa   :  { %5279 = vpow2.f32 %v4500_v14  ;;  %v4501_v48 = vmul.f32 -1.442695, %v2831_v25  ;;  %v2729_v16 = vpop.xlane.xlu1 %2728 }
 0x7ab   :  { %v5266_v20 = vpop.eup %5265  ;;  %5281 = vrsqrt.f32 %v2770_v57  ;;  %v2771_v40 = vmax.f32 %v2729_v16, 1e-24 }
 0x7ac   :  { %v5268_v39 = vpop.eup %5267  ;;  %5283 = vpow2.f32 %v4501_v48  ;;  %v3427_v22 = vpack.c.bf16 %v5266_v20, %v5264_v29 }
 0x7ad   :  { %v5270_v61 = vpop.eup %5269  ;;  %5285 = vrsqrt.f32 %v2771_v40  ;;  %v2956_v55 = vadd.f32 1.0, %v5268_v39 }
 0x7ae   :  { %v5272_v10 = vpop.eup %5271  ;;  %v2832_v51 = vmul.f32 %v5270_v61, %v7079_v28  ;;  %4961 = vmatmul.mubr.bf16.gmra.mrb[168].mxu0 %v3427_v22 }
 0x7af   :  { %v5274_v23 = vpop.eup %5273  ;;  %v2957_v36 = vadd.f32 1.0, %v5272_v10  ;;  %5287 = vrcp.f32 %v2956_v55 }
 0x7b0   :  { %v4502_v18 = vmul.f32 -1.442695, %v2832_v51  ;;  %v2833_v5 = vmul.f32 %v5274_v23, %v7085_v1  ;;  %v2731_v56 = vpop.xlane.xlu0 %2730 }
 0x7b1   :  { %v2772_v52 = vmax.f32 %v2731_v56, 1e-24  ;;  %5289 = vrcp.f32 %v2957_v36  ;;  %v5276_v12 = vpop.eup %5275 }
 0x7b2   :  { %5291 = vpow2.f32 %v4502_v18  ;;  %v4503_v21 = vmul.f32 -1.442695, %v2833_v5  ;;  %v2733_v6 = vpop.xlane.xlu1 %2732 }
 0x7b3   :  { %v5278_v45 = vpop.eup %5277  ;;  %5293 = vrsqrt.f32 %v2772_v52  ;;  %v2773_v50 = vmax.f32 %v2733_v6, 1e-24 }
 0x7b4   :  { %v5280_v37 = vpop.eup %5279  ;;  %5295 = vpow2.f32 %v4503_v21  ;;  %v3428_v28 = vpack.c.bf16 %v5278_v45, %v5276_v12 }
 0x7b5   :  { %v5282_v4 = vpop.eup %5281  ;;  %5297 = vrsqrt.f32 %v2773_v50  ;;  %v2958_v8 = vadd.f32 1.0, %v5280_v37 }
 0x7b6   :  { %v5284_v35 = vpop.eup %5283  ;;  %v2834_v1 = vmul.f32 %v5282_v4, %v7091_v11  ;;  %4964 = vmatprep.mubr.bf16.mxu0 %v3428_v28 }
 0x7b7   :  { %v5286_v62 = vpop.eup %5285  ;;  %v2959_v14 = vadd.f32 1.0, %v5284_v35  ;;  %5299 = vrcp.f32 %v2958_v8 }
 0x7b8   :  { %v4504_v25 = vmul.f32 -1.442695, %v2834_v1  ;;  %v2835_v15 = vmul.f32 %v5286_v62, %v7097_v24  ;;  %v2735_v57 = vpop.xlane.xlu0 %2734 }
 0x7b9   :  { %v2774_v29 = vmax.f32 %v2735_v57, 1e-24  ;;  %5301 = vrcp.f32 %v2959_v14  ;;  %v5288_v48 = vpop.eup %5287 }
 0x7ba   :  { %5303 = vpow2.f32 %v4504_v25  ;;  %v4505_v16 = vmul.f32 -1.442695, %v2835_v15  ;;  %v2737_v20 = vpop.xlane.xlu1 %2736 }
 0x7bb   :  { %v5290_v40 = vpop.eup %5289  ;;  %5305 = vrsqrt.f32 %v2774_v29  ;;  %v2775_v39 = vmax.f32 %v2737_v20, 1e-24 }
 0x7bc   :  { %v5292_v22 = vpop.eup %5291  ;;  %5307 = vpow2.f32 %v4505_v16  ;;  %v3429_v11 = vpack.c.bf16 %v5290_v40, %v5288_v48 }
 0x7bd   :  { %v5294_v61 = vpop.eup %5293  ;;  %5309 = vrsqrt.f32 %v2775_v39  ;;  %v2960_v55 = vadd.f32 1.0, %v5292_v22 }
 0x7be   :  { %v5296_v10 = vpop.eup %5295  ;;  %v2836_v24 = vmul.f32 %v5294_v61, %v7103_v43  ;;  %4965 = vmatmul.mubr.bf16.gmra.mrb[172].mxu0 %v3429_v11  ;;  %v8244_v11 = vld [vmem:[#allocation91_spill] sm:$0xff] }
 0x7bf   :  { %v5298_v51 = vpop.eup %5297  ;;  %v2961_v23 = vadd.f32 1.0, %v5296_v10  ;;  %5311 = vrcp.f32 %v2960_v55 }
 0x7c0   :  { %v4506_v36 = vmul.f32 -1.442695, %v2836_v24  ;;  %v2837_v18 = vmul.f32 %v5298_v51, %v7109_v41  ;;  %v2739_v5 = vpop.xlane.xlu0 %2738  ;;  %v8245_v24 = vld [vmem:[#allocation92_spill] sm:$0xff] }
 0x7c1   :  { %v2776_v56 = vmax.f32 %v2739_v5, 1e-24  ;;  %5313 = vrcp.f32 %v2961_v23  ;;  %v5300_v52 = vpop.eup %5299 }
 0x7c2   :  { %5315 = vpow2.f32 %v4506_v36  ;;  %v4507_v12 = vmul.f32 -1.442695, %v2837_v18  ;;  %v2741_v21 = vpop.xlane.xlu1 %2740 }
 0x7c3   :  { %v5302_v6 = vpop.eup %5301  ;;  %5317 = vrsqrt.f32 %v2776_v56  ;;  %v2777_v45 = vmax.f32 %v2741_v21, 1e-24 }
 0x7c4   :  { %v5304_v50 = vpop.eup %5303  ;;  %5319 = vpow2.f32 %v4507_v12  ;;  %v3430_v43 = vpack.c.bf16 %v5302_v6, %v5300_v52 }
 0x7c5   :  { %v5306_v37 = vpop.eup %5305  ;;  %5321 = vrsqrt.f32 %v2777_v45  ;;  %v2962_v28 = vadd.f32 1.0, %v5304_v50 }
 0x7c6   :  { %v5308_v4 = vpop.eup %5307  ;;  %v2838_v41 = vmul.f32 %v5306_v37, %v7115_v27  ;;  %4968 = vmatprep.mubr.bf16.mxu0 %v3430_v43 }
 0x7c7   :  { %v5310_v8 = vpop.eup %5309  ;;  %v2963_v35 = vadd.f32 1.0, %v5308_v4  ;;  %5323 = vrcp.f32 %v2962_v28  ;;  %v8246_v4 = vld [vmem:[#allocation93_spill] sm:$0xff] }
 0x7c8   :  { %v4508_v1 = vmul.f32 -1.442695, %v2838_v41  ;;  %v2839_v62 = vmul.f32 %v5310_v8, %v7121_v63  ;;  %v2743_v14 = vpop.xlane.xlu0 %2742 }
 0x7c9   :  { %v2778_v25 = vmax.f32 %v2743_v14, 1e-24  ;;  %5325 = vrcp.f32 %v2963_v35  ;;  %v5312_v15 = vpop.eup %5311  ;;  %v8247_v14 = vld [vmem:[#allocation94_spill] sm:$0xff] }
 0x7ca   :  { %5327 = vpow2.f32 %v4508_v1  ;;  %v4509_v57 = vmul.f32 -1.442695, %v2839_v62  ;;  %v2745_v29 = vpop.xlane.xlu1 %2744 }
 0x7cb   :  { %v5314_v48 = vpop.eup %5313  ;;  %5329 = vrsqrt.f32 %v2778_v25  ;;  %v2779_v16 = vmax.f32 %v2745_v29, 1e-24 }
 0x7cc   :  { %v5316_v20 = vpop.eup %5315  ;;  %5331 = vpow2.f32 %v4509_v57  ;;  %v3431_v27 = vpack.c.bf16 %v5314_v48, %v5312_v15 }
 0x7cd   :  { %v5318_v40 = vpop.eup %5317  ;;  %5333 = vrsqrt.f32 %v2779_v16  ;;  %v2964_v39 = vadd.f32 1.0, %v5316_v20 }
 0x7ce   :  { %v5320_v22 = vpop.eup %5319  ;;  %v2840_v63 = vmul.f32 %v5318_v40, %v8244_v11  ;;  %4969 = vmatmul.mubr.bf16.gmra.mrb[176].mxu0 %v3431_v27 }
 0x7cf   :  { %v5322_v61 = vpop.eup %5321  ;;  %v2965_v55 = vadd.f32 1.0, %v5320_v22  ;;  %5335 = vrcp.f32 %v2964_v39 }
 0x7d0   :  { %v4510_v10 = vmul.f32 -1.442695, %v2840_v63  ;;  %v2841_v51 = vmul.f32 %v5322_v61, %v8245_v24  ;;  %v2747_v23 = vpop.xlane.xlu0 %2746 }
 0x7d1   :  { %v2780_v36 = vmax.f32 %v2747_v23, 1e-24  ;;  %5337 = vrcp.f32 %v2965_v55  ;;  %v5324_v18 = vpop.eup %5323 }
 0x7d2   :  { %5339 = vpow2.f32 %v4510_v10  ;;  %v4511_v5 = vmul.f32 -1.442695, %v2841_v51  ;;  %v2749_v56 = vpop.xlane.xlu1 %2748  ;;  %v8248_v10 = vld [vmem:[#allocation95_spill] sm:$0xff] }
 0x7d3   :  { %v5326_v52 = vpop.eup %5325  ;;  %5341 = vrsqrt.f32 %v2780_v36  ;;  %v2781_v12 = vmax.f32 %v2749_v56, 1e-24  ;;  %v8249_v56 = vld [vmem:[#allocation96_spill] sm:$0xff] }
 0x7d4   :  { %v5328_v21 = vpop.eup %5327  ;;  %v3071_v6 = vpop.xlane.xlu0 %3070  ;;  %v3432_v45 = vpack.c.bf16 %v5326_v52, %v5324_v18 }
 0x7d5   :  { %v5330_v50 = vpop.eup %5329  ;;  %5343 = vrsqrt.f32 %v2781_v12  ;;  %v3134_v43 = vmax.f32 %v3071_v6, 1e-24  ;;  %v2966_v37 = vadd.f32 1.0, %v5328_v21 }
 0x7d6   :  { %v5332_v28 = vpop.eup %5331  ;;  %5345 = vpow2.f32 %v4511_v5  ;;  %v2842_v41 = vmul.f32 %v5330_v50, %v8246_v4  ;;  %4972 = vmatprep.mubr.bf16.mxu0 %v3432_v45  ;;  %v3073_v8 = vpop.xlane.xlu1 %3072 }
 0x7d7   :  { %v5334_v35 = vpop.eup %5333  ;;  %5347 = vrsqrt.f32 %v3134_v43  ;;  %v3135_v1 = vmax.f32 %v3073_v8, 1e-24  ;;  %v2967_v20 = vadd.f32 1.0, %v5332_v28 }
 0x7d8   :  { %v4512_v62 = vmul.f32 -1.442695, %v2842_v41  ;;  %v2843_v25 = vmul.f32 %v5334_v35, %v8247_v14  ;;  %v3075_v15 = vpop.xlane.xlu0 %3074  ;;  %5349 = vrcp.f32 %v2966_v37 }
 0x7d9   :  { %5351 = vrsqrt.f32 %v3135_v1  ;;  %v3136_v57 = vmax.f32 %v3075_v15, 1e-24  ;;  %v5336_v29 = vpop.eup %5335 }
 0x7da   :  { %5353 = vpow2.f32 %v4512_v62  ;;  %v4513_v48 = vmul.f32 -1.442695, %v2843_v25  ;;  %v3077_v16 = vpop.xlane.xlu1 %3076 }
 0x7db   :  { %v5338_v27 = vpop.eup %5337  ;;  %5355 = vrsqrt.f32 %v3136_v57  ;;  %v3137_v40 = vmax.f32 %v3077_v16, 1e-24 }
 0x7dc   :  { %v5340_v39 = vpop.eup %5339  ;;  %5357 = vpow2.f32 %v4513_v48  ;;  %v3079_v22 = vpop.xlane.xlu0 %3078  ;;  %v3433_v11 = vpack.c.bf16 %v5338_v27, %v5336_v29 }
 0x7dd   :  { %v5342_v63 = vpop.eup %5341  ;;  %5359 = vrsqrt.f32 %v3137_v40  ;;  %v3138_v61 = vmax.f32 %v3079_v22, 1e-24  ;;  %v2968_v55 = vadd.f32 1.0, %v5340_v39 }
 0x7de   :  { %v2844_v24 = vmul.f32 %v5342_v63, %v8248_v10  ;;  %4973 = vmatmul.mubr.bf16.gmra.mrb[180].mxu0 %v3433_v11  ;;  %v3081_v51 = vpop.xlane.xlu1 %3080  ;;  %5361 = vrcp.f32 %v2967_v20 }
 0x7df   :  { %v5344_v23 = vpop.eup %5343  ;;  %5363 = vrsqrt.f32 %v3138_v61  ;;  %v3139_v36 = vmax.f32 %v3081_v51, 1e-24  ;;  %v8250_v61 = vld [vmem:[#allocation84_spill] sm:$0xff] }
 0x7e0   :  { %v5346_v18 = vpop.eup %5345  ;;  %v4514_v5 = vmul.f32 -1.442695, %v2844_v24  ;;  %v2845_v52 = vmul.f32 %v5344_v23, %v8249_v56  ;;  %v3083_v12 = vpop.xlane.xlu0 %3082  ;;  %5365 = vrcp.f32 %v2968_v55 }
 0x7e1   :  { %v5348_v21 = vpop.eup %5347  ;;  %5367 = vrsqrt.f32 %v3139_v36  ;;  %v3140_v6 = vmax.f32 %v3083_v12, 1e-24 }
 0x7e2   :  { %v5350_v45 = vpop.eup %5349  ;;  %5369 = vpow2.f32 %v4514_v5  ;;  %v4515_v50 = vmul.f32 -1.442695, %v2845_v52  ;;  %v3198_v43 = vmul.f32 %v5348_v21, %v6949_v33  ;;  %v3085_v37 = vpop.xlane.xlu1 %3084  ;;  %v2969_v52 = vadd.f32 1.0, %v5346_v18 }
 0x7e3   :  { %v5352_v28 = vpop.eup %5351  ;;  %5371 = vrsqrt.f32 %v3140_v6  ;;  %v3141_v4 = vmax.f32 %v3085_v37, 1e-24 }
 0x7e4   :  { %v7260_v41 = vpop.eup %5353  ;;  %5373 = vpow2.f32 %v4515_v50  ;;  %v4516_v8 = vmul.f32 -1.442695, %v3198_v43  ;;  %v3199_v35 = vmul.f32 %v5352_v28, %v6955_v49  ;;  %v3087_v1 = vpop.xlane.xlu0 %3086 }
 0x7e5   :  { %v5356_v62 = vpop.eup %5355  ;;  %5375 = vrsqrt.f32 %v3141_v4  ;;  %v3142_v14 = vmax.f32 %v3087_v1, 1e-24 }
 0x7e6   :  { %v7263_v25 = vpop.eup %5357  ;;  %5377 = vpow2.f32 %v4516_v8  ;;  %v4517_v15 = vmul.f32 -1.442695, %v3199_v35  ;;  %v3200_v33 = vmul.f32 %v5356_v62, %v6961_v7  ;;  %v3089_v57 = vpop.xlane.xlu1 %3088 }
 0x7e7   :  { %v5360_v29 = vpop.eup %5359  ;;  %5379 = vrsqrt.f32 %v3142_v14  ;;  %v3143_v48 = vmax.f32 %v3089_v57, 1e-24 }
 0x7e8   :  { %v5362_v16 = vpop.eup %5361  ;;  %5381 = vpow2.f32 %v4517_v15  ;;  %v4518_v20 = vmul.f32 -1.442695, %v3200_v33  ;;  %v3201_v27 = vmul.f32 %v5360_v29, %v6967_v60  ;;  %v3091_v49 = vpop.xlane.xlu0 %3090 }
 0x7e9   :  { %v5364_v40 = vpop.eup %5363  ;;  %v3434_v39 = vpack.c.bf16 %v5362_v16, %v5350_v45  ;;  %5383 = vrsqrt.f32 %v3143_v48  ;;  %v3144_v22 = vmax.f32 %v3091_v49, 1e-24  ;;  %v8252_v48 = vld [vmem:[#allocation86_spill] sm:$0xff] }
 0x7ea   :  { %v7267_v11 = vpop.eup %5365  ;;  %5385 = vpow2.f32 %v4518_v20  ;;  %v4519_v63 = vmul.f32 -1.442695, %v3201_v27  ;;  %v3202_v7 = vmul.f32 %v5364_v40, %v8250_v61  ;;  %v3093_v55 = vpop.xlane.xlu1 %3092  ;;  %v2970_v61 = vadd.f32 1.0, %v7260_v41 }
 0x7eb   :  { %v5368_v10 = vpop.eup %5367  ;;  %4976 = vmatprep.mubr.bf16.mxu0 %v3434_v39  ;;  %5387 = vrsqrt.f32 %v3144_v22  ;;  %v3145_v24 = vmax.f32 %v3093_v55, 1e-24 }
 0x7ec   :  { %v7270_v51 = vpop.eup %5369  ;;  %5389 = vpow2.f32 %v4519_v63  ;;  %v4520_v60 = vmul.f32 -1.442695, %v3202_v7  ;;  %v3203_v23 = vmul.f32 %v5368_v10, %v6979_v0  ;;  %v3095_v36 = vpop.xlane.xlu0 %3094  ;;  %v8251_v0 = vld [vmem:[#allocation85_spill] sm:$0xff]  ;;  %v8253_v10 = vld [vmem:[#allocation87_spill] sm:$0xff] }
 0x7ed   :  { %v5372_v5 = vpop.eup %5371  ;;  %5391 = vrsqrt.f32 %v3145_v24  ;;  %v3146_v56 = vmax.f32 %v3095_v36, 1e-24  ;;  %v2971_v36 = vadd.f32 1.0, %v7263_v25 }
 0x7ee   :  { %v7273_v12 = vpop.eup %5373  ;;  %5393 = vpow2.f32 %v4520_v60  ;;  %v4521_v21 = vmul.f32 -1.442695, %v3203_v23  ;;  %v3204_v6 = vmul.f32 %v5372_v5, %v6985_v59  ;;  %v3097_v45 = vpop.xlane.xlu1 %3096 }
 0x7ef   :  { %v5376_v50 = vpop.eup %5375  ;;  %5395 = vrsqrt.f32 %v3146_v56  ;;  %v3147_v43 = vmax.f32 %v3097_v45, 1e-24 }
 0x7f0   :  { %v7276_v37 = vpop.eup %5377  ;;  %5397 = vpow2.f32 %v4521_v21  ;;  %v4522_v28 = vmul.f32 -1.442695, %v3204_v6  ;;  %v3205_v4 = vmul.f32 %v5376_v50, %v8251_v0  ;;  %v3099_v8 = vpop.xlane.xlu0 %3098 }
 0x7f1   :  { %v5380_v35 = vpop.eup %5379  ;;  %5399 = vrcp.f32 %v2969_v52  ;;  %v3148_v18 = vmax.f32 %v3099_v8, 1e-24 }
 0x7f2   :  { %v7279_v1 = vpop.eup %5381  ;;  %5401 = vpow2.f32 %v4522_v28  ;;  %v4523_v62 = vmul.f32 -1.442695, %v3205_v4  ;;  %v3206_v59 = vmul.f32 %v5380_v35, %v6997_v44  ;;  %v3101_v14 = vpop.xlane.xlu1 %3100 }
 0x7f3   :  { %v5384_v15 = vpop.eup %5383  ;;  %5403 = vrsqrt.f32 %v3147_v43  ;;  %v3149_v33 = vmax.f32 %v3101_v14, 1e-24 }
 0x7f4   :  { %v7282_v57 = vpop.eup %5385  ;;  %5405 = vpow2.f32 %v4523_v62  ;;  %v4524_v29 = vmul.f32 -1.442695, %v3206_v59  ;;  %v3207_v16 = vmul.f32 %v5384_v15, %v8252_v48  ;;  %v3103_v20 = vpop.xlane.xlu0 %3102  ;;  %v8254_v59 = vld [vmem:[#allocation88_spill] sm:$0xff] }
 0x7f5   :  { %v5388_v27 = vpop.eup %5387  ;;  %5407 = vrsqrt.f32 %v3148_v18  ;;  %v3150_v49 = vmax.f32 %v3103_v20, 1e-24 }
 0x7f6   :  { %v7285_v40 = vpop.eup %5389  ;;  %5409 = vpow2.f32 %v4524_v29  ;;  %v4525_v39 = vmul.f32 -1.442695, %v3207_v16  ;;  %v3208_v44 = vmul.f32 %v5388_v27, %v7012_v30  ;;  %v3105_v22 = vpop.xlane.xlu1 %3104  ;;  %v8255_v16 = vld [vmem:[#allocation89_spill] sm:$0xff]  ;;  %v2973_v27 = vadd.f32 1.0, %v7273_v12 }
 0x7f7   :  { %v5392_v63 = vpop.eup %5391  ;;  %5411 = vrsqrt.f32 %v3149_v33  ;;  %v3151_v41 = vmax.f32 %v3105_v22, 1e-24  ;;  %v2972_v33 = vadd.f32 1.0, %v7270_v51  ;;  %v8256_v22 = vld [vmem:[#allocation90_spill] sm:$0xff]  ;;  %v3326_v12 = vadd.f32 1.0, %v7276_v37 }
 0x7f8   :  { %v7289_v7 = vpop.eup %5393  ;;  %5413 = vpow2.f32 %v4525_v39  ;;  %v4526_v55 = vmul.f32 -1.442695, %v3208_v44  ;;  %v3209_v24 = vmul.f32 %v5392_v63, %v8253_v10  ;;  %v3107_v60 = vpop.xlane.xlu0 %3106 }
 0x7f9   :  { %v5396_v23 = vpop.eup %5395  ;;  %5415 = vrsqrt.f32 %v3150_v49  ;;  %v3152_v43 = vmax.f32 %v3107_v60, 1e-24 }
 0x7fa   :  { %v7293_v5 = vpop.eup %5397  ;;  %5417 = vpow2.f32 %v4526_v55  ;;  %v4527_v30 = vmul.f32 -1.442695, %v3209_v24  ;;  %v3210_v56 = vmul.f32 %v5396_v23, %v7030_v38  ;;  %v3109_v52 = vpop.xlane.xlu1 %3108 }
 0x7fb   :  { %v5400_v21 = vpop.eup %5399  ;;  %5419 = vrcp.f32 %v2970_v61  ;;  %v3153_v25 = vmax.f32 %v3109_v52, 1e-24 }
 0x7fc   :  { %v7296_v6 = vpop.eup %5401  ;;  %5421 = vpow2.f32 %v4527_v30  ;;  %v4528_v45 = vmul.f32 -1.442695, %v3210_v56  ;;  %v3435_v50 = vpack.c.bf16 %v5400_v21, %v7267_v11  ;;  %v3111_v28 = vpop.xlane.xlu0 %3110  ;;  %v3327_v56 = vadd.f32 1.0, %v7279_v1 }
 0x7fd   :  { %v5404_v0 = vpop.eup %5403  ;;  %5423 = vrcp.f32 %v2971_v36  ;;  %v3154_v35 = vmax.f32 %v3111_v28, 1e-24 }
 0x7fe   :  { %v7299_v4 = vpop.eup %5405  ;;  %5425 = vpow2.f32 %v4528_v45  ;;  %4977 = vmatmul.mubr.bf16.gmra.mrb[184].mxu0 %v3435_v50  ;;  %v3211_v38 = vmul.f32 %v5404_v0, %v7039_v32  ;;  %v3113_v11 = vpop.xlane.xlu1 %3112 }
 0x7ff   :  { %v5408_v8 = vpop.eup %5407  ;;  %5427 = vrsqrt.f32 %v3151_v41  ;;  %v3155_v51 = vmax.f32 %v3113_v11, 1e-24 }
 0x800   :  { %v7302_v18 = vpop.eup %5409  ;;  %v4529_v62 = vmul.f32 -1.442695, %v3211_v38  ;;  %v3212_v14 = vmul.f32 %v5408_v8, %v8254_v59  ;;  %5429 = vrsqrt.f32 %v3152_v43  ;;  %v3115_v49 = vpop.xlane.xlu0 %3114 }
 0x801   :  { %v5412_v15 = vpop.eup %5411  ;;  %5431 = vrsqrt.f32 %v3153_v25  ;;  %v3156_v24 = vmax.f32 %v3115_v49, 1e-24  ;;  %v3330_v49 = vadd.f32 1.0, %v7289_v7 }
 0x802   :  { %v7306_v29 = vpop.eup %5413  ;;  %5433 = vpow2.f32 %v4529_v62  ;;  %v4530_v48 = vmul.f32 -1.442695, %v3212_v14  ;;  %v3213_v32 = vmul.f32 %v5412_v15, %v8255_v16  ;;  %v3117_v60 = vpop.xlane.xlu1 %3116 }
 0x803   :  { %v5416_v20 = vpop.eup %5415  ;;  %5435 = vrsqrt.f32 %v3154_v35  ;;  %v3157_v21 = vmax.f32 %v3117_v60, 1e-24 }
 0x804   :  { %v7310_v39 = vpop.eup %5417  ;;  %5437 = vpow2.f32 %v4530_v48  ;;  %v4531_v44 = vmul.f32 -1.442695, %v3213_v32  ;;  %v3214_v63 = vmul.f32 %v5416_v20, %v8256_v22  ;;  %v3119_v41 = vpop.xlane.xlu0 %3118 }
 0x805   :  { %v5420_v61 = vpop.eup %5419  ;;  %5439 = vrcp.f32 %v2972_v33  ;;  %v3158_v8 = vmax.f32 %v3119_v41, 1e-24  ;;  %v3329_v33 = vadd.f32 1.0, %v7285_v40 }
 0x806   :  { %v7313_v55 = vpop.eup %5421  ;;  %5441 = vpow2.f32 %v4531_v44  ;;  %v4532_v10 = vmul.f32 -1.442695, %v3214_v63  ;;  %v3121_v59 = vpop.xlane.xlu1 %3120 }
 0x807   :  { %v5424_v23 = vpop.eup %5423  ;;  %5443 = vrcp.f32 %v2973_v27  ;;  %v3159_v16 = vmax.f32 %v3121_v59, 1e-24 }
 0x808   :  { %v7316_v36 = vpop.eup %5425  ;;  %5445 = vpow2.f32 %v4532_v10  ;;  %v3436_v30 = vpack.c.bf16 %v5424_v23, %v5420_v61  ;;  %v3123_v11 = vpop.xlane.xlu0 %3122 }
 0x809   :  { %v5428_v52 = vpop.eup %5427  ;;  %5447 = vrsqrt.f32 %v3155_v51 }
 0x80a   :  { %v5430_v45 = vpop.eup %5429  ;;  %4980 = vmatprep.mubr.bf16.mxu0 %v3436_v30  ;;  %v3215_v50 = vmul.f32 %v5428_v52, %v7072_v42  ;;  %5449 = vrsqrt.f32 %v3156_v24  ;;  %v3125_v22 = vpop.xlane.xlu1 %3124  ;;  %v3331_v24 = vadd.f32 1.0, %v7293_v5  ;;  %v3332_v5 = vadd.f32 1.0, %v7296_v6 }
 0x80b   :  { %v5432_v43 = vpop.eup %5431  ;;  %v3216_v28 = vmul.f32 %v5430_v45, %v7081_v54  ;;  %5451 = vrcp.f32 %v3326_v12  ;;  %v3328_v54 = vadd.f32 1.0, %v7282_v57  ;;  %v3161_v7 = vmax.f32 %v3125_v22, 1e-24 }
 0x80c   :  { %v7321_v37 = vpop.eup %5433  ;;  %v4533_v0 = vmul.f32 -1.442695, %v3215_v50  ;;  %v3217_v25 = vmul.f32 %v5432_v43, %v7087_v2  ;;  %5453 = vrcp.f32 %v3327_v56  ;;  %v3127_v61 = vpop.xlane.xlu0 %3126  ;;  %v3333_v50 = vadd.f32 1.0, %v7299_v4 }
 0x80d   :  { %v5436_v1 = vpop.eup %5435  ;;  %v4534_v38 = vmul.f32 -1.442695, %v3216_v28  ;;  %5455 = vrsqrt.f32 %v3157_v21 }
 0x80e   :  { %v7324_v35 = vpop.eup %5437  ;;  %5457 = vpow2.f32 %v4533_v0  ;;  %v4535_v62 = vmul.f32 -1.442695, %v3217_v25  ;;  %v3218_v42 = vmul.f32 %v5436_v1, %v7093_v19  ;;  %v3160_v19 = vmax.f32 %v3123_v11, 1e-24  ;;  %v3129_v41 = vpop.xlane.xlu1 %3128 }
 0x80f   :  { %v5440_v14 = vpop.eup %5439  ;;  %5459 = vpow2.f32 %v4534_v38  ;;  %v3163_v25 = vmax.f32 %v3129_v41, 1e-24 }
 0x810   :  { %v7328_v15 = vpop.eup %5441  ;;  %5461 = vpow2.f32 %v4535_v62  ;;  %v4536_v2 = vmul.f32 -1.442695, %v3218_v42  ;;  %v3131_v43 = vpop.xlane.xlu0 %3130  ;;  %v3334_v42 = vadd.f32 1.0, %v7302_v18 }
 0x811   :  { %v5444_v48 = vpop.eup %5443  ;;  %5463 = vrsqrt.f32 %v3158_v8  ;;  %v3164_v8 = vmax.f32 %v3131_v43, 1e-24 }
 0x812   :  { %v7331_v32 = vpop.eup %5445  ;;  %5465 = vpow2.f32 %v4536_v2  ;;  %v3437_v20 = vpack.c.bf16 %v5444_v48, %v5440_v14  ;;  %v3133_v14 = vpop.xlane.xlu1 %3132 }
 0x813   :  { %v5448_v27 = vpop.eup %5447  ;;  %5467 = vrcp.f32 %v3328_v54  ;;  %v3165_v18 = vmax.f32 %v3133_v14, 1e-24 }
 0x814   :  { %v5450_v57 = vpop.eup %5449  ;;  %4981 = vmatmul.mubr.bf16.gmra.mrb[188].mxu0 %v3437_v20  ;;  %v3219_v44 = vmul.f32 %v5448_v27, %v7099_v47  ;;  %5469 = vrcp.f32 %v3329_v33  ;;  %v3335_v33 = vadd.f32 1.0, %v7306_v29  ;;  %v3338_v29 = vadd.f32 1.0, %v7316_v36 }
 0x815   :  { %v5452_v63 = vpop.eup %5451  ;;  %v3220_v40 = vmul.f32 %v5450_v57, %v7105_v46  ;;  %5471 = vrsqrt.f32 %v3159_v16  ;;  %v3162_v46 = vmax.f32 %v3127_v61, 1e-24  ;;  %v3339_v61 = vadd.f32 1.0, %v7321_v37 }
 0x816   :  { %v5454_v51 = vpop.eup %5453  ;;  %v4537_v10 = vmul.f32 -1.442695, %v3219_v44  ;;  %5473 = vrsqrt.f32 %v3160_v19 }
 0x817   :  { %v5456_v60 = vpop.eup %5455  ;;  %v4538_v23 = vmul.f32 -1.442695, %v3220_v40  ;;  %v3438_v12 = vpack.c.bf16 %v5454_v51, %v5452_v63  ;;  %5475 = vrcp.f32 %v3330_v49 }
 0x818   :  { %v7337_v30 = vpop.eup %5457  ;;  %5477 = vpow2.f32 %v4537_v10  ;;  %v3221_v47 = vmul.f32 %v5456_v60, %v7111_v13  ;;  %v3341_v60 = vadd.f32 1.0, %v7328_v15 }
 0x819   :  { %v7340_v56 = vpop.eup %5459  ;;  %5479 = vpow2.f32 %v4538_v23  ;;  %4984 = vmatprep.mubr.bf16.mxu0 %v3438_v12 }
 0x81a   :  { %v7342_v52 = vpop.eup %5461  ;;  %v4539_v21 = vmul.f32 -1.442695, %v3221_v47  ;;  %5481 = vrcp.f32 %v3331_v24  ;;  %v3342_v47 = vadd.f32 1.0, %v7331_v32 }
 0x81b   :  { %v5464_v45 = vpop.eup %5463  ;;  %5483 = vrsqrt.f32 %v3161_v7 }
 0x81c   :  { %v7346_v28 = vpop.eup %5465  ;;  %5485 = vpow2.f32 %v4539_v21  ;;  %v3222_v13 = vmul.f32 %v5464_v45, %v7117_v53  ;;  %v3343_v21 = vadd.f32 1.0, %v7337_v30 }
 0x81d   :  { %v5468_v0 = vpop.eup %5467  ;;  %5487 = vrsqrt.f32 %v3162_v46  ;;  %v3346_v32 = vadd.f32 1.0, %v7346_v28 }
 0x81e   :  { %v5470_v1 = vpop.eup %5469  ;;  %v4540_v38 = vmul.f32 -1.442695, %v3222_v13  ;;  %5489 = vrcp.f32 %v3332_v5  ;;  %v3344_v5 = vadd.f32 1.0, %v7340_v56 }
 0x81f   :  { %v5472_v62 = vpop.eup %5471  ;;  %v3439_v6 = vpack.c.bf16 %v5470_v1, %v5468_v0  ;;  %5491 = vrcp.f32 %v3333_v50 }
 0x820   :  { %v5474_v59 = vpop.eup %5473  ;;  %5493 = vpow2.f32 %v4540_v38  ;;  %v3223_v4 = vmul.f32 %v5472_v62, %v7123_v9  ;;  %v3336_v9 = vadd.f32 1.0, %v7310_v39 }
 0x821   :  { %v5476_v54 = vpop.eup %5475  ;;  %4985 = vmatmul.mubr.bf16.gmra.mrb[192].mxu0 %v3439_v6  ;;  %v3224_v53 = vmul.f32 %v5474_v59, %v7129_v34  ;;  %5495 = vrsqrt.f32 %v3163_v25  ;;  %v3337_v34 = vadd.f32 1.0, %v7313_v55 }
 0x822   :  { %v7352_v11 = vpop.eup %5477  ;;  %v4541_v2 = vmul.f32 -1.442695, %v3223_v4  ;;  %5497 = vrsqrt.f32 %v3164_v8 }
 0x823   :  { %v7355_v48 = vpop.eup %5479  ;;  %v4542_v16 = vmul.f32 -1.442695, %v3224_v53  ;;  %5499 = vrcp.f32 %v3334_v42  ;;  %v3347_v56 = vadd.f32 1.0, %v7352_v11 }
 0x824   :  { %v5482_v20 = vpop.eup %5481  ;;  %5501 = vpow2.f32 %v4541_v2  ;;  %v3348_v1 = vadd.f32 1.0, %v7355_v48 }
 0x825   :  { %v5484_v19 = vpop.eup %5483  ;;  %5503 = vpow2.f32 %v4542_v16  ;;  %v3440_v27 = vpack.c.bf16 %v5482_v20, %v5476_v54 }
 0x826   :  { %v5486_v49 = vpop.eup %5485  ;;  %v3225_v57 = vmul.f32 %v5484_v19, %v7135_v31  ;;  %5505 = vrcp.f32 %v3335_v33  ;;  %v3340_v31 = vadd.f32 1.0, %v7324_v35 }
 0x827   :  { %v5488_v44 = vpop.eup %5487  ;;  %4988 = vmatprep.mubr.bf16.mxu0 %v3440_v27  ;;  %5507 = vrsqrt.f32 %v3165_v18 }
 0x828   :  { %v5490_v22 = vpop.eup %5489  ;;  %v4543_v63 = vmul.f32 -1.442695, %v3225_v57  ;;  %v3226_v40 = vmul.f32 %v5488_v44, %v7141_v26  ;;  %5509 = vrcp.f32 %v3336_v9 }
 0x829   :  { %v5492_v39 = vpop.eup %5491  ;;  %5511 = vrcp.f32 %v3337_v34 }
 0x82a   :  { %v5494_v51 = vpop.eup %5493  ;;  %5513 = vpow2.f32 %v4543_v63  ;;  %v4544_v55 = vmul.f32 -1.442695, %v3226_v40  ;;  %v3441_v10 = vpack.c.bf16 %v5492_v39, %v5490_v22 }
 0x82b   :  { %v5496_v24 = vpop.eup %5495  ;;  %5515 = vrcp.f32 %v3338_v29  ;;  %v3350_v8 = vadd.f32 1.0, %v5494_v51 }
 0x82c   :  { %v5498_v36 = vpop.eup %5497  ;;  %5517 = vpow2.f32 %v4544_v55  ;;  %4989 = vmatmul.mubr.bf16.gmra.mrb[196].mxu0 %v3441_v10  ;;  %v3227_v26 = vmul.f32 %v5496_v24, %v7147_v58 }
 0x82d   :  { %v5500_v23 = vpop.eup %5499  ;;  %v3228_v12 = vmul.f32 %v5498_v36, %v7153_v17  ;;  %5519 = vrcp.f32 %v3339_v61  ;;  %v3345_v17 = vadd.f32 1.0, %v7342_v52 }
 0x82e   :  { %v5502_v37 = vpop.eup %5501  ;;  %v4545_v7 = vmul.f32 -1.442695, %v3227_v26  ;;  %5521 = vrcp.f32 %v3340_v31 }
 0x82f   :  { %v5504_v46 = vpop.eup %5503  ;;  %v4546_v35 = vmul.f32 -1.442695, %v3228_v12  ;;  %5523 = vrcp.f32 %v3341_v60  ;;  %v3351_v28 = vadd.f32 1.0, %v5502_v37 }
 0x830   :  { %v5506_v15 = vpop.eup %5505  ;;  %5525 = vpow2.f32 %v4545_v7  ;;  %v3352_v59 = vadd.f32 1.0, %v5504_v46  ;;  %v8257_v7 = vld [vmem:[#allocation23_spill] sm:$0xff] }
 0x831   :  { %v5508_v41 = vpop.eup %5507  ;;  %5527 = vpow2.f32 %v4546_v35  ;;  %v3442_v58 = vpack.c.bf16 %v5506_v15, %v5500_v23 }
 0x832   :  { %v5510_v45 = vpop.eup %5509  ;;  %v3229_v50 = vmul.f32 %v5508_v41, %v7159_v3  ;;  %5529 = vrcp.f32 %v3342_v47  ;;  %v3349_v3 = vadd.f32 1.0, %v5486_v49 }
 0x833   :  { %v5512_v43 = vpop.eup %5511  ;;  %4992 = vmatprep.mubr.bf16.mxu0 %v3442_v58  ;;  %5531 = vrcp.f32 %v3343_v21  ;;  %v8258_v21 = vld [vmem:[#allocation25_spill] sm:$0xff]  ;;  %v8260_v58 = vld [vmem:[#allocation28_spill] sm:$0xff] }
 0x834   :  { %v5514_v13 = vpop.eup %5513  ;;  %v4547_v30 = vmul.f32 -1.442695, %v3229_v50  ;;  %v3443_v0 = vpack.c.bf16 %v5512_v43, %v5510_v45  ;;  %5533 = vrcp.f32 %v3344_v5  ;;  %v8259_v5 = vld [vmem:[#allocation26_spill] sm:$0xff]  ;;  %v8261_v45 = vld [vmem:[#allocation20_spill] sm:$0xff]  ;;  %v8262_v43 = vld [vmem:[#allocation21_spill] sm:$0xff] }
 0x835   :  { %v5516_v25 = vpop.eup %5515  ;;  %5535 = vrcp.f32 %v3345_v17  ;;  %v3353_v54 = vadd.f32 1.0, %v5514_v13 }
 0x836   :  { %v5518_v52 = vpop.eup %5517  ;;  %5537 = vpow2.f32 %v4547_v30  ;;  %4993 = vmatmul.mubr.bf16.gmra.mrb[200].mxu0 %v3443_v0  ;;  %v8263_v0 = vld [vmem:[#allocation22_spill] sm:$0xff] }
 0x837   :  { %v5520_v38 = vpop.eup %5519  ;;  %5539 = vrcp.f32 %v3346_v32  ;;  %v3354_v11 = vadd.f32 1.0, %v5518_v52  ;;  %v8264_v52 = vld [vmem:[#allocation24_spill] sm:$0xff] }
 0x838   :  { %v5522_v62 = vpop.eup %5521  ;;  %v3444_v6 = vpack.c.bf16 %v5520_v38, %v5516_v25  ;;  %5541 = vrcp.f32 %v3347_v56  ;;  %v8265_v38 = vld [vmem:[#allocation31_spill] sm:$0xff] }
 0x839   :  { %v5524_v42 = vpop.eup %5523  ;;  %5543 = vrcp.f32 %v3348_v1 }
 0x83a   :  { %v5526_v4 = vpop.eup %5525  ;;  %4996 = vmatprep.mubr.bf16.mxu0 %v3444_v6  ;;  %v3445_v14 = vpack.c.bf16 %v5524_v42, %v5522_v62  ;;  %5545 = vrcp.f32 %v3349_v3  ;;  %v8266_v62 = vld [vmem:[#allocation34_spill] sm:$0xff] }
 0x83b   :  { %v5528_v53 = vpop.eup %5527  ;;  %5547 = vrcp.f32 %v3350_v8  ;;  %v3355_v33 = vadd.f32 1.0, %v5526_v4 }
 0x83c   :  { %v5530_v2 = vpop.eup %5529  ;;  %5549 = vrcp.f32 %v3351_v28  ;;  %v3356_v20 = vadd.f32 1.0, %v5528_v53  ;;  %v8267_v28 = vld [vmem:[#allocation33_spill] sm:$0xff] }
 0x83d   :  { %v5532_v48 = vpop.eup %5531  ;;  %5551 = vrcp.f32 %v3352_v59  ;;  %v8268_v59 = vld [vmem:[#allocation35_spill] sm:$0xff]  ;;  %v8270_v53 = vld [vmem:[#allocation29_spill] sm:$0xff] }
 0x83e   :  { %v5534_v16 = vpop.eup %5533  ;;  %4997 = vmatmul.mubr.bf16.gmra.mrb[204].mxu0 %v3445_v14  ;;  %v3446_v18 = vpack.c.bf16 %v5532_v48, %v5530_v2  ;;  %5553 = vrcp.f32 %v3353_v54  ;;  %v8269_v14 = vld [vmem:[#allocation27_spill] sm:$0xff]  ;;  %v8271_v48 = vld [vmem:[#allocation30_spill] sm:$0xff] }
 0x83f   :  { %v5536_v9 = vpop.eup %5535  ;;  %5555 = vrcp.f32 %v3354_v11 }
 0x840   :  { %v5538_v19 = vpop.eup %5537  ;;  %5000 = vmatprep.mubr.bf16.mxu0 %v3446_v18  ;;  %v3447_v27 = vpack.c.bf16 %v5536_v9, %v5534_v16  ;;  %5557 = vrcp.f32 %v3355_v33  ;;  %v8272_v9 = vld [vmem:[#allocation32_spill] sm:$0xff] }
 0x841   :  { %v5540_v34 = vpop.eup %5539  ;;  %v3357_v49 = vadd.f32 1.0, %v5538_v19  ;;  %5559 = vrcp.f32 %v3356_v20 }
 0x842   :  { %v5542_v57 = vpop.eup %5541 }
 0x843   :  { %v5544_v44 = vpop.eup %5543  ;;  %v3448_v29 = vpack.c.bf16 %v5542_v57, %v5540_v34  ;;  %5561 = vrcp.f32 %v3357_v49  ;;  %v8274_v49 = vld [vmem:[#allocation42_spill] sm:$0xff] }
 0x844   :  { %v5546_v22 = vpop.eup %5545 }
 0x845   :  { %v5548_v63 = vpop.eup %5547  ;;  %v3449_v40 = vpack.c.bf16 %v5546_v22, %v5544_v44  ;;  %v8275_v44 = vld [vmem:[#allocation41_spill] sm:$0xff]  ;;  %v8276_v22 = vld [vmem:[#allocation43_spill] sm:$0xff] }
 0x846   :  { %v5550_v39 = vpop.eup %5549  ;;  %5001 = vmatmul.mubr.bf16.gmra.mrb[208].mxu0 %v3447_v27  ;;  %v8273_v27 = vld [vmem:[#allocation40_spill] sm:$0xff] }
 0x847   :  { %v5552_v61 = vpop.eup %5551  ;;  %5004 = vmatprep.mubr.bf16.mxu0 %v3448_v29  ;;  %v3450_v51 = vpack.c.bf16 %v5550_v39, %v5548_v63 }
 0x848   :  { %v5554_v55 = vpop.eup %5553 }
 0x849   :  { %v5556_v10 = vpop.eup %5555  ;;  %v3451_v31 = vpack.c.bf16 %v5554_v55, %v5552_v61  ;;  %v8278_v61 = vld [vmem:[#allocation38_spill] sm:$0xff] }
 0x84a   :  { %v5558_v24 = vpop.eup %5557 }
 0x84b   :  { %v3452_v60 = vpack.c.bf16 %v5558_v24, %v5556_v10  ;;  %v5560_v36 = vpop.eup %5559 }
 0x84d   :  { %v5562_v26 = vpop.eup %5561 }
 0x84e   :  { %5005 = vmatmul.mubr.bf16.gmra.mrb[212].mxu0 %v3449_v40  ;;  %v3453_v23 = vpack.c.bf16 %v5562_v26, %v5560_v36  ;;  %v8277_v40 = vld [vmem:[#allocation36_spill] sm:$0xff]  ;;  %v8280_v26 = vld [vmem:[#allocation39_spill] sm:$0xff] }
 0x84f   :  { %5008 = vmatprep.mubr.bf16.mxu0 %v3450_v51 }
 0x856   :  { %5009 = vmatmul.mubr.bf16.gmra.mrb[216].mxu0 %v3451_v31  ;;  %v8279_v31 = vld [vmem:[#allocation37_spill] sm:$0xff] }
 0x857   :  { %5012 = vmatprep.mubr.bf16.mxu0 %v3452_v60 }
 0x85e   :  { %5013 = vmatmul.mubr.bf16.gmra.mrb[220].mxu0 %v3453_v23 }
 0x866   :  { %v4954_v12 = vpop.f32.mrb[160].mxu0 }
 0x867   :  { %v3552_v37 = vpop.f32.mrb[161].mxu0  ;;  %v3809_v47 = vmul.f32 %v4954_v12, %v8257_v7  ;;  %v3905_v41 = vmul.f32 %v4954_v12, %v8259_v5  ;;  %v8281_v12 = vld [vmem:[#allocation48_spill] sm:$0xff] }
 0x868   :  { %v4955_v46 = vpop.f32.mrb[162].mxu0  ;;  %v3807_v50 = vmul.f32 %v3552_v37, %v8261_v45  ;;  %v3903_v56 = vmul.f32 %v3552_v37, %v8263_v0 }
 0x869   :  { %v3555_v35 = vpop.f32.mrb[163].mxu0  ;;  %3843 = vadd.xlane.f32.xlu0 %v3809_v47  ;;  %v3810_v15 = vmul.f32 %v4955_v46, %v8258_v21  ;;  %v3906_v17 = vmul.f32 %v4955_v46, %v8260_v58  ;;  %v8282_v47 = vld [vmem:[#allocation50_spill] sm:$0xff] }
 0x86a   :  { %v3808_v32 = vmul.f32 %v3555_v35, %v8262_v43  ;;  %v3904_v3 = vmul.f32 %v3555_v35, %v8264_v52  ;;  %v8283_v35 = vld [vmem:[#allocation49_spill] sm:$0xff] }
 0x86b   :  { %3845 = vadd.xlane.f32.xlu1 %v3810_v15 }
 0x86d   :  { %3939 = vadd.xlane.f32.xlu0 %v3905_v41  ;;  %v8284_v41 = vld [vmem:[#allocation51_spill] sm:$0xff] }
 0x86f   :  { %3941 = vadd.xlane.f32.xlu1 %v3906_v17 }
 0x871   :  { %3839 = vadd.xlane.f32.xlu0 %v3807_v50  ;;  %v4958_v13 = vpop.f32.mrb[164].mxu0  ;;  %v8285_v50 = vld [vmem:[#allocation44_spill] sm:$0xff] }
 0x872   :  { %v3568_v30 = vpop.f32.mrb[165].mxu0  ;;  %v3813_v8 = vmul.f32 %v4958_v13, %v8265_v38  ;;  %v3909_v42 = vmul.f32 %v4958_v13, %v8267_v28  ;;  %v8286_v13 = vld [vmem:[#allocation46_spill] sm:$0xff] }
 0x873   :  { %3841 = vadd.xlane.f32.xlu1 %v3808_v32  ;;  %v4959_v25 = vpop.f32.mrb[166].mxu0  ;;  %v3811_v54 = vmul.f32 %v3568_v30, %v8269_v14  ;;  %v3907_v16 = vmul.f32 %v3568_v30, %v8271_v48 }
 0x874   :  { %v3571_v1 = vpop.f32.mrb[167].mxu0  ;;  %v3814_v6 = vmul.f32 %v4959_v25, %v8266_v62  ;;  %v3910_v4 = vmul.f32 %v4959_v25, %v8268_v59 }
 0x875   :  { %3935 = vadd.xlane.f32.xlu0 %v3903_v56  ;;  %v3812_v11 = vmul.f32 %v3571_v1, %v8270_v53  ;;  %v3908_v19 = vmul.f32 %v3571_v1, %v8272_v9  ;;  %v8287_v1 = vld [vmem:[#allocation45_spill] sm:$0xff] }
 0x877   :  { %3937 = vadd.xlane.f32.xlu1 %v3904_v3 }
 0x879   :  { %3851 = vadd.xlane.f32.xlu0 %v3813_v8 }
 0x87b   :  { %3853 = vadd.xlane.f32.xlu1 %v3814_v6 }
 0x87d   :  { %3947 = vadd.xlane.f32.xlu0 %v3909_v42  ;;  %v8288_v42 = vld [vmem:[#allocation47_spill] sm:$0xff] }
 0x87f   :  { %3949 = vadd.xlane.f32.xlu1 %v3910_v4 }
 0x881   :  { %3847 = vadd.xlane.f32.xlu0 %v3811_v54  ;;  %v4962_v2 = vpop.f32.mrb[168].mxu0  ;;  %v8289_v54 = vld [vmem:[#allocation56_spill] sm:$0xff] }
 0x882   :  { %v3584_v33 = vpop.f32.mrb[169].mxu0  ;;  %v3817_v34 = vmul.f32 %v4962_v2, %v8273_v27  ;;  %v3913_v29 = vmul.f32 %v4962_v2, %v8275_v44  ;;  %v8290_v2 = vld [vmem:[#allocation58_spill] sm:$0xff] }
 0x883   :  { %3849 = vadd.xlane.f32.xlu1 %v3812_v11  ;;  %v4963_v18 = vpop.f32.mrb[170].mxu0  ;;  %v3815_v39 = vmul.f32 %v3584_v33, %v8277_v40  ;;  %v3911_v24 = vmul.f32 %v3584_v33, %v8279_v31 }
 0x884   :  { %v3587_v20 = vpop.f32.mrb[171].mxu0  ;;  %v3818_v57 = vmul.f32 %v4963_v18, %v8274_v49  ;;  %v3914_v63 = vmul.f32 %v4963_v18, %v8276_v22 }
 0x885   :  { %3943 = vadd.xlane.f32.xlu0 %v3907_v16  ;;  %v3816_v51 = vmul.f32 %v3587_v20, %v8278_v61  ;;  %v3912_v23 = vmul.f32 %v3587_v20, %v8280_v26  ;;  %v8291_v16 = vld [vmem:[#allocation57_spill] sm:$0xff]  ;;  %v8292_v20 = vld [vmem:[#allocation59_spill] sm:$0xff] }
 0x887   :  { %3945 = vadd.xlane.f32.xlu1 %v3908_v19 }
 0x889   :  { %3859 = vadd.xlane.f32.xlu0 %v3817_v34  ;;  %v8293_v34 = vld [vmem:[#allocation52_spill] sm:$0xff] }
 0x88b   :  { %3861 = vadd.xlane.f32.xlu1 %v3818_v57 }
 0x88d   :  { %3955 = vadd.xlane.f32.xlu0 %v3913_v29  ;;  %v8294_v29 = vld [vmem:[#allocation54_spill] sm:$0xff] }
 0x88f   :  { %3957 = vadd.xlane.f32.xlu1 %v3914_v63 }
 0x891   :  { %3855 = vadd.xlane.f32.xlu0 %v3815_v39  ;;  %v4966_v55 = vpop.f32.mrb[172].mxu0 }
 0x892   :  { %v3600_v10 = vpop.f32.mrb[173].mxu0  ;;  %v3821_v37 = vmul.f32 %v4966_v55, %v8281_v12  ;;  %v3917_v15 = vmul.f32 %v4966_v55, %v8283_v35  ;;  %v8295_v55 = vld [vmem:[#allocation53_spill] sm:$0xff] }
 0x893   :  { %3857 = vadd.xlane.f32.xlu1 %v3816_v51  ;;  %v4967_v60 = vpop.f32.mrb[174].mxu0  ;;  %v3819_v32 = vmul.f32 %v3600_v10, %v8285_v50  ;;  %v3915_v3 = vmul.f32 %v3600_v10, %v8287_v1 }
 0x894   :  { %v3603_v36 = vpop.f32.mrb[175].mxu0  ;;  %v3822_v46 = vmul.f32 %v4967_v60, %v8282_v47  ;;  %v3918_v17 = vmul.f32 %v4967_v60, %v8284_v41 }
 0x895   :  { %3951 = vadd.xlane.f32.xlu0 %v3911_v24  ;;  %v3820_v30 = vmul.f32 %v3603_v36, %v8286_v13  ;;  %v3916_v4 = vmul.f32 %v3603_v36, %v8288_v42  ;;  %v8296_v36 = vld [vmem:[#allocation55_spill] sm:$0xff] }
 0x897   :  { %3953 = vadd.xlane.f32.xlu1 %v3912_v23 }
 0x899   :  { %3867 = vadd.xlane.f32.xlu0 %v3821_v37  ;;  %v8297_v37 = vld [vmem:[#allocation64_spill] sm:$0xff] }
 0x89b   :  { %3869 = vadd.xlane.f32.xlu1 %v3822_v46 }
 0x89d   :  { %3963 = vadd.xlane.f32.xlu0 %v3917_v15  ;;  %v8298_v15 = vld [vmem:[#allocation66_spill] sm:$0xff] }
 0x89f   :  { %3965 = vadd.xlane.f32.xlu1 %v3918_v17 }
 0x8a1   :  { %3863 = vadd.xlane.f32.xlu0 %v3819_v32  ;;  %v4970_v56 = vpop.f32.mrb[176].mxu0  ;;  %v8299_v32 = vld [vmem:[#allocation65_spill] sm:$0xff] }
 0x8a2   :  { %v3616_v25 = vpop.f32.mrb[177].mxu0  ;;  %v3825_v11 = vmul.f32 %v4970_v56, %v8289_v54  ;;  %v3921_v18 = vmul.f32 %v4970_v56, %v8291_v16  ;;  %v8300_v56 = vld [vmem:[#allocation67_spill] sm:$0xff] }
 0x8a3   :  { %3865 = vadd.xlane.f32.xlu1 %v3820_v30  ;;  %v4971_v8 = vpop.f32.mrb[178].mxu0  ;;  %v3823_v57 = vmul.f32 %v3616_v25, %v8293_v34  ;;  %v3919_v10 = vmul.f32 %v3616_v25, %v8295_v55 }
 0x8a4   :  { %v3619_v6 = vpop.f32.mrb[179].mxu0  ;;  %v3826_v33 = vmul.f32 %v4971_v8, %v8290_v2  ;;  %v3922_v19 = vmul.f32 %v4971_v8, %v8292_v20  ;;  %v8301_v8 = vld [vmem:[#allocation60_spill] sm:$0xff] }
 0x8a5   :  { %3959 = vadd.xlane.f32.xlu0 %v3915_v3  ;;  %v3824_v63 = vmul.f32 %v3619_v6, %v8294_v29  ;;  %v3920_v23 = vmul.f32 %v3619_v6, %v8296_v36  ;;  %v8303_v6 = vld [vmem:[#allocation61_spill] sm:$0xff] }
 0x8a7   :  { %3961 = vadd.xlane.f32.xlu1 %v3916_v4  ;;  %v8302_v4 = vld [vmem:[#allocation62_spill] sm:$0xff] }
 0x8a9   :  { %3875 = vadd.xlane.f32.xlu0 %v3825_v11 }
 0x8ab   :  { %3877 = vadd.xlane.f32.xlu1 %v3826_v33 }
 0x8ad   :  { %3971 = vadd.xlane.f32.xlu0 %v3921_v18  ;;  %v8304_v18 = vld [vmem:[#allocation63_spill] sm:$0xff] }
 0x8af   :  { %3973 = vadd.xlane.f32.xlu1 %v3922_v19 }
 0x8b1   :  { %3871 = vadd.xlane.f32.xlu0 %v3823_v57  ;;  %v4974_v39 = vpop.f32.mrb[180].mxu0 }
 0x8b2   :  { %v3632_v51 = vpop.f32.mrb[181].mxu0  ;;  %v3829_v46 = vmul.f32 %v4974_v39, %v8297_v37  ;;  %v3925_v30 = vmul.f32 %v4974_v39, %v8299_v32 }
 0x8b3   :  { %3873 = vadd.xlane.f32.xlu1 %v3824_v63  ;;  %v4975_v24 = vpop.f32.mrb[182].mxu0  ;;  %v3827_v25 = vmul.f32 %v3632_v51, %v8301_v8  ;;  %v3923_v33 = vmul.f32 %v3632_v51, %v8303_v6  ;;  %v8305_v63 = vld [vmem:[#allocation72_spill] sm:$0xff]  ;;  %v8312_v8 = vld [vmem:[#allocation71_spill] sm:$0xff] }
 0x8b4   :  { %v3635_v60 = vpop.f32.mrb[183].mxu0  ;;  %v3830_v17 = vmul.f32 %v4975_v24, %v8298_v15  ;;  %v3926_v3 = vmul.f32 %v4975_v24, %v8300_v56  ;;  %v8306_v24 = vld [vmem:[#allocation74_spill] sm:$0xff]  ;;  %v8309_v51 = vld [vmem:[#allocation68_spill] sm:$0xff] }
 0x8b5   :  { %3967 = vadd.xlane.f32.xlu0 %v3919_v10  ;;  %v3828_v11 = vmul.f32 %v3635_v60, %v8302_v4  ;;  %v3924_v19 = vmul.f32 %v3635_v60, %v8304_v18  ;;  %v8310_v60 = vld [vmem:[#allocation70_spill] sm:$0xff] }
 0x8b7   :  { %3969 = vadd.xlane.f32.xlu1 %v3920_v23 }
 0x8b9   :  { %3883 = vadd.xlane.f32.xlu0 %v3829_v46 }
 0x8bb   :  { %3885 = vadd.xlane.f32.xlu1 %v3830_v17 }
 0x8bd   :  { %3979 = vadd.xlane.f32.xlu0 %v3925_v30  ;;  %v8307_v30 = vld [vmem:[#allocation73_spill] sm:$0xff] }
 0x8bf   :  { %3981 = vadd.xlane.f32.xlu1 %v3926_v3 }
 0x8c1   :  { %3879 = vadd.xlane.f32.xlu0 %v3827_v25  ;;  %v8308_v25 = vld [vmem:[#allocation75_spill] sm:$0xff] }
 0x8c3   :  { %3881 = vadd.xlane.f32.xlu1 %v3828_v11 }
 0x8c5   :  { %3975 = vadd.xlane.f32.xlu0 %v3923_v33 }
 0x8c7   :  { %3977 = vadd.xlane.f32.xlu1 %v3924_v19  ;;  %v8311_v19 = vld [vmem:[#allocation69_spill] sm:$0xff] }
 0x8d1   :  { %v4978_v57 = vpop.f32.mrb[184].mxu0 }
 0x8d2   :  { %v3833_v39 = vmul.f32 %v4978_v57, %v8305_v63  ;;  %v3648_v10 = vpop.f32.mrb[185].mxu0  ;;  %v3929_v3 = vmul.f32 %v4978_v57, %v8307_v30 }
 0x8d3   :  { %v4979_v23 = vpop.f32.mrb[186].mxu0  ;;  %v3831_v11 = vmul.f32 %v3648_v10, %v8309_v51  ;;  %v3927_v63 = vmul.f32 %v3648_v10, %v8311_v19  ;;  %v8317_v10 = vld [vmem:[#allocation76_spill] sm:$0xff] }
 0x8d4   :  { %v3834_v46 = vmul.f32 %v4979_v23, %v8306_v24  ;;  %v3651_v17 = vpop.f32.mrb[187].mxu0  ;;  %3891 = vadd.xlane.f32.xlu0 %v3833_v39  ;;  %v3930_v4 = vmul.f32 %v4979_v23, %v8308_v25  ;;  %v8313_v24 = vld [vmem:[#allocation80_spill] sm:$0xff]  ;;  %v8314_v23 = vld [vmem:[#allocation82_spill] sm:$0xff] }
 0x8d5   :  { %v3832_v33 = vmul.f32 %v3651_v17, %v8310_v60  ;;  %v3928_v18 = vmul.f32 %v3651_v17, %v8312_v8  ;;  %v8319_v17 = vld [vmem:[#allocation77_spill] sm:$0xff] }
 0x8d6   :  { %3893 = vadd.xlane.f32.xlu1 %v3834_v46 }
 0x8d8   :  { %3987 = vadd.xlane.f32.xlu0 %v3929_v3 }
 0x8da   :  { %3989 = vadd.xlane.f32.xlu1 %v3930_v4  ;;  %v8315_v4 = vld [vmem:[#allocation81_spill] sm:$0xff] }
 0x8dc   :  { %3887 = vadd.xlane.f32.xlu0 %v3831_v11  ;;  %v8316_v11 = vld [vmem:[#allocation83_spill] sm:$0xff] }
 0x8de   :  { %3889 = vadd.xlane.f32.xlu1 %v3832_v33 }
 0x8e0   :  { %3983 = vadd.xlane.f32.xlu0 %v3927_v63  ;;  %v8318_v63 = vld [vmem:[#allocation78_spill] sm:$0xff] }
 0x8e2   :  { %3985 = vadd.xlane.f32.xlu1 %v3928_v18 }
 0x8e7   :  { %v4982_v39 = vpop.f32.mrb[188].mxu0 }
 0x8e8   :  { %v3837_v57 = vmul.f32 %v4982_v39, %v8313_v24  ;;  %v3664_v46 = vpop.f32.mrb[189].mxu0  ;;  %v3933_v51 = vmul.f32 %v4982_v39, %v8315_v4 }
 0x8e9   :  { %v4983_v30 = vpop.f32.mrb[190].mxu0  ;;  %v3835_v33 = vmul.f32 %v3664_v46, %v8317_v10  ;;  %v3931_v24 = vmul.f32 %v3664_v46, %v8319_v17 }
 0x8ea   :  { %v3838_v3 = vmul.f32 %v4983_v30, %v8314_v23  ;;  %v3667_v25 = vpop.f32.mrb[191].mxu0  ;;  %3899 = vadd.xlane.f32.xlu0 %v3837_v57  ;;  %v3934_v60 = vmul.f32 %v4983_v30, %v8316_v11  ;;  %v8320_v23 = vld [vmem:[#allocation79_spill] sm:$0xff] }
 0x8eb   :  { %v3836_v18 = vmul.f32 %v3667_v25, %v8318_v63  ;;  %v3932_v6 = vmul.f32 %v3667_v25, %v8320_v23 }
 0x8ec   :  { %3901 = vadd.xlane.f32.xlu1 %v3838_v3 }
 0x8ee   :  { %3995 = vadd.xlane.f32.xlu0 %v3933_v51 }
 0x8f0   :  { %3997 = vadd.xlane.f32.xlu1 %v3934_v60 }
 0x8f2   :  { %3895 = vadd.xlane.f32.xlu0 %v3835_v33 }
 0x8f4   :  { %v4986_v8 = vpop.f32.mrb[192].mxu0  ;;  %3897 = vadd.xlane.f32.xlu1 %v3836_v18 }
 0x8f5   :  { %v3680_v19 = vpop.f32.mrb[193].mxu0  ;;  %v4001_v30 = vmul.f32 %v4986_v8, %v8259_v5  ;;  %v4097_v46 = vmul.f32 %v4986_v8, %v8257_v7 }
 0x8f6   :  { %v4987_v57 = vpop.f32.mrb[194].mxu0  ;;  %3991 = vadd.xlane.f32.xlu0 %v3931_v24  ;;  %v7439_v39 = vpop.xlane.xlu0 %3843  ;;  %v3999_v5 = vmul.f32 %v3680_v19, %v8263_v0  ;;  %v4095_v8 = vmul.f32 %v3680_v19, %v8261_v45 }
 0x8f7   :  { %8321 = vst [vmem:[#allocation91_spill] sm:$0xff] %v7439_v39  ;;  %v3683_v3 = vpop.f32.mrb[195].mxu0  ;;  %v4002_v60 = vmul.f32 %v4987_v57, %v8260_v58  ;;  %v4098_v24 = vmul.f32 %v4987_v57, %v8258_v21 }
 0x8f8   :  { %3993 = vadd.xlane.f32.xlu1 %v3932_v6  ;;  %v7442_v51 = vpop.xlane.xlu1 %3845  ;;  %v4096_v57 = vmul.f32 %v3683_v3, %v8262_v43 }
 0x8f9   :  { %8322 = vst [vmem:[#allocation92_spill] sm:$0xff] %v7442_v51 }
 0x8fa   :  { %4035 = vadd.xlane.f32.xlu0 %v4001_v30  ;;  %v7445_v33 = vpop.xlane.xlu0 %3939  ;;  %v4000_v30 = vmul.f32 %v3683_v3, %v8264_v52 }
 0x8fb   :  { %8323 = vst [vmem:[#allocation93_spill] sm:$0xff] %v7445_v33 }
 0x8fc   :  { %4037 = vadd.xlane.f32.xlu1 %v4002_v60  ;;  %v7448_v18 = vpop.xlane.xlu1 %3941 }
 0x8fe   :  { %4131 = vadd.xlane.f32.xlu0 %v4097_v46  ;;  %v7451_v25 = vpop.xlane.xlu0 %3839 }
 0x8ff   :  { %v4990_v39 = vpop.f32.mrb[196].mxu0 }
 0x900   :  { %v3696_v6 = vpop.f32.mrb[197].mxu0  ;;  %4133 = vadd.xlane.f32.xlu1 %v4098_v24  ;;  %v7454_v51 = vpop.xlane.xlu1 %3841  ;;  %v4005_v60 = vmul.f32 %v4990_v39, %v8267_v28  ;;  %v4101_v19 = vmul.f32 %v4990_v39, %v8265_v38 }
 0x901   :  { %8324 = vst [vmem:[#allocation94_spill] sm:$0xff] %v7454_v51  ;;  %v4991_v58 = vpop.f32.mrb[198].mxu0 }
 0x902   :  { %v3699_v33 = vpop.f32.mrb[199].mxu0  ;;  %4031 = vadd.xlane.f32.xlu0 %v3999_v5  ;;  %v7457_v7 = vpop.xlane.xlu0 %3935  ;;  %v4006_v24 = vmul.f32 %v4991_v58, %v8268_v59  ;;  %v4102_v3 = vmul.f32 %v4991_v58, %v8266_v62 }
 0x904   :  { %4033 = vadd.xlane.f32.xlu1 %v4000_v30  ;;  %v7460_v21 = vpop.xlane.xlu1 %3937 }
 0x906   :  { %4127 = vadd.xlane.f32.xlu0 %v4095_v8  ;;  %v7463_v0 = vpop.xlane.xlu0 %3851  ;;  %v4003_v8 = vmul.f32 %v3696_v6, %v8271_v48  ;;  %v4100_v48 = vmul.f32 %v3699_v33, %v8270_v53 }
 0x908   :  { %4129 = vadd.xlane.f32.xlu1 %v4096_v57  ;;  %v7466_v46 = vpop.xlane.xlu1 %3853 }
 0x909   :  { %8325 = vst [vmem:[#allocation95_spill] sm:$0xff] %v7466_v46  ;;  %v4994_v52 = vpop.f32.mrb[200].mxu0 }
 0x90a   :  { %v3712_v5 = vpop.f32.mrb[201].mxu0  ;;  %4043 = vadd.xlane.f32.xlu0 %v4005_v60  ;;  %v7469_v51 = vpop.xlane.xlu0 %3947  ;;  %v4004_v60 = vmul.f32 %v3699_v33, %v8272_v9  ;;  %v4009_v9 = vmul.f32 %v4994_v52, %v8275_v44  ;;  %v4105_v53 = vmul.f32 %v4994_v52, %v8273_v27 }
 0x90b   :  { %v4995_v45 = vpop.f32.mrb[202].mxu0 }
 0x90c   :  { %v3715_v30 = vpop.f32.mrb[203].mxu0  ;;  %4045 = vadd.xlane.f32.xlu1 %v4006_v24  ;;  %v7472_v43 = vpop.xlane.xlu1 %3949  ;;  %v4099_v24 = vmul.f32 %v3696_v6, %v8269_v14 }
 0x90e   :  { %4139 = vadd.xlane.f32.xlu0 %v4101_v19  ;;  %v7475_v28 = vpop.xlane.xlu0 %3847 }
 0x910   :  { %4141 = vadd.xlane.f32.xlu1 %v4102_v3  ;;  %v7478_v59 = vpop.xlane.xlu1 %3849 }
 0x911   :  { %8326 = vst [vmem:[#allocation96_spill] sm:$0xff] %v7478_v59  ;;  %v4998_v57 = vpop.f32.mrb[204].mxu0  ;;  %v4010_v59 = vmul.f32 %v4995_v45, %v8276_v22  ;;  %v4007_v22 = vmul.f32 %v3712_v5, %v8279_v31 }
 0x912   :  { %v7481_v46 = vpop.f32.mrb[205].mxu0  ;;  %4039 = vadd.xlane.f32.xlu0 %v4003_v8  ;;  %v7483_v38 = vpop.xlane.xlu0 %3943 }
 0x913   :  { %v4999_v39 = vpop.f32.mrb[206].mxu0 }
 0x914   :  { %v7486_v62 = vpop.f32.mrb[207].mxu0  ;;  %4041 = vadd.xlane.f32.xlu1 %v4004_v60  ;;  %v7488_v58 = vpop.xlane.xlu1 %3945 }
 0x916   :  { %4135 = vadd.xlane.f32.xlu0 %v4099_v24  ;;  %v7491_v19 = vpop.xlane.xlu0 %3859  ;;  %v4106_v24 = vmul.f32 %v4995_v45, %v8274_v49  ;;  %v4103_v49 = vmul.f32 %v3712_v5, %v8277_v40 }
 0x917   :  { %8327 = vst [vmem:[#allocation84_spill] sm:$0xff] %v7491_v19  ;;  %v4008_v19 = vmul.f32 %v3715_v30, %v8280_v26  ;;  %v4013_v26 = vmul.f32 %v4998_v57, %v8283_v35 }
 0x918   :  { %4137 = vadd.xlane.f32.xlu1 %v4100_v48  ;;  %v7494_v3 = vpop.xlane.xlu1 %3861 }
 0x919   :  { %8328 = vst [vmem:[#allocation85_spill] sm:$0xff] %v7494_v3  ;;  %v7496_v8 = vpop.f32.mrb[208].mxu0 }
 0x91a   :  { %v7499_v14 = vpop.f32.mrb[209].mxu0  ;;  %4051 = vadd.xlane.f32.xlu0 %v4009_v9  ;;  %v7501_v6 = vpop.xlane.xlu0 %3955 }
 0x91b   :  { %v7503_v60 = vpop.f32.mrb[210].mxu0 }
 0x91c   :  { %v7506_v33 = vpop.f32.mrb[211].mxu0  ;;  %4053 = vadd.xlane.f32.xlu1 %v4010_v59  ;;  %v7508_v44 = vpop.xlane.xlu1 %3957 }
 0x91e   :  { %4147 = vadd.xlane.f32.xlu0 %v4105_v53  ;;  %v7511_v48 = vpop.xlane.xlu0 %3855  ;;  %v4104_v53 = vmul.f32 %v3715_v30, %v8278_v61  ;;  %v4109_v61 = vmul.f32 %v4998_v57, %v8281_v12  ;;  %v4012_v12 = vmul.f32 %v7486_v62, %v8288_v42 }
 0x91f   :  { %8329 = vst [vmem:[#allocation86_spill] sm:$0xff] %v7511_v48  ;;  %v4014_v48 = vmul.f32 %v4999_v39, %v8284_v41  ;;  %v4011_v41 = vmul.f32 %v7481_v46, %v8287_v1 }
 0x920   :  { %4149 = vadd.xlane.f32.xlu1 %v4106_v24  ;;  %v7514_v9 = vpop.xlane.xlu1 %3857 }
 0x921   :  { %8330 = vst [vmem:[#allocation87_spill] sm:$0xff] %v7514_v9  ;;  %v7516_v3 = vpop.f32.mrb[212].mxu0 }
 0x922   :  { %v7519_v27 = vpop.f32.mrb[213].mxu0  ;;  %4047 = vadd.xlane.f32.xlu0 %v4007_v22  ;;  %v7521_v52 = vpop.xlane.xlu0 %3951 }
 0x923   :  { %v7523_v59 = vpop.f32.mrb[214].mxu0 }
 0x924   :  { %v7526_v45 = vpop.f32.mrb[215].mxu0  ;;  %4049 = vadd.xlane.f32.xlu1 %v4008_v19  ;;  %v7528_v31 = vpop.xlane.xlu1 %3953 }
 0x926   :  { %4143 = vadd.xlane.f32.xlu0 %v4103_v49  ;;  %v7531_v24 = vpop.xlane.xlu0 %3867  ;;  %v4110_v49 = vmul.f32 %v4999_v39, %v8282_v47  ;;  %v4107_v39 = vmul.f32 %v7481_v46, %v8285_v50 }
 0x928   :  { %4145 = vadd.xlane.f32.xlu1 %v4104_v53  ;;  %v7534_v22 = vpop.xlane.xlu1 %3869 }
 0x929   :  { %8331 = vst [vmem:[#allocation88_spill] sm:$0xff] %v7534_v22  ;;  %v7536_v9 = vpop.f32.mrb[216].mxu0 }
 0x92a   :  { %v7539_v40 = vpop.f32.mrb[217].mxu0  ;;  %4059 = vadd.xlane.f32.xlu0 %v4013_v26  ;;  %v7541_v5 = vpop.xlane.xlu0 %3963 }
 0x92b   :  { %v7543_v19 = vpop.f32.mrb[218].mxu0 }
 0x92c   :  { %v7546_v30 = vpop.f32.mrb[219].mxu0  ;;  %4061 = vadd.xlane.f32.xlu1 %v4014_v48  ;;  %v7548_v35 = vpop.xlane.xlu1 %3965 }
 0x92e   :  { %4155 = vadd.xlane.f32.xlu0 %v4109_v61  ;;  %v7551_v53 = vpop.xlane.xlu0 %3863 }
 0x92f   :  { %8332 = vst [vmem:[#allocation89_spill] sm:$0xff] %v7551_v53  ;;  %v4018_v53 = vmul.f32 %v7503_v60, %v8292_v20  ;;  %v4015_v20 = vmul.f32 %v7499_v14, %v8295_v55  ;;  %v4112_v55 = vmul.f32 %v7506_v33, %v8294_v29 }
 0x930   :  { %4157 = vadd.xlane.f32.xlu1 %v4110_v49  ;;  %v7555_v26 = vpop.xlane.xlu1 %3865  ;;  %v4108_v49 = vmul.f32 %v7486_v62, %v8286_v13 }
 0x931   :  { %8333 = vst [vmem:[#allocation90_spill] sm:$0xff] %v7555_v26  ;;  %v7557_v22 = vpop.f32.mrb[220].mxu0 }
 0x932   :  { %v7561_v57 = vpop.f32.mrb[221].mxu0  ;;  %4055 = vadd.xlane.f32.xlu0 %v4011_v41  ;;  %v7563_v48 = vpop.xlane.xlu0 %3959  ;;  %v4017_v41 = vmul.f32 %v7496_v8, %v8291_v16  ;;  %v4114_v16 = vmul.f32 %v7503_v60, %v8290_v2 }
 0x933   :  { %v7565_v47 = vpop.f32.mrb[222].mxu0 }
 0x934   :  { %v7569_v61 = vpop.f32.mrb[223].mxu0  ;;  %4057 = vadd.xlane.f32.xlu1 %v4012_v12  ;;  %v7571_v1 = vpop.xlane.xlu1 %3961  ;;  %v4113_v12 = vmul.f32 %v7496_v8, %v8289_v54 }
 0x936   :  { %4151 = vadd.xlane.f32.xlu0 %v4107_v39  ;;  %v3876_v42 = vpop.xlane.xlu0 %3875 }
 0x938   :  { %4153 = vadd.xlane.f32.xlu1 %v4108_v49  ;;  %v3878_v26 = vpop.xlane.xlu1 %3877 }
 0x93a   :  { %4067 = vadd.xlane.f32.xlu0 %v4017_v41  ;;  %v3972_v50 = vpop.xlane.xlu0 %3971 }
 0x93b   :  { %v7580_v46 = vsel %vm4191_vm0, %v3876_v42, %v3972_v50  ;;  %v4016_v42 = vmul.f32 %v7506_v33, %v8296_v36  ;;  %v4021_v36 = vmul.f32 %v7516_v3, %v8299_v32  ;;  %v4022_v50 = vmul.f32 %v7523_v59, %v8300_v56 }
 0x93c   :  { %4069 = vadd.xlane.f32.xlu1 %v4018_v53  ;;  %v3974_v13 = vpop.xlane.xlu1 %3973  ;;  %v4111_v53 = vmul.f32 %v7499_v14, %v8293_v34  ;;  %v4118_v32 = vmul.f32 %v7523_v59, %v8298_v15 }
 0x93d   :  { %v7585_v62 = vsel %vm4191_vm0, %v3878_v26, %v3974_v13 }
 0x93e   :  { %4163 = vadd.xlane.f32.xlu0 %v4113_v12  ;;  %v3872_v39 = vpop.xlane.xlu0 %3871  ;;  %v4117_v12 = vmul.f32 %v7516_v3, %v8297_v37 }
 0x940   :  { %4165 = vadd.xlane.f32.xlu1 %v4114_v16  ;;  %v3874_v49 = vpop.xlane.xlu1 %3873  ;;  %v8334_v16 = vld [vmem:[#allocation61_spill] sm:$0xff] }
 0x941   :  { %v4019_v56 = vmul.f32 %v7519_v27, %v8334_v16 }
 0x942   :  { %4063 = vadd.xlane.f32.xlu0 %v4015_v20  ;;  %v3968_v54 = vpop.xlane.xlu0 %3967  ;;  %v8335_v20 = vld [vmem:[#allocation63_spill] sm:$0xff] }
 0x943   :  { %v7594_v8 = vsel %vm4191_vm0, %v3872_v39, %v3968_v54 }
 0x944   :  { %4065 = vadd.xlane.f32.xlu1 %v4016_v42  ;;  %v3970_v2 = vpop.xlane.xlu1 %3969  ;;  %v8336_v42 = vld [vmem:[#allocation60_spill] sm:$0xff] }
 0x945   :  { %v7599_v60 = vsel %vm4191_vm0, %v3874_v49, %v3970_v2  ;;  %v4020_v49 = vmul.f32 %v7526_v45, %v8335_v20  ;;  %v4115_v54 = vmul.f32 %v7519_v27, %v8336_v42 }
 0x946   :  { %4159 = vadd.xlane.f32.xlu0 %v4111_v53  ;;  %v3884_v26 = vpop.xlane.xlu0 %3883  ;;  %v8337_v53 = vld [vmem:[#allocation62_spill] sm:$0xff] }
 0x947   :  { %v4116_v2 = vmul.f32 %v7526_v45, %v8337_v53 }
 0x948   :  { %4161 = vadd.xlane.f32.xlu1 %v4112_v55  ;;  %v3886_v41 = vpop.xlane.xlu1 %3885  ;;  %v8338_v55 = vld [vmem:[#allocation73_spill] sm:$0xff] }
 0x94a   :  { %4075 = vadd.xlane.f32.xlu0 %v4021_v36  ;;  %v3980_v34 = vpop.xlane.xlu0 %3979  ;;  %v8339_v36 = vld [vmem:[#allocation75_spill] sm:$0xff] }
 0x94b   :  { %v7608_v14 = vsel %vm4191_vm0, %v3884_v26, %v3980_v34  ;;  %v4025_v26 = vmul.f32 %v7536_v9, %v8338_v55  ;;  %v8341_v34 = vld [vmem:[#allocation74_spill] sm:$0xff] }
 0x94c   :  { %4077 = vadd.xlane.f32.xlu1 %v4022_v50  ;;  %v3982_v29 = vpop.xlane.xlu1 %3981  ;;  %v8340_v50 = vld [vmem:[#allocation72_spill] sm:$0xff] }
 0x94d   :  { %v7613_v33 = vsel %vm4191_vm0, %v3886_v41, %v3982_v29  ;;  %v4026_v41 = vmul.f32 %v7543_v19, %v8339_v36  ;;  %v4121_v27 = vmul.f32 %v7536_v9, %v8340_v50  ;;  %v8342_v29 = vld [vmem:[#allocation69_spill] sm:$0xff]  ;;  %v8346_v50 = vld [vmem:[#allocation80_spill] sm:$0xff] }
 0x94e   :  { %4171 = vadd.xlane.f32.xlu0 %v4117_v12  ;;  %v3880_v13 = vpop.xlane.xlu0 %3879  ;;  %v4122_v12 = vmul.f32 %v7543_v19, %v8341_v34  ;;  %v4023_v45 = vmul.f32 %v7539_v40, %v8342_v29 }
 0x950   :  { %4173 = vadd.xlane.f32.xlu1 %v4118_v32  ;;  %v3882_v39 = vpop.xlane.xlu1 %3881 }
 0x952   :  { %4071 = vadd.xlane.f32.xlu0 %v4019_v56  ;;  %v3976_v37 = vpop.xlane.xlu0 %3975 }
 0x953   :  { %v7622_v3 = vsel %vm4191_vm0, %v3880_v13, %v3976_v37  ;;  %v8343_v13 = vld [vmem:[#allocation71_spill] sm:$0xff] }
 0x954   :  { %4073 = vadd.xlane.f32.xlu1 %v4020_v49  ;;  %v3978_v15 = vpop.xlane.xlu1 %3977  ;;  %v4024_v16 = vmul.f32 %v7546_v30, %v8343_v13  ;;  %v8345_v49 = vld [vmem:[#allocation70_spill] sm:$0xff] }
 0x955   :  { %v7627_v59 = vsel %vm4191_vm0, %v3882_v39, %v3978_v15  ;;  %v8344_v39 = vld [vmem:[#allocation68_spill] sm:$0xff]  ;;  %v4120_v37 = vmul.f32 %v7546_v30, %v8345_v49  ;;  %v4027_v30 = vmul.f32 %v7561_v57, %v8319_v17  ;;  %v4124_v17 = vmul.f32 %v7569_v61, %v8318_v63 }
 0x956   :  { %4167 = vadd.xlane.f32.xlu0 %v4115_v54  ;;  %v4119_v20 = vmul.f32 %v7539_v40, %v8344_v39  ;;  %v4029_v54 = vmul.f32 %v7557_v22, %v8315_v4  ;;  %v4030_v40 = vmul.f32 %v7565_v47, %v8316_v11 }
 0x958   :  { %4169 = vadd.xlane.f32.xlu1 %v4116_v2 }
 0x95a   :  { %4083 = vadd.xlane.f32.xlu0 %v4025_v26  ;;  %v4028_v26 = vmul.f32 %v7569_v61, %v8320_v23  ;;  %v8347_v23 = vld [vmem:[#allocation82_spill] sm:$0xff] }
 0x95b   :  { %v4126_v34 = vmul.f32 %v7565_v47, %v8347_v23 }
 0x95c   :  { %4085 = vadd.xlane.f32.xlu1 %v4026_v41  ;;  %v4123_v41 = vmul.f32 %v7561_v57, %v8317_v10 }
 0x95e   :  { %4179 = vadd.xlane.f32.xlu0 %v4121_v27  ;;  %v4125_v27 = vmul.f32 %v7557_v22, %v8346_v50  ;;  %v8351_v50 = vld [vmem:[#allocation94_spill] sm:$0xff] }
 0x960   :  { %4181 = vadd.xlane.f32.xlu1 %v4122_v12 }
 0x961   :  { %v3892_v32 = vpop.xlane.xlu0 %3891 }
 0x962   :  { %4079 = vadd.xlane.f32.xlu0 %v4023_v45 }
 0x963   :  { %v3894_v56 = vpop.xlane.xlu1 %3893 }
 0x964   :  { %4081 = vadd.xlane.f32.xlu1 %v4024_v16 }
 0x965   :  { %v3988_v9 = vpop.xlane.xlu0 %3987 }
 0x966   :  { %4175 = vadd.xlane.f32.xlu0 %v4119_v20  ;;  %v7648_v19 = vsel %vm4191_vm0, %v3892_v32, %v3988_v9  ;;  %v8348_v20 = vld [vmem:[#allocation93_spill] sm:$0xff]  ;;  %v8349_v9 = vld [vmem:[#allocation91_spill] sm:$0xff] }
 0x967   :  { %v3990_v42 = vpop.xlane.xlu1 %3989  ;;  %v4194_v49 = vsel %vm4191_vm0, %v8349_v9, %v8348_v20 }
 0x968   :  { %4177 = vadd.xlane.f32.xlu1 %v4120_v37  ;;  %v7653_v15 = vsel %vm4191_vm0, %v3894_v56, %v3990_v42 }
 0x969   :  { %v3888_v53 = vpop.xlane.xlu0 %3887 }
 0x96a   :  { %4091 = vadd.xlane.f32.xlu0 %v4029_v54  ;;  %v8350_v54 = vld [vmem:[#allocation92_spill] sm:$0xff] }
 0x96b   :  { %v3890_v2 = vpop.xlane.xlu1 %3889 }
 0x96c   :  { %4093 = vadd.xlane.f32.xlu1 %v4030_v40 }
 0x96d   :  { %v3984_v55 = vpop.xlane.xlu0 %3983 }
 0x96e   :  { %4087 = vadd.xlane.f32.xlu0 %v4027_v30  ;;  %v7662_v4 = vsel %vm4191_vm0, %v3888_v53, %v3984_v55  ;;  %v4195_v53 = vsel %vm4191_vm0, %v8350_v54, %v7448_v18  ;;  %v4192_v18 = vsel %vm4191_vm0, %v7451_v25, %v7457_v7 }
 0x96f   :  { %v3986_v36 = vpop.xlane.xlu1 %3985 }
 0x970   :  { %4089 = vadd.xlane.f32.xlu1 %v4028_v26  ;;  %v7667_v11 = vsel %vm4191_vm0, %v3890_v2, %v3986_v36 }
 0x972   :  { %4183 = vadd.xlane.f32.xlu0 %v4123_v41 }
 0x974   :  { %4185 = vadd.xlane.f32.xlu1 %v4124_v17 }
 0x976   :  { %4187 = vadd.xlane.f32.xlu0 %v4125_v27  ;;  %v4193_v27 = vsel %vm4191_vm0, %v8351_v50, %v7460_v21  ;;  %v4198_v21 = vsel %vm4191_vm0, %v7463_v0, %v7469_v51 }
 0x977   :  { %v3900_v12 = vpop.xlane.xlu0 %3899 }
 0x978   :  { %4189 = vadd.xlane.f32.xlu1 %v4126_v34 }
 0x979   :  { %v3902_v29 = vpop.xlane.xlu1 %3901 }
 0x97b   :  { %v3996_v10 = vpop.xlane.xlu0 %3995 }
 0x97c   :  { %v7676_v57 = vsel %vm4191_vm0, %v3900_v12, %v3996_v10 }
 0x97d   :  { %v3998_v45 = vpop.xlane.xlu1 %3997 }
 0x97e   :  { %v7679_v32 = vsel %vm4191_vm0, %v3902_v29, %v3998_v45 }
 0x97f   :  { %v3896_v63 = vpop.xlane.xlu0 %3895 }
 0x981   :  { %v3898_v61 = vpop.xlane.xlu1 %3897 }
 0x983   :  { %v3992_v13 = vpop.xlane.xlu0 %3991 }
 0x984   :  { %v7682_v22 = vsel %vm4191_vm0, %v3896_v63, %v3992_v13  ;;  %v8352_v63 = vld [vmem:[#allocation95_spill] sm:$0xff] }
 0x985   :  { %v3994_v16 = vpop.xlane.xlu1 %3993 }
 0x986   :  { %v7685_v47 = vsel %vm4191_vm0, %v3898_v61, %v3994_v16  ;;  %v4199_v61 = vsel %vm4191_vm0, %v8352_v63, %v7472_v43  ;;  %v4196_v43 = vsel %vm4191_vm0, %v7475_v28, %v7483_v38 }
 0x987   :  { %v4036_v56 = vpop.xlane.xlu0 %4035 }
 0x988   :  { %v4227_v37 = vsel %vm4224_vm1, %v4194_v49, %v4036_v56  ;;  %v8353_v49 = vld [vmem:[#allocation96_spill] sm:$0xff] }
 0x989   :  { %v4038_v39 = vpop.xlane.xlu1 %4037 }
 0x98a   :  { %v4228_v2 = vsel %vm4224_vm1, %v4195_v53, %v4038_v39 }
 0x98b   :  { %v4132_v42 = vpop.xlane.xlu0 %4131 }
 0x98c   :  { %v4260_v40 = vsel %vm4257_vm2, %v4227_v37, %v4132_v42  ;;  %v4197_v37 = vsel %vm4191_vm0, %v8353_v49, %v7488_v58  ;;  %v8354_v58 = vld [vmem:[#allocation84_spill] sm:$0xff] }
 0x98d   :  { %4293 = vst.msk [vmem:[%s7952_s9 + $0x10] sm:$0xff] %vm4290_vm3, %v4260_v40  ;;  %v4134_v30 = vpop.xlane.xlu1 %4133 }
 0x98e   :  { %v4261_v55 = vsel %vm4257_vm2, %v4228_v2, %v4134_v30  ;;  %v4202_v2 = vsel %vm4191_vm0, %v8354_v58, %v7501_v6 }
 0x98f   :  { %4294 = vst.msk [vmem:[%s7952_s9 + $0x18] sm:$0xff] %vm4290_vm3, %v4261_v55  ;;  %v4032_v26 = vpop.xlane.xlu0 %4031 }
 0x990   :  { %v4225_v41 = vsel %vm4224_vm1, %v4192_v18, %v4032_v26  ;;  %v8355_v26 = vld [vmem:[#allocation85_spill] sm:$0xff] }
 0x991   :  { %v4034_v36 = vpop.xlane.xlu1 %4033 }
 0x992   :  { %v4226_v34 = vsel %vm4224_vm1, %v4193_v27, %v4034_v36  ;;  %v4203_v36 = vsel %vm4191_vm0, %v8355_v26, %v7508_v44  ;;  %v8356_v44 = vld [vmem:[#allocation86_spill] sm:$0xff] }
 0x993   :  { %v4128_v17 = vpop.xlane.xlu0 %4127 }
 0x994   :  { %v4258_v23 = vsel %vm4257_vm2, %v4225_v41, %v4128_v17 }
 0x995   :  { %4291 = vst.msk [vmem:[%s7952_s9] sm:$0xff] %vm4290_vm3, %v4258_v23  ;;  %v4130_v12 = vpop.xlane.xlu1 %4129  ;;  %v4200_v23 = vsel %vm4191_vm0, %v8356_v44, %v7521_v52 }
 0x996   :  { %v4259_v29 = vsel %vm4257_vm2, %v4226_v34, %v4130_v12 }
 0x997   :  { %4292 = vst.msk [vmem:[%s7952_s9 + $0x8] sm:$0xff] %vm4290_vm3, %v4259_v29  ;;  %v4044_v25 = vpop.xlane.xlu0 %4043  ;;  %v8357_v29 = vld [vmem:[#allocation87_spill] sm:$0xff] }
 0x998   :  { %v4231_v10 = vsel %vm4224_vm1, %v4198_v21, %v4044_v25  ;;  %v4201_v25 = vsel %vm4191_vm0, %v8357_v29, %v7528_v31  ;;  %v4206_v31 = vsel %vm4191_vm0, %v7531_v24, %v7541_v5 }
 0x999   :  { %v4046_v7 = vpop.xlane.xlu1 %4045 }
 0x99a   :  { %v4232_v16 = vsel %vm4224_vm1, %v4199_v61, %v4046_v7 }
 0x99b   :  { %v4140_v45 = vpop.xlane.xlu0 %4139 }
 0x99c   :  { %v4264_v13 = vsel %vm4257_vm2, %v4231_v10, %v4140_v45 }
 0x99d   :  { %4297 = vst.msk [vmem:[%s7952_s9 + $0x30] sm:$0xff] %vm4290_vm3, %v4264_v13  ;;  %v4142_v56 = vpop.xlane.xlu1 %4141 }
 0x99e   :  { %v4265_v39 = vsel %vm4257_vm2, %v4232_v16, %v4142_v56  ;;  %v8358_v16 = vld [vmem:[#allocation88_spill] sm:$0xff] }
 0x99f   :  { %4298 = vst.msk [vmem:[%s7952_s9 + $0x38] sm:$0xff] %vm4290_vm3, %v4265_v39  ;;  %v4040_v51 = vpop.xlane.xlu0 %4039  ;;  %v4207_v56 = vsel %vm4191_vm0, %v8358_v16, %v7548_v35  ;;  %v8359_v35 = vld [vmem:[#allocation89_spill] sm:$0xff] }
 0x9a0   :  { %v4229_v20 = vsel %vm4224_vm1, %v4196_v43, %v4040_v51 }
 0x9a1   :  { %v4042_v0 = vpop.xlane.xlu1 %4041 }
 0x9a2   :  { %v4230_v54 = vsel %vm4224_vm1, %v4197_v37, %v4042_v0  ;;  %v8360_v37 = vld [vmem:[#allocation90_spill] sm:$0xff] }
 0x9a3   :  { %v4136_v9 = vpop.xlane.xlu0 %4135 }
 0x9a4   :  { %v4262_v42 = vsel %vm4257_vm2, %v4229_v20, %v4136_v9  ;;  %v4204_v20 = vsel %vm4191_vm0, %v8359_v35, %v7563_v48 }
 0x9a5   :  { %4295 = vst.msk [vmem:[%s7952_s9 + $0x20] sm:$0xff] %vm4290_vm3, %v4262_v42  ;;  %v4138_v53 = vpop.xlane.xlu1 %4137  ;;  %v4205_v42 = vsel %vm4191_vm0, %v8360_v37, %v7571_v1 }
 0x9a6   :  { %v4263_v40 = vsel %vm4257_vm2, %v4230_v54, %v4138_v53 }
 0x9a7   :  { %4296 = vst.msk [vmem:[%s7952_s9 + $0x28] sm:$0xff] %vm4290_vm3, %v4263_v40  ;;  %v4052_v28 = vpop.xlane.xlu0 %4051 }
 0x9a8   :  { %v4235_v30 = vsel %vm4224_vm1, %v4202_v2, %v4052_v28 }
 0x9a9   :  { %v4054_v38 = vpop.xlane.xlu1 %4053 }
 0x9aa   :  { %v4236_v41 = vsel %vm4224_vm1, %v4203_v36, %v4054_v38 }
 0x9ab   :  { %v4148_v55 = vpop.xlane.xlu0 %4147 }
 0x9ac   :  { %v4268_v18 = vsel %vm4257_vm2, %v4235_v30, %v4148_v55 }
 0x9ad   :  { %4301 = vst.msk [vmem:[%s7952_s9 + $0x50] sm:$0xff] %vm4290_vm3, %v4268_v18  ;;  %v4150_v17 = vpop.xlane.xlu1 %4149 }
 0x9ae   :  { %v4269_v50 = vsel %vm4257_vm2, %v4236_v41, %v4150_v17 }
 0x9af   :  { %4302 = vst.msk [vmem:[%s7952_s9 + $0x58] sm:$0xff] %vm4290_vm3, %v4269_v50  ;;  %v4048_v6 = vpop.xlane.xlu0 %4047 }
 0x9b0   :  { %v4233_v34 = vsel %vm4224_vm1, %v4200_v23, %v4048_v6 }
 0x9b1   :  { %v4050_v27 = vpop.xlane.xlu1 %4049 }
 0x9b2   :  { %v4234_v21 = vsel %vm4224_vm1, %v4201_v25, %v4050_v27 }
 0x9b3   :  { %v4144_v12 = vpop.xlane.xlu0 %4143 }
 0x9b4   :  { %v4266_v7 = vsel %vm4257_vm2, %v4233_v34, %v4144_v12 }
 0x9b5   :  { %4299 = vst.msk [vmem:[%s7952_s9 + $0x40] sm:$0xff] %vm4290_vm3, %v4266_v7  ;;  %v4146_v10 = vpop.xlane.xlu1 %4145 }
 0x9b6   :  { %v4267_v45 = vsel %vm4257_vm2, %v4234_v21, %v4146_v10 }
 0x9b7   :  { %4300 = vst.msk [vmem:[%s7952_s9 + $0x48] sm:$0xff] %vm4290_vm3, %v4267_v45  ;;  %v4060_v52 = vpop.xlane.xlu0 %4059 }
 0x9b8   :  { %v4239_v61 = vsel %vm4224_vm1, %v4206_v31, %v4060_v52 }
 0x9b9   :  { %v4062_v63 = vpop.xlane.xlu1 %4061 }
 0x9ba   :  { %v4240_v51 = vsel %vm4224_vm1, %v4207_v56, %v4062_v63 }
 0x9bb   :  { %v4156_v13 = vpop.xlane.xlu0 %4155 }
 0x9bc   :  { %v4272_v39 = vsel %vm4257_vm2, %v4239_v61, %v4156_v13 }
 0x9bd   :  { %4305 = vst.msk [vmem:[%s7952_s9 + $0x70] sm:$0xff] %vm4290_vm3, %v4272_v39  ;;  %v4158_v0 = vpop.xlane.xlu1 %4157 }
 0x9be   :  { %v4273_v43 = vsel %vm4257_vm2, %v4240_v51, %v4158_v0 }
 0x9bf   :  { %4306 = vst.msk [vmem:[%s7952_s9 + $0x78] sm:$0xff] %vm4290_vm3, %v4273_v43  ;;  %v4056_v24 = vpop.xlane.xlu0 %4055 }
 0x9c0   :  { %v4237_v9 = vsel %vm4224_vm1, %v4204_v20, %v4056_v24 }
 0x9c1   :  { %v4058_v5 = vpop.xlane.xlu1 %4057 }
 0x9c2   :  { %v4238_v53 = vsel %vm4224_vm1, %v4205_v42, %v4058_v5 }
 0x9c3   :  { %v4152_v49 = vpop.xlane.xlu0 %4151 }
 0x9c4   :  { %v4270_v54 = vsel %vm4257_vm2, %v4237_v9, %v4152_v49 }
 0x9c5   :  { %4303 = vst.msk [vmem:[%s7952_s9 + $0x60] sm:$0xff] %vm4290_vm3, %v4270_v54  ;;  %v4154_v40 = vpop.xlane.xlu1 %4153 }
 0x9c6   :  { %v4271_v28 = vsel %vm4257_vm2, %v4238_v53, %v4154_v40 }
 0x9c7   :  { %4304 = vst.msk [vmem:[%s7952_s9 + $0x68] sm:$0xff] %vm4290_vm3, %v4271_v28  ;;  %v4068_v48 = vpop.xlane.xlu0 %4067 }
 0x9c8   :  { %v4243_v1 = vsel %vm4224_vm1, %v7580_v46, %v4068_v48 }
 0x9c9   :  { %v4070_v38 = vpop.xlane.xlu1 %4069 }
 0x9ca   :  { %v4244_v30 = vsel %vm4224_vm1, %v7585_v62, %v4070_v38 }
 0x9cb   :  { %v4164_v58 = vpop.xlane.xlu0 %4163 }
 0x9cc   :  { %v4276_v2 = vsel %vm4257_vm2, %v4243_v1, %v4164_v58 }
 0x9cd   :  { %4309 = vst.msk [vmem:[%s7952_s9 + $0x90] sm:$0xff] %vm4290_vm3, %v4276_v2  ;;  %v4166_v55 = vpop.xlane.xlu1 %4165 }
 0x9ce   :  { %v4277_v26 = vsel %vm4257_vm2, %v4244_v30, %v4166_v55 }
 0x9cf   :  { %4310 = vst.msk [vmem:[%s7952_s9 + $0x98] sm:$0xff] %vm4290_vm3, %v4277_v26  ;;  %v4064_v46 = vpop.xlane.xlu0 %4063 }
 0x9d0   :  { %v4241_v18 = vsel %vm4224_vm1, %v7594_v8, %v4064_v46 }
 0x9d1   :  { %v4066_v36 = vpop.xlane.xlu1 %4065 }
 0x9d2   :  { %v4242_v17 = vsel %vm4224_vm1, %v7599_v60, %v4066_v36 }
 0x9d3   :  { %v4160_v41 = vpop.xlane.xlu0 %4159 }
 0x9d4   :  { %v4274_v62 = vsel %vm4257_vm2, %v4241_v18, %v4160_v41 }
 0x9d5   :  { %4307 = vst.msk [vmem:[%s7952_s9 + $0x80] sm:$0xff] %vm4290_vm3, %v4274_v62  ;;  %v4162_v50 = vpop.xlane.xlu1 %4161 }
 0x9d6   :  { %v4275_v6 = vsel %vm4257_vm2, %v4242_v17, %v4162_v50 }
 0x9d7   :  { %4308 = vst.msk [vmem:[%s7952_s9 + $0x88] sm:$0xff] %vm4290_vm3, %v4275_v6  ;;  %v4076_v8 = vpop.xlane.xlu0 %4075 }
 0x9d8   :  { %v4247_v44 = vsel %vm4224_vm1, %v7608_v14, %v4076_v8 }
 0x9d9   :  { %v4078_v27 = vpop.xlane.xlu1 %4077 }
 0x9da   :  { %v4248_v34 = vsel %vm4224_vm1, %v7613_v33, %v4078_v27 }
 0x9db   :  { %v4172_v23 = vpop.xlane.xlu0 %4171 }
 0x9dc   :  { %v4280_v60 = vsel %vm4257_vm2, %v4247_v44, %v4172_v23 }
 0x9dd   :  { %4313 = vst.msk [vmem:[%s7952_s9 + $0xb0] sm:$0xff] %vm4290_vm3, %v4280_v60  ;;  %v4174_v12 = vpop.xlane.xlu1 %4173 }
 0x9de   :  { %v4281_v29 = vsel %vm4257_vm2, %v4248_v34, %v4174_v12 }
 0x9df   :  { %4314 = vst.msk [vmem:[%s7952_s9 + $0xb8] sm:$0xff] %vm4290_vm3, %v4281_v29  ;;  %v4072_v14 = vpop.xlane.xlu0 %4071 }
 0x9e0   :  { %v4245_v7 = vsel %vm4224_vm1, %v7622_v3, %v4072_v14 }
 0x9e1   :  { %v4074_v25 = vpop.xlane.xlu1 %4073 }
 0x9e2   :  { %v4246_v10 = vsel %vm4224_vm1, %v7627_v59, %v4074_v25 }
 0x9e3   :  { %v4168_v21 = vpop.xlane.xlu0 %4167 }
 0x9e4   :  { %v4278_v33 = vsel %vm4257_vm2, %v4245_v7, %v4168_v21 }
 0x9e5   :  { %4311 = vst.msk [vmem:[%s7952_s9 + $0xa0] sm:$0xff] %vm4290_vm3, %v4278_v33  ;;  %v4170_v45 = vpop.xlane.xlu1 %4169 }
 0x9e6   :  { %v4279_v52 = vsel %vm4257_vm2, %v4246_v10, %v4170_v45 }
 0x9e7   :  { %4312 = vst.msk [vmem:[%s7952_s9 + $0xa8] sm:$0xff] %vm4290_vm3, %v4279_v52  ;;  %v4084_v3 = vpop.xlane.xlu0 %4083 }
 0x9e8   :  { %v4251_v31 = vsel %vm4224_vm1, %v7648_v19, %v4084_v3 }
 0x9e9   :  { %v4086_v63 = vpop.xlane.xlu1 %4085 }
 0x9ea   :  { %v4252_v13 = vsel %vm4224_vm1, %v7653_v15, %v4086_v63 }
 0x9eb   :  { %v4180_v61 = vpop.xlane.xlu0 %4179 }
 0x9ec   :  { %v4284_v59 = vsel %vm4257_vm2, %v4251_v31, %v4180_v61 }
 0x9ed   :  { %4317 = vst.msk [vmem:[%s7952_s9 + $0xd0] sm:$0xff] %vm4290_vm3, %v4284_v59  ;;  %v4182_v16 = vpop.xlane.xlu1 %4181 }
 0x9ee   :  { %v4285_v56 = vsel %vm4257_vm2, %v4252_v13, %v4182_v16 }
 0x9ef   :  { %4318 = vst.msk [vmem:[%s7952_s9 + $0xd8] sm:$0xff] %vm4290_vm3, %v4285_v56  ;;  %v4080_v19 = vpop.xlane.xlu0 %4079 }
 0x9f0   :  { %v4249_v51 = vsel %vm4224_vm1, %v7662_v4, %v4080_v19 }
 0x9f1   :  { %v4082_v39 = vpop.xlane.xlu1 %4081 }
 0x9f2   :  { %v4250_v43 = vsel %vm4224_vm1, %v7667_v11, %v4082_v39 }
 0x9f3   :  { %v4176_v0 = vpop.xlane.xlu0 %4175 }
 0x9f4   :  { %v4282_v15 = vsel %vm4257_vm2, %v4249_v51, %v4176_v0 }
 0x9f5   :  { %4315 = vst.msk [vmem:[%s7952_s9 + $0xc0] sm:$0xff] %vm4290_vm3, %v4282_v15  ;;  %v4178_v24 = vpop.xlane.xlu1 %4177 }
 0x9f6   :  { %v4283_v5 = vsel %vm4257_vm2, %v4250_v43, %v4178_v24 }
 0x9f7   :  { %4316 = vst.msk [vmem:[%s7952_s9 + $0xc8] sm:$0xff] %vm4290_vm3, %v4283_v5  ;;  %v4092_v4 = vpop.xlane.xlu0 %4091 }
 0x9f8   :  { %v4255_v40 = vsel %vm4224_vm1, %v7676_v57, %v4092_v4 }
 0x9f9   :  { %v4094_v35 = vpop.xlane.xlu1 %4093 }
 0x9fb   :  { %v4088_v20 = vpop.xlane.xlu0 %4087 }
 0x9fc   :  { %v4253_v11 = vsel %vm4224_vm1, %v7682_v22, %v4088_v20 }
 0x9fd   :  { %v4090_v9 = vpop.xlane.xlu1 %4089 }
 0x9fe   :  { %v4254_v42 = vsel %vm4224_vm1, %v7685_v47, %v4090_v9  ;;  %v4256_v47 = vsel %vm4224_vm1, %v7679_v32, %v4094_v35 }
 0x9ff   :  { %v4184_v49 = vpop.xlane.xlu0 %4183 }
 0xa00   :  { %v4286_v37 = vsel %vm4257_vm2, %v4253_v11, %v4184_v49 }
 0xa01   :  { %4319 = vst.msk [vmem:[%s7952_s9 + $0xe0] sm:$0xff] %vm4290_vm3, %v4286_v37  ;;  %v4186_v54 = vpop.xlane.xlu1 %4185 }
 0xa02   :  { %v4287_v53 = vsel %vm4257_vm2, %v4254_v42, %v4186_v54 }
 0xa03   :  { %4320 = vst.msk [vmem:[%s7952_s9 + $0xe8] sm:$0xff] %vm4290_vm3, %v4287_v53  ;;  %v4188_v22 = vpop.xlane.xlu0 %4187 }
 0xa04   :  { %v4288_v28 = vsel %vm4257_vm2, %v4255_v40, %v4188_v22 }
 0xa05   :  { %4321 = vst.msk [vmem:[%s7952_s9 + $0xf0] sm:$0xff] %vm4290_vm3, %v4288_v28  ;;  %v4190_v48 = vpop.xlane.xlu1 %4189 }
 0xa06   :  { %v4289_v38 = vsel %vm4257_vm2, %v4256_v47, %v4190_v48 }
 0xa07   :  { %4322 = vst.msk [vmem:[%s7952_s9 + $0xf8] sm:$0xff] %vm4290_vm3, %v4289_v38 }
 0xa08   :  { %5611 = dma.done.wait [#allocation7], 4096 }
 0xa09   :  { %5612 = vsyncadd [#allocation7], 4294963200 }
 0xa0a   :  { %5613 = dma.done.wait [#allocation7 + $0x1], 8192 }
 0xa0b   :  { %5614 = vsyncadd [#allocation7 + $0x1], 4294959104 }
 0xa0c   :  { %4334 = vsyncmov [#allocation6] }
 0xa0f   :  { %s4335_s18 = vpop.sfrf %4334 }
 0xa10   :  { %p4556_p2 = scmp.ne.s32.totalorder %s4335_s18, 0 }
 0xa12   :  { %4339 = shalt.err (%p4556_p2)  }
 0xa13   :  { %4341 = vsyncmov [#allocation6 + $0x1] }
 0xa16   :  { %s4342_s3 = vpop.sfrf %4341 }
 0xa17   :  { %p4557_p3 = scmp.ne.s32.totalorder %s4342_s3, 0 }
 0xa19   :  { %4346 = shalt.err (%p4557_p3)  }
 0xa1a   :  { %4347 = vsyncmov [#allocation7] }
 0xa1d   :  { %s4348_s19 = vpop.sfrf %4347 }
 0xa1e   :  { %p4558_p4 = scmp.ne.s32.totalorder %s4348_s19, 0 }
 0xa20   :  { %4352 = shalt.err (%p4558_p4)  }
 0xa21   :  { %4354 = vsyncmov [#allocation7 + $0x1] }
 0xa24   :  { %s4355_s20 = vpop.sfrf %4354 }
 0xa25   :  { %p4559_p5 = scmp.ne.s32.totalorder %s4355_s20, 0 }
 0xa27   :  { %4359 = shalt.err (%p4559_p5)  }

</bundles_post_ra>
